<compile_context>
chip_gen: v5e
topology: v5e:2x2
jax: 0.10.0
libtpu: 0.0.40
codegen_flags: <defaults>
</compile_context>

<pallas_src>
import functools

import jax
import jax.numpy as jnp
import numpy as np
from jax.experimental import pallas as pl
from jax.experimental.pallas import tpu as pltpu

_EPS = 1e-5
_BN_INV = 1.0 / (1.0 + _EPS) ** 0.5  # inference BatchNorm with running stats (0, 1)


def _vmem():
    return pl.BlockSpec(memory_space=pltpu.MemorySpace.VMEM)


def _layer_norm(x, g, b):
    mu = jnp.mean(x, axis=-1, keepdims=True)
    var = jnp.mean((x - mu) ** 2, axis=-1, keepdims=True)
    return (x - mu) * jax.lax.rsqrt(var + _EPS) * g + b


def _swish(x):
    return x * jax.nn.sigmoid(x)


# ----------------------------- fused kernel -----------------------------

def _classifier_kernel(
        mels_ref,        # (R, n_mels)                  flat rows, T-major / B-minor
        prenet_ln_ref,   # (n_mels+1+10, d)             prenet W, b, 5x(LN gamma, beta)
        ffw1_ref,        # (2d+2, ffh)                  ff1_w1,b1, ff2_w1,b1
        to_d_ref,        # (2*ffh+inner+cinner+4, d)    ff1_w2,b2, wo,bo, pw2,b, ff2_w2,b2
        wqkv_ref,        # (d, 3*inner)
        rel_ref,         # (dh, n*n)                    Shaw rel-pos, column i*n+j
        mask_ref,        # (R, R)                       block-diagonal additive bias
        masks_ref,       # (R, conv_k + n)              conv-tap validity | rowsel one-hot
        pw1_ref,         # (d+1, 2*cinner)
        dw_ref,          # (conv_k+1, cinner)           folded depthwise conv W, bias
        pred_ref,        # (d+1, P)                     lane-padded prediction head
        o_ref,           # (n, P)
        *, heads, dim_head, conv_k, n_seq):
    f32 = jnp.float32
    R, n_mels = mels_ref.shape
    d = prenet_ln_ref.shape[1]
    ffh = ffw1_ref.shape[1]
    cinner = dw_ref.shape[1]
    inner = heads * dim_head
    n_blocks = R // n_seq
    pad_l = conv_k // 2
    scale = float(dim_head) ** -0.5

    def mm(a, w):
        return jnp.dot(a, w, preferred_element_type=f32)

    ln0 = n_mels + 1

    def ln_gb(k):  # k: 0=ff1, 1=attn, 2=conv, 3=ff2, 4=post
        g = prenet_ln_ref[ln0 + 2 * k:ln0 + 2 * k + 1, :]
        b = prenet_ln_ref[ln0 + 2 * k + 1:ln0 + 2 * k + 2, :]
        return g, b

    allm = masks_ref[...]
    conv_masks = allm[:, :conv_k]          # (R, conv_k)
    rowsel = allm[:, conv_k:]              # (R, n_seq) one-hot conformer-seq position

    # static row offsets into the packed "-> d_model" slab
    o_ff1w2 = 0
    o_wo = ffh + 1
    o_pw2 = o_wo + inner + 1
    o_ff2w2 = o_pw2 + cinner + 1

    # ---------------- prenet ----------------
    x = mm(mels_ref[...], prenet_ln_ref[:n_mels, :]) + prenet_ln_ref[n_mels:n_mels + 1, :]

    # ---------------- ff1: x += 0.5 * FF(LN(x)) ----------------
    g, be = ln_gb(0)
    h = _layer_norm(x, g, be)
    h = _swish(mm(h, ffw1_ref[:d, :]) + ffw1_ref[d:d + 1, :])
    h = mm(h, to_d_ref[o_ff1w2:o_ff1w2 + ffh, :]) + to_d_ref[o_ff1w2 + ffh:o_ff1w2 + ffh + 1, :]
    x = x + 0.5 * h

    # ---------------- attention: x += Attn(LN(x)) ----------------
    g, be = ln_gb(1)
    hln = _layer_norm(x, g, be)
    qkv = mm(hln, wqkv_ref[...])           # (R, 3*inner) fused QKV (no bias in reference)
    mask = mask_ref[...]
    rel_flat = rel_ref[...]                # (dh, n*n)

    heads_out = []
    for hh in range(heads):
        lo = hh * dim_head
        qh = qkv[:, lo:lo + dim_head] * scale
        kh = qkv[:, inner + lo:inner + lo + dim_head]
        vh = qkv[:, 2 * inner + lo:2 * inner + lo + dim_head]
        # content logits: single q.k^T matmul (hoisted; rowsel partitions rows)
        logits = mask + jax.lax.dot_general(
            qh, kh, (((1,), (1,)), ((), ())), preferred_element_type=f32)
        # Shaw relative-position logits: rl[r, i*n+j] = q[r].rel[i, j]
        rl = mm(qh, rel_flat)              # (R, n*n)
        rel_rows = jnp.zeros((R, n_seq), f32)
        for i in range(n_seq):
            rel_rows = rel_rows + rowsel[:, i:i + 1] * rl[:, i * n_seq:(i + 1) * n_seq]
        logits = logits + jnp.tile(rel_rows, (1, n_blocks))
        m = jnp.max(logits, axis=-1, keepdims=True)
        probs = jnp.exp(logits - m)
        probs = probs * pl.reciprocal(jnp.sum(probs, axis=-1, keepdims=True), approx=True)
        heads_out.append(mm(probs, vh))    # (R, dim_head)
    oh_all = jnp.concatenate(heads_out, axis=-1)                     # (R, inner)
    x = (x + mm(oh_all, to_d_ref[o_wo:o_wo + inner, :])
         + to_d_ref[o_wo + inner:o_wo + inner + 1, :])

    # ---------------- conv module: x += Conv(LN(x)) ----------------
    g, be = ln_gb(2)
    h = _layer_norm(x, g, be)
    h = mm(h, pw1_ref[:d, :]) + pw1_ref[d:d + 1, :]                  # pointwise -> 2*cinner
    hg = h[:, :cinner] * jax.nn.sigmoid(h[:, cinner:])               # GLU over channels
    dw = dw_ref[...]
    acc = jnp.zeros((R, cinner), f32)
    for kk in range(conv_k):               # depthwise conv along the conformer-seq axis
        shift = (pad_l - kk) % R
        rolled = pltpu.roll(hg, shift=shift, axis=0) if shift else hg
        acc = acc + rolled * dw[kk:kk + 1, :] * conv_masks[:, kk:kk + 1]
    acc = acc + dw[conv_k:conv_k + 1, :]   # conv bias + folded inference BatchNorm
    h = _swish(acc)
    h = mm(h, to_d_ref[o_pw2:o_pw2 + cinner, :]) + to_d_ref[o_pw2 + cinner:o_pw2 + cinner + 1, :]
    x = x + h

    # ---------------- ff2: x += 0.5 * FF(LN(x)) ----------------
    g, be = ln_gb(3)
    h = _layer_norm(x, g, be)
    h = _swish(mm(h, ffw1_ref[d + 1:2 * d + 1, :]) + ffw1_ref[2 * d + 1:2 * d + 2, :])
    h = mm(h, to_d_ref[o_ff2w2:o_ff2w2 + ffh, :]) + to_d_ref[o_ff2w2 + ffh:o_ff2w2 + ffh + 1, :]
    x = x + 0.5 * h

    # ---------------- post norm + mean over time + prediction head ----------------
    g, be = ln_gb(4)
    x = _layer_norm(x, g, be)
    # mean over the original T axis: stats[j] = (1/T) * sum_r rowsel[r, j] * x[r]
    stats = jax.lax.dot_general(
        rowsel, x, (((0,), (0,)), ((), ())), preferred_element_type=f32) * (1.0 / n_blocks)
    logits = mm(stats, pred_ref[:d, :]) + pred_ref[d:d + 1, :]       # lane-dense (n, P)
    o_ref[...] = logits.astype(o_ref.dtype)


# ----------------------------- parameters -----------------------------

def init_params(key, d_model, n_spks, dim_head, heads, ff_mult, conv_exp, conv_k,
                n_mels=40, max_pos=512):
    inner = dim_head * heads
    ffh = d_model * ff_mult
    cinner = d_model * conv_exp
    ks = iter(jax.random.split(key, 32))

    def w(shape, s=0.1):
        return (s * jax.random.normal(next(ks), shape)).astype(jnp.float32)

    ones = lambda n: jnp.ones((1, n), jnp.float32)
    zeros = lambda n: jnp.zeros((1, n), jnp.float32)

    return {
        "prenet_w": w((n_mels, d_model)), "prenet_b": w((1, d_model)),
        # ff1 (Scale 0.5, PreNorm)
        "ff1_ln_g": ones(d_model), "ff1_ln_b": zeros(d_model),
        "ff1_w1": w((d_model, ffh)), "ff1_b1": w((1, ffh)),
        "ff1_w2": w((ffh, d_model)), "ff1_b2": w((1, d_model)),
        # attention (PreNorm); to_q / to_kv have no bias
        "attn_ln_g": ones(d_model), "attn_ln_b": zeros(d_model),
        "wq": w((d_model, inner)), "wk": w((d_model, inner)), "wv": w((d_model, inner)),
        "wo": w((inner, d_model)), "bo": w((1, d_model)),
        "rel_emb": w((2 * max_pos + 1, dim_head), 0.02),
        # conv module
        "conv_ln_g": ones(d_model), "conv_ln_b": zeros(d_model),
        "pw1_w": w((d_model, 2 * cinner)), "pw1_b": w((1, 2 * cinner)),
        "dw_w": w((conv_k, cinner)), "dw_b": w((1, cinner)),
        "bn_g": ones(cinner), "bn_b": zeros(cinner),
        "pw2_w": w((cinner, d_model)), "pw2_b": w((1, d_model)),
        # ff2
        "ff2_ln_g": ones(d_model), "ff2_ln_b": zeros(d_model),
        "ff2_w1": w((d_model, ffh)), "ff2_b1": w((1, ffh)),
        "ff2_w2": w((ffh, d_model)), "ff2_b2": w((1, d_model)),
        # post norm + prediction head
        "post_ln_g": ones(d_model), "post_ln_b": zeros(d_model),
        "pred_w": w((d_model, n_spks)), "pred_b": w((1, n_spks)),
    }


# ----------------------------- forward (wrapper + single fused pallas_call) -----------------------------

def classifier_forward(mels, p, *, heads, dim_head, conv_k, max_pos=512):
    B, T, n_mels = mels.shape
    d = p["prenet_w"].shape[1]
    inner = heads * dim_head
    ffh = p["ff1_w1"].shape[1]
    cinner = p["dw_w"].shape[1]
    n_spks = p["pred_w"].shape[1]
    n, b = B, T                          # conformer sequence / batch after permute(1, 0, 2)
    R = b * n
    pad_l = conv_k // 2                  # calc_same_padding

    # input relayout: (B, T, n_mels) -> flat (T*B, n_mels), T-major / B-minor rows
    mels2d = jnp.transpose(mels, (1, 0, 2)).reshape(R, n_mels)

    # ----- packed parameter slabs (bias rows appended; LN gammas/betas stacked) -----
    prenet_ln = jnp.concatenate([
        p["prenet_w"], p["prenet_b"],
        p["ff1_ln_g"], p["ff1_ln_b"], p["attn_ln_g"], p["attn_ln_b"],
        p["conv_ln_g"], p["conv_ln_b"], p["ff2_ln_g"], p["ff2_ln_b"],
        p["post_ln_g"], p["post_ln_b"]], axis=0)
    ffw1 = jnp.concatenate([p["ff1_w1"], p["ff1_b1"], p["ff2_w1"], p["ff2_b1"]], axis=0)
    to_d = jnp.concatenate([
        p["ff1_w2"], p["ff1_b2"], p["wo"], p["bo"],
        p["pw2_w"], p["pw2_b"], p["ff2_w2"], p["ff2_b2"]], axis=0)
    wqkv = jnp.concatenate([p["wq"], p["wk"], p["wv"]], axis=1)      # (d, 3*inner), no bias
    pw1 = jnp.concatenate([p["pw1_w"], p["pw1_b"]], axis=0)

    # fold inference BatchNorm1d (running stats 0/1) into the depthwise conv
    g_scale = p["bn_g"] * _BN_INV
    dw_pack = jnp.concatenate([p["dw_w"] * g_scale,
                               p["dw_b"] * g_scale + p["bn_b"]], axis=0)  # (K+1, cinner)

    # prediction head padded to a lane-dense output width
    P = ((max(n_spks, 1) + 127) // 128) * 128
    pred = jnp.concatenate([p["pred_w"], p["pred_b"]], axis=0)
    pred = jnp.pad(pred, ((0, 0), (0, P - n_spks)))

    # Shaw relative positions, flattened: rel_flat[:, i*n + j] = rel_emb[clip(i - j) + max_pos]
    idx = np.arange(n)
    dist = np.clip(idx[:, None] - idx[None, :], -max_pos, max_pos) + max_pos
    rel_flat = jnp.take(p["rel_emb"], jnp.asarray(dist.reshape(-1)), axis=0).T   # (dh, n*n)

    # ----- static (compile-time) masks -----
    r = np.arange(R)
    s = r % n                                                   # conformer seq pos (= batch idx)
    blk = r // n                                                # time-block index
    mask_bias = np.where(blk[:, None] == blk[None, :], 0.0, -1e30).astype(np.float32)
    masks = np.zeros((R, conv_k + n), np.float32)
    for kk in range(conv_k):                                    # depthwise-conv tap validity
        sh = s + (kk - pad_l)
        masks[:, kk] = ((sh >= 0) & (sh < n)).astype(np.float32)
    masks[np.arange(R), conv_k + s] = 1.0                       # one-hot row selector / mean weights

    inputs = [mels2d, prenet_ln, ffw1, to_d, wqkv, rel_flat,
              jnp.asarray(mask_bias), jnp.asarray(masks), pw1, dw_pack, pred]

    in_bytes = sum(int(np.prod(a.shape)) * 4 for a in inputs)
    out_bytes = n * P * 4
    vmem_limit = int(min(64 * 1024 * 1024,
                         max(8 * 1024 * 1024, 8 * (in_bytes + out_bytes))))

    kernel = functools.partial(_classifier_kernel, heads=heads, dim_head=dim_head,
                               conv_k=conv_k, n_seq=n)
    out = pl.pallas_call(
        kernel,
        out_shape=jax.ShapeDtypeStruct((n, P), jnp.float32),
        in_specs=[_vmem()] * len(inputs),
        out_specs=_vmem(),
        compiler_params=pltpu.CompilerParams(vmem_limit_bytes=vmem_limit),
    )(*inputs)
    return out[:, :n_spks]


# ----------------------------- demo -----------------------------

if __name__ == "__main__":
    B, T, N_MELS = 2, 16, 40
    d_model, n_spks, dim_head, heads = 32, 10, 8, 4
    ff_mult, conv_exp, conv_k = 2, 2, 7

    key = jax.random.PRNGKey(0)
    pkey, xkey = jax.random.split(key)
    params = init_params(pkey, d_model, n_spks, dim_head, heads, ff_mult, conv_exp,
                         conv_k, n_mels=N_MELS)
    mels = jax.random.normal(xkey, (B, T, N_MELS), jnp.float32)

    fwd = jax.jit(functools.partial(classifier_forward,
                                    heads=heads, dim_head=dim_head, conv_k=conv_k))
    out = fwd(mels, params)
    jax.block_until_ready(out)
    assert out.shape == (B, n_spks), out.shape
    assert bool(jnp.all(jnp.isfinite(out)))
    print("KERNEL_OK")
</pallas_src>

<mosaic_0001>
module attributes {stable_mosaic.version = 11 : i64} {
  func.func @_classifier_kernel(%arg0: memref<32x40xf32, #tpu.memory_space<vmem>>, %arg1: memref<51x32xf32, #tpu.memory_space<vmem>>, %arg2: memref<66x64xf32, #tpu.memory_space<vmem>>, %arg3: memref<228x32xf32, #tpu.memory_space<vmem>>, %arg4: memref<32x96xf32, #tpu.memory_space<vmem>>, %arg5: memref<8x4xf32, #tpu.memory_space<vmem>>, %arg6: memref<32x32xf32, #tpu.memory_space<vmem>>, %arg7: memref<32x9xf32, #tpu.memory_space<vmem>>, %arg8: memref<33x128xf32, #tpu.memory_space<vmem>>, %arg9: memref<8x64xf32, #tpu.memory_space<vmem>>, %arg10: memref<33x128xf32, #tpu.memory_space<vmem>>, %arg11: memref<2x128xf32, #tpu.memory_space<vmem>>) attributes {dimension_semantics = [], scalar_prefetch = 0 : i64, scratch_operands = 0 : i64, tpu.core_type = #tpu.core_type<tc>} {
    %c0 = arith.constant 0 : index
    %c0_0 = arith.constant 0 : index
    %0 = vector.load %arg7[%c0, %c0_0] : memref<32x9xf32, #tpu.memory_space<vmem>>, vector<32x9xf32>
    %1 = vector.extract_strided_slice %0 {offsets = [0, 0], sizes = [32, 7], strides = [1, 1]} : vector<32x9xf32> to vector<32x7xf32>
    %2 = vector.extract_strided_slice %0 {offsets = [0, 7], sizes = [32, 2], strides = [1, 1]} : vector<32x9xf32> to vector<32x2xf32>
    %c0_1 = arith.constant 0 : index
    %c0_2 = arith.constant 0 : index
    %3 = vector.load %arg0[%c0_1, %c0_2] : memref<32x40xf32, #tpu.memory_space<vmem>>, vector<32x40xf32>
    %c0_3 = arith.constant 0 : index
    %c0_4 = arith.constant 0 : index
    %4 = vector.load %arg1[%c0_3, %c0_4] : memref<51x32xf32, #tpu.memory_space<vmem>>, vector<40x32xf32>
    %cst = arith.constant dense<0.000000e+00> : vector<32x32xf32>
    %5 = tpu.matmul %3, %4, %cst {dimension_numbers = #tpu.dot_dimension_numbers<[1], [0], [0], [1], [0, 0, 1, 1], [], []>} : vector<32x40xf32>, vector<40x32xf32>, vector<32x32xf32> -> vector<32x32xf32>
    %c40 = arith.constant 40 : index
    %c0_5 = arith.constant 0 : index
    %6 = vector.load %arg1[%c40, %c0_5] : memref<51x32xf32, #tpu.memory_space<vmem>>, vector<1x32xf32>
    %7 = vector.broadcast %6 : vector<1x32xf32> to vector<32x32xf32>
    %8 = arith.addf %5, %7 : vector<32x32xf32>
    %c41 = arith.constant 41 : index
    %c0_6 = arith.constant 0 : index
    %9 = vector.load %arg1[%c41, %c0_6] : memref<51x32xf32, #tpu.memory_space<vmem>>, vector<1x32xf32>
    %c42 = arith.constant 42 : index
    %c0_7 = arith.constant 0 : index
    %10 = vector.load %arg1[%c42, %c0_7] : memref<51x32xf32, #tpu.memory_space<vmem>>, vector<1x32xf32>
    %cst_8 = arith.constant dense<0.000000e+00> : vector<32xf32>
    %11 = vector.multi_reduction <add>, %8, %cst_8 [1] : vector<32x32xf32> to vector<32xf32>
    %12 = vector.shape_cast %11 : vector<32xf32> to vector<32x1xf32>
    %cst_9 = arith.constant 3.200000e+01 : f32
    %13 = vector.broadcast %cst_9 : f32 to vector<32x1xf32>
    %14 = arith.divf %12, %13 : vector<32x1xf32>
    %15 = vector.broadcast %14 : vector<32x1xf32> to vector<32x32xf32>
    %16 = arith.subf %8, %15 : vector<32x32xf32>
    %17 = arith.mulf %16, %16 : vector<32x32xf32>
    %cst_10 = arith.constant dense<0.000000e+00> : vector<32xf32>
    %18 = vector.multi_reduction <add>, %17, %cst_10 [1] : vector<32x32xf32> to vector<32xf32>
    %19 = vector.shape_cast %18 : vector<32xf32> to vector<32x1xf32>
    %cst_11 = arith.constant 3.200000e+01 : f32
    %20 = vector.broadcast %cst_11 : f32 to vector<32x1xf32>
    %21 = arith.divf %19, %20 : vector<32x1xf32>
    %22 = vector.broadcast %14 : vector<32x1xf32> to vector<32x32xf32>
    %23 = arith.subf %8, %22 : vector<32x32xf32>
    %cst_12 = arith.constant 9.99999974E-6 : f32
    %24 = vector.broadcast %cst_12 : f32 to vector<32x1xf32>
    %25 = arith.addf %21, %24 : vector<32x1xf32>
    %26 = math.rsqrt %25 : vector<32x1xf32>
    %27 = vector.broadcast %26 : vector<32x1xf32> to vector<32x32xf32>
    %28 = arith.mulf %23, %27 : vector<32x32xf32>
    %29 = vector.broadcast %9 : vector<1x32xf32> to vector<32x32xf32>
    %30 = arith.mulf %28, %29 : vector<32x32xf32>
    %31 = vector.broadcast %10 : vector<1x32xf32> to vector<32x32xf32>
    %32 = arith.addf %30, %31 : vector<32x32xf32>
    %c0_13 = arith.constant 0 : index
    %c0_14 = arith.constant 0 : index
    %33 = vector.load %arg2[%c0_13, %c0_14] : memref<66x64xf32, #tpu.memory_space<vmem>>, vector<32x64xf32>
    %cst_15 = arith.constant dense<0.000000e+00> : vector<32x64xf32>
    %34 = tpu.matmul %32, %33, %cst_15 {dimension_numbers = #tpu.dot_dimension_numbers<[1], [0], [0], [1], [0, 0, 1, 1], [], []>} : vector<32x32xf32>, vector<32x64xf32>, vector<32x64xf32> -> vector<32x64xf32>
    %c32 = arith.constant 32 : index
    %c0_16 = arith.constant 0 : index
    %35 = vector.load %arg2[%c32, %c0_16] : memref<66x64xf32, #tpu.memory_space<vmem>>, vector<1x64xf32>
    %36 = vector.broadcast %35 : vector<1x64xf32> to vector<32x64xf32>
    %37 = arith.addf %34, %36 : vector<32x64xf32>
    %38 = arith.negf %37 : vector<32x64xf32>
    %39 = math.exp %38 : vector<32x64xf32>
    %cst_17 = arith.constant 1.000000e+00 : f32
    %40 = vector.broadcast %cst_17 : f32 to vector<32x64xf32>
    %41 = arith.addf %40, %39 : vector<32x64xf32>
    %42 = arith.divf %40, %41 : vector<32x64xf32>
    %43 = arith.mulf %37, %42 : vector<32x64xf32>
    %c0_18 = arith.constant 0 : index
    %c0_19 = arith.constant 0 : index
    %44 = vector.load %arg3[%c0_18, %c0_19] : memref<228x32xf32, #tpu.memory_space<vmem>>, vector<64x32xf32>
    %cst_20 = arith.constant dense<0.000000e+00> : vector<32x32xf32>
    %45 = tpu.matmul %43, %44, %cst_20 {dimension_numbers = #tpu.dot_dimension_numbers<[1], [0], [0], [1], [0, 0, 1, 1], [], []>} : vector<32x64xf32>, vector<64x32xf32>, vector<32x32xf32> -> vector<32x32xf32>
    %c64 = arith.constant 64 : index
    %c0_21 = arith.constant 0 : index
    %46 = vector.load %arg3[%c64, %c0_21] : memref<228x32xf32, #tpu.memory_space<vmem>>, vector<1x32xf32>
    %47 = vector.broadcast %46 : vector<1x32xf32> to vector<32x32xf32>
    %48 = arith.addf %45, %47 : vector<32x32xf32>
    %cst_22 = arith.constant 5.000000e-01 : f32
    %49 = vector.broadcast %cst_22 : f32 to vector<32x32xf32>
    %50 = arith.mulf %49, %48 : vector<32x32xf32>
    %51 = arith.addf %8, %50 : vector<32x32xf32>
    %c43 = arith.constant 43 : index
    %c0_23 = arith.constant 0 : index
    %52 = vector.load %arg1[%c43, %c0_23] : memref<51x32xf32, #tpu.memory_space<vmem>>, vector<1x32xf32>
    %c44 = arith.constant 44 : index
    %c0_24 = arith.constant 0 : index
    %53 = vector.load %arg1[%c44, %c0_24] : memref<51x32xf32, #tpu.memory_space<vmem>>, vector<1x32xf32>
    %cst_25 = arith.constant dense<0.000000e+00> : vector<32xf32>
    %54 = vector.multi_reduction <add>, %51, %cst_25 [1] : vector<32x32xf32> to vector<32xf32>
    %55 = vector.shape_cast %54 : vector<32xf32> to vector<32x1xf32>
    %cst_26 = arith.constant 3.200000e+01 : f32
    %56 = vector.broadcast %cst_26 : f32 to vector<32x1xf32>
    %57 = arith.divf %55, %56 : vector<32x1xf32>
    %58 = vector.broadcast %57 : vector<32x1xf32> to vector<32x32xf32>
    %59 = arith.subf %51, %58 : vector<32x32xf32>
    %60 = arith.mulf %59, %59 : vector<32x32xf32>
    %cst_27 = arith.constant dense<0.000000e+00> : vector<32xf32>
    %61 = vector.multi_reduction <add>, %60, %cst_27 [1] : vector<32x32xf32> to vector<32xf32>
    %62 = vector.shape_cast %61 : vector<32xf32> to vector<32x1xf32>
    %cst_28 = arith.constant 3.200000e+01 : f32
    %63 = vector.broadcast %cst_28 : f32 to vector<32x1xf32>
    %64 = arith.divf %62, %63 : vector<32x1xf32>
    %65 = vector.broadcast %57 : vector<32x1xf32> to vector<32x32xf32>
    %66 = arith.subf %51, %65 : vector<32x32xf32>
    %cst_29 = arith.constant 9.99999974E-6 : f32
    %67 = vector.broadcast %cst_29 : f32 to vector<32x1xf32>
    %68 = arith.addf %64, %67 : vector<32x1xf32>
    %69 = math.rsqrt %68 : vector<32x1xf32>
    %70 = vector.broadcast %69 : vector<32x1xf32> to vector<32x32xf32>
    %71 = arith.mulf %66, %70 : vector<32x32xf32>
    %72 = vector.broadcast %52 : vector<1x32xf32> to vector<32x32xf32>
    %73 = arith.mulf %71, %72 : vector<32x32xf32>
    %74 = vector.broadcast %53 : vector<1x32xf32> to vector<32x32xf32>
    %75 = arith.addf %73, %74 : vector<32x32xf32>
    %c0_30 = arith.constant 0 : index
    %c0_31 = arith.constant 0 : index
    %76 = vector.load %arg4[%c0_30, %c0_31] : memref<32x96xf32, #tpu.memory_space<vmem>>, vector<32x96xf32>
    %cst_32 = arith.constant dense<0.000000e+00> : vector<32x96xf32>
    %77 = tpu.matmul %75, %76, %cst_32 {dimension_numbers = #tpu.dot_dimension_numbers<[1], [0], [0], [1], [0, 0, 1, 1], [], []>} : vector<32x32xf32>, vector<32x96xf32>, vector<32x96xf32> -> vector<32x96xf32>
    %c0_33 = arith.constant 0 : index
    %c0_34 = arith.constant 0 : index
    %78 = vector.load %arg6[%c0_33, %c0_34] : memref<32x32xf32, #tpu.memory_space<vmem>>, vector<32x32xf32>
    %c0_35 = arith.constant 0 : index
    %c0_36 = arith.constant 0 : index
    %79 = vector.load %arg5[%c0_35, %c0_36] : memref<8x4xf32, #tpu.memory_space<vmem>>, vector<8x4xf32>
    %80 = vector.extract_strided_slice %77 {offsets = [0, 0], sizes = [32, 8], strides = [1, 1]} : vector<32x96xf32> to vector<32x8xf32>
    %cst_37 = arith.constant 0.353553385 : f32
    %81 = vector.broadcast %cst_37 : f32 to vector<32x8xf32>
    %82 = arith.mulf %80, %81 : vector<32x8xf32>
    %83 = vector.extract_strided_slice %77 {offsets = [0, 32], sizes = [32, 8], strides = [1, 1]} : vector<32x96xf32> to vector<32x8xf32>
    %84 = vector.extract_strided_slice %77 {offsets = [0, 64], sizes = [32, 8], strides = [1, 1]} : vector<32x96xf32> to vector<32x8xf32>
    %cst_38 = arith.constant dense<0.000000e+00> : vector<32x32xf32>
    %85 = tpu.matmul %82, %83, %cst_38 {dimension_numbers = #tpu.dot_dimension_numbers<[1], [1], [0], [0], [0, 0, 1, 0], [], []>} : vector<32x8xf32>, vector<32x8xf32>, vector<32x32xf32> -> vector<32x32xf32>
    %86 = arith.addf %78, %85 : vector<32x32xf32>
    %cst_39 = arith.constant dense<0.000000e+00> : vector<32x4xf32>
    %87 = tpu.matmul %82, %79, %cst_39 {dimension_numbers = #tpu.dot_dimension_numbers<[1], [0], [0], [1], [0, 0, 1, 1], [], []>} : vector<32x8xf32>, vector<8x4xf32>, vector<32x4xf32> -> vector<32x4xf32>
    %cst_40 = arith.constant 0.000000e+00 : f32
    %88 = vector.broadcast %cst_40 : f32 to vector<32x2xf32>
    %89 = vector.extract_strided_slice %2 {offsets = [0, 0], sizes = [32, 1], strides = [1, 1]} : vector<32x2xf32> to vector<32x1xf32>
    %90 = vector.extract_strided_slice %87 {offsets = [0, 0], sizes = [32, 2], strides = [1, 1]} : vector<32x4xf32> to vector<32x2xf32>
    %91 = vector.broadcast %89 : vector<32x1xf32> to vector<32x2xf32>
    %92 = arith.mulf %91, %90 : vector<32x2xf32>
    %93 = arith.addf %88, %92 : vector<32x2xf32>
    %94 = vector.extract_strided_slice %2 {offsets = [0, 1], sizes = [32, 1], strides = [1, 1]} : vector<32x2xf32> to vector<32x1xf32>
    %95 = vector.extract_strided_slice %87 {offsets = [0, 2], sizes = [32, 2], strides = [1, 1]} : vector<32x4xf32> to vector<32x2xf32>
    %96 = vector.broadcast %94 : vector<32x1xf32> to vector<32x2xf32>
    %97 = arith.mulf %96, %95 : vector<32x2xf32>
    %98 = arith.addf %93, %97 : vector<32x2xf32>
    %99 = tpu.concatenate %98, %98, %98, %98, %98, %98, %98, %98, %98, %98, %98, %98, %98, %98, %98, %98 in 1 : vector<32x2xf32>, vector<32x2xf32>, vector<32x2xf32>, vector<32x2xf32>, vector<32x2xf32>, vector<32x2xf32>, vector<32x2xf32>, vector<32x2xf32>, vector<32x2xf32>, vector<32x2xf32>, vector<32x2xf32>, vector<32x2xf32>, vector<32x2xf32>, vector<32x2xf32>, vector<32x2xf32>, vector<32x2xf32> -> vector<32x32xf32>
    %100 = arith.addf %86, %99 : vector<32x32xf32>
    %cst_41 = arith.constant dense<0xFF800000> : vector<32xf32>
    %101 = vector.multi_reduction <maximumf>, %100, %cst_41 [1] : vector<32x32xf32> to vector<32xf32>
    %102 = vector.shape_cast %101 : vector<32xf32> to vector<32x1xf32>
    %103 = vector.broadcast %102 : vector<32x1xf32> to vector<32x32xf32>
    %104 = arith.subf %100, %103 : vector<32x32xf32>
    %105 = math.exp %104 : vector<32x32xf32>
    %cst_42 = arith.constant dense<0.000000e+00> : vector<32xf32>
    %106 = vector.multi_reduction <add>, %105, %cst_42 [1] : vector<32x32xf32> to vector<32xf32>
    %107 = vector.shape_cast %106 : vector<32xf32> to vector<32x1xf32>
    %108 = tpu.reciprocal %107 {approx = true} : vector<32x1xf32> -> vector<32x1xf32>
    %109 = vector.broadcast %108 : vector<32x1xf32> to vector<32x32xf32>
    %110 = arith.mulf %105, %109 : vector<32x32xf32>
    %cst_43 = arith.constant dense<0.000000e+00> : vector<32x8xf32>
    %111 = tpu.matmul %110, %84, %cst_43 {dimension_numbers = #tpu.dot_dimension_numbers<[1], [0], [0], [1], [0, 0, 1, 1], [], []>} : vector<32x32xf32>, vector<32x8xf32>, vector<32x8xf32> -> vector<32x8xf32>
    %112 = vector.extract_strided_slice %77 {offsets = [0, 8], sizes = [32, 8], strides = [1, 1]} : vector<32x96xf32> to vector<32x8xf32>
    %cst_44 = arith.constant 0.353553385 : f32
    %113 = vector.broadcast %cst_44 : f32 to vector<32x8xf32>
    %114 = arith.mulf %112, %113 : vector<32x8xf32>
    %115 = vector.extract_strided_slice %77 {offsets = [0, 40], sizes = [32, 8], strides = [1, 1]} : vector<32x96xf32> to vector<32x8xf32>
    %116 = vector.extract_strided_slice %77 {offsets = [0, 72], sizes = [32, 8], strides = [1, 1]} : vector<32x96xf32> to vector<32x8xf32>
    %cst_45 = arith.constant dense<0.000000e+00> : vector<32x32xf32>
    %117 = tpu.matmul %114, %115, %cst_45 {dimension_numbers = #tpu.dot_dimension_numbers<[1], [1], [0], [0], [0, 0, 1, 0], [], []>} : vector<32x8xf32>, vector<32x8xf32>, vector<32x32xf32> -> vector<32x32xf32>
    %118 = arith.addf %78, %117 : vector<32x32xf32>
    %cst_46 = arith.constant dense<0.000000e+00> : vector<32x4xf32>
    %119 = tpu.matmul %114, %79, %cst_46 {dimension_numbers = #tpu.dot_dimension_numbers<[1], [0], [0], [1], [0, 0, 1, 1], [], []>} : vector<32x8xf32>, vector<8x4xf32>, vector<32x4xf32> -> vector<32x4xf32>
    %cst_47 = arith.constant 0.000000e+00 : f32
    %120 = vector.broadcast %cst_47 : f32 to vector<32x2xf32>
    %121 = vector.extract_strided_slice %2 {offsets = [0, 0], sizes = [32, 1], strides = [1, 1]} : vector<32x2xf32> to vector<32x1xf32>
    %122 = vector.extract_strided_slice %119 {offsets = [0, 0], sizes = [32, 2], strides = [1, 1]} : vector<32x4xf32> to vector<32x2xf32>
    %123 = vector.broadcast %121 : vector<32x1xf32> to vector<32x2xf32>
    %124 = arith.mulf %123, %122 : vector<32x2xf32>
    %125 = arith.addf %120, %124 : vector<32x2xf32>
    %126 = vector.extract_strided_slice %2 {offsets = [0, 1], sizes = [32, 1], strides = [1, 1]} : vector<32x2xf32> to vector<32x1xf32>
    %127 = vector.extract_strided_slice %119 {offsets = [0, 2], sizes = [32, 2], strides = [1, 1]} : vector<32x4xf32> to vector<32x2xf32>
    %128 = vector.broadcast %126 : vector<32x1xf32> to vector<32x2xf32>
    %129 = arith.mulf %128, %127 : vector<32x2xf32>
    %130 = arith.addf %125, %129 : vector<32x2xf32>
    %131 = tpu.concatenate %130, %130, %130, %130, %130, %130, %130, %130, %130, %130, %130, %130, %130, %130, %130, %130 in 1 : vector<32x2xf32>, vector<32x2xf32>, vector<32x2xf32>, vector<32x2xf32>, vector<32x2xf32>, vector<32x2xf32>, vector<32x2xf32>, vector<32x2xf32>, vector<32x2xf32>, vector<32x2xf32>, vector<32x2xf32>, vector<32x2xf32>, vector<32x2xf32>, vector<32x2xf32>, vector<32x2xf32>, vector<32x2xf32> -> vector<32x32xf32>
    %132 = arith.addf %118, %131 : vector<32x32xf32>
    %cst_48 = arith.constant dense<0xFF800000> : vector<32xf32>
    %133 = vector.multi_reduction <maximumf>, %132, %cst_48 [1] : vector<32x32xf32> to vector<32xf32>
    %134 = vector.shape_cast %133 : vector<32xf32> to vector<32x1xf32>
    %135 = vector.broadcast %134 : vector<32x1xf32> to vector<32x32xf32>
    %136 = arith.subf %132, %135 : vector<32x32xf32>
    %137 = math.exp %136 : vector<32x32xf32>
    %cst_49 = arith.constant dense<0.000000e+00> : vector<32xf32>
    %138 = vector.multi_reduction <add>, %137, %cst_49 [1] : vector<32x32xf32> to vector<32xf32>
    %139 = vector.shape_cast %138 : vector<32xf32> to vector<32x1xf32>
    %140 = tpu.reciprocal %139 {approx = true} : vector<32x1xf32> -> vector<32x1xf32>
    %141 = vector.broadcast %140 : vector<32x1xf32> to vector<32x32xf32>
    %142 = arith.mulf %137, %141 : vector<32x32xf32>
    %cst_50 = arith.constant dense<0.000000e+00> : vector<32x8xf32>
    %143 = tpu.matmul %142, %116, %cst_50 {dimension_numbers = #tpu.dot_dimension_numbers<[1], [0], [0], [1], [0, 0, 1, 1], [], []>} : vector<32x32xf32>, vector<32x8xf32>, vector<32x8xf32> -> vector<32x8xf32>
    %144 = vector.extract_strided_slice %77 {offsets = [0, 16], sizes = [32, 8], strides = [1, 1]} : vector<32x96xf32> to vector<32x8xf32>
    %cst_51 = arith.constant 0.353553385 : f32
    %145 = vector.broadcast %cst_51 : f32 to vector<32x8xf32>
    %146 = arith.mulf %144, %145 : vector<32x8xf32>
    %147 = vector.extract_strided_slice %77 {offsets = [0, 48], sizes = [32, 8], strides = [1, 1]} : vector<32x96xf32> to vector<32x8xf32>
    %148 = vector.extract_strided_slice %77 {offsets = [0, 80], sizes = [32, 8], strides = [1, 1]} : vector<32x96xf32> to vector<32x8xf32>
    %cst_52 = arith.constant dense<0.000000e+00> : vector<32x32xf32>
    %149 = tpu.matmul %146, %147, %cst_52 {dimension_numbers = #tpu.dot_dimension_numbers<[1], [1], [0], [0], [0, 0, 1, 0], [], []>} : vector<32x8xf32>, vector<32x8xf32>, vector<32x32xf32> -> vector<32x32xf32>
    %150 = arith.addf %78, %149 : vector<32x32xf32>
    %cst_53 = arith.constant dense<0.000000e+00> : vector<32x4xf32>
    %151 = tpu.matmul %146, %79, %cst_53 {dimension_numbers = #tpu.dot_dimension_numbers<[1], [0], [0], [1], [0, 0, 1, 1], [], []>} : vector<32x8xf32>, vector<8x4xf32>, vector<32x4xf32> -> vector<32x4xf32>
    %cst_54 = arith.constant 0.000000e+00 : f32
    %152 = vector.broadcast %cst_54 : f32 to vector<32x2xf32>
    %153 = vector.extract_strided_slice %2 {offsets = [0, 0], sizes = [32, 1], strides = [1, 1]} : vector<32x2xf32> to vector<32x1xf32>
    %154 = vector.extract_strided_slice %151 {offsets = [0, 0], sizes = [32, 2], strides = [1, 1]} : vector<32x4xf32> to vector<32x2xf32>
    %155 = vector.broadcast %153 : vector<32x1xf32> to vector<32x2xf32>
    %156 = arith.mulf %155, %154 : vector<32x2xf32>
    %157 = arith.addf %152, %156 : vector<32x2xf32>
    %158 = vector.extract_strided_slice %2 {offsets = [0, 1], sizes = [32, 1], strides = [1, 1]} : vector<32x2xf32> to vector<32x1xf32>
    %159 = vector.extract_strided_slice %151 {offsets = [0, 2], sizes = [32, 2], strides = [1, 1]} : vector<32x4xf32> to vector<32x2xf32>
    %160 = vector.broadcast %158 : vector<32x1xf32> to vector<32x2xf32>
    %161 = arith.mulf %160, %159 : vector<32x2xf32>
    %162 = arith.addf %157, %161 : vector<32x2xf32>
    %163 = tpu.concatenate %162, %162, %162, %162, %162, %162, %162, %162, %162, %162, %162, %162, %162, %162, %162, %162 in 1 : vector<32x2xf32>, vector<32x2xf32>, vector<32x2xf32>, vector<32x2xf32>, vector<32x2xf32>, vector<32x2xf32>, vector<32x2xf32>, vector<32x2xf32>, vector<32x2xf32>, vector<32x2xf32>, vector<32x2xf32>, vector<32x2xf32>, vector<32x2xf32>, vector<32x2xf32>, vector<32x2xf32>, vector<32x2xf32> -> vector<32x32xf32>
    %164 = arith.addf %150, %163 : vector<32x32xf32>
    %cst_55 = arith.constant dense<0xFF800000> : vector<32xf32>
    %165 = vector.multi_reduction <maximumf>, %164, %cst_55 [1] : vector<32x32xf32> to vector<32xf32>
    %166 = vector.shape_cast %165 : vector<32xf32> to vector<32x1xf32>
    %167 = vector.broadcast %166 : vector<32x1xf32> to vector<32x32xf32>
    %168 = arith.subf %164, %167 : vector<32x32xf32>
    %169 = math.exp %168 : vector<32x32xf32>
    %cst_56 = arith.constant dense<0.000000e+00> : vector<32xf32>
    %170 = vector.multi_reduction <add>, %169, %cst_56 [1] : vector<32x32xf32> to vector<32xf32>
    %171 = vector.shape_cast %170 : vector<32xf32> to vector<32x1xf32>
    %172 = tpu.reciprocal %171 {approx = true} : vector<32x1xf32> -> vector<32x1xf32>
    %173 = vector.broadcast %172 : vector<32x1xf32> to vector<32x32xf32>
    %174 = arith.mulf %169, %173 : vector<32x32xf32>
    %cst_57 = arith.constant dense<0.000000e+00> : vector<32x8xf32>
    %175 = tpu.matmul %174, %148, %cst_57 {dimension_numbers = #tpu.dot_dimension_numbers<[1], [0], [0], [1], [0, 0, 1, 1], [], []>} : vector<32x32xf32>, vector<32x8xf32>, vector<32x8xf32> -> vector<32x8xf32>
    %176 = vector.extract_strided_slice %77 {offsets = [0, 24], sizes = [32, 8], strides = [1, 1]} : vector<32x96xf32> to vector<32x8xf32>
    %cst_58 = arith.constant 0.353553385 : f32
    %177 = vector.broadcast %cst_58 : f32 to vector<32x8xf32>
    %178 = arith.mulf %176, %177 : vector<32x8xf32>
    %179 = vector.extract_strided_slice %77 {offsets = [0, 56], sizes = [32, 8], strides = [1, 1]} : vector<32x96xf32> to vector<32x8xf32>
    %180 = vector.extract_strided_slice %77 {offsets = [0, 88], sizes = [32, 8], strides = [1, 1]} : vector<32x96xf32> to vector<32x8xf32>
    %cst_59 = arith.constant dense<0.000000e+00> : vector<32x32xf32>
    %181 = tpu.matmul %178, %179, %cst_59 {dimension_numbers = #tpu.dot_dimension_numbers<[1], [1], [0], [0], [0, 0, 1, 0], [], []>} : vector<32x8xf32>, vector<32x8xf32>, vector<32x32xf32> -> vector<32x32xf32>
    %182 = arith.addf %78, %181 : vector<32x32xf32>
    %cst_60 = arith.constant dense<0.000000e+00> : vector<32x4xf32>
    %183 = tpu.matmul %178, %79, %cst_60 {dimension_numbers = #tpu.dot_dimension_numbers<[1], [0], [0], [1], [0, 0, 1, 1], [], []>} : vector<32x8xf32>, vector<8x4xf32>, vector<32x4xf32> -> vector<32x4xf32>
    %cst_61 = arith.constant 0.000000e+00 : f32
    %184 = vector.broadcast %cst_61 : f32 to vector<32x2xf32>
    %185 = vector.extract_strided_slice %2 {offsets = [0, 0], sizes = [32, 1], strides = [1, 1]} : vector<32x2xf32> to vector<32x1xf32>
    %186 = vector.extract_strided_slice %183 {offsets = [0, 0], sizes = [32, 2], strides = [1, 1]} : vector<32x4xf32> to vector<32x2xf32>
    %187 = vector.broadcast %185 : vector<32x1xf32> to vector<32x2xf32>
    %188 = arith.mulf %187, %186 : vector<32x2xf32>
    %189 = arith.addf %184, %188 : vector<32x2xf32>
    %190 = vector.extract_strided_slice %2 {offsets = [0, 1], sizes = [32, 1], strides = [1, 1]} : vector<32x2xf32> to vector<32x1xf32>
    %191 = vector.extract_strided_slice %183 {offsets = [0, 2], sizes = [32, 2], strides = [1, 1]} : vector<32x4xf32> to vector<32x2xf32>
    %192 = vector.broadcast %190 : vector<32x1xf32> to vector<32x2xf32>
    %193 = arith.mulf %192, %191 : vector<32x2xf32>
    %194 = arith.addf %189, %193 : vector<32x2xf32>
    %195 = tpu.concatenate %194, %194, %194, %194, %194, %194, %194, %194, %194, %194, %194, %194, %194, %194, %194, %194 in 1 : vector<32x2xf32>, vector<32x2xf32>, vector<32x2xf32>, vector<32x2xf32>, vector<32x2xf32>, vector<32x2xf32>, vector<32x2xf32>, vector<32x2xf32>, vector<32x2xf32>, vector<32x2xf32>, vector<32x2xf32>, vector<32x2xf32>, vector<32x2xf32>, vector<32x2xf32>, vector<32x2xf32>, vector<32x2xf32> -> vector<32x32xf32>
    %196 = arith.addf %182, %195 : vector<32x32xf32>
    %cst_62 = arith.constant dense<0xFF800000> : vector<32xf32>
    %197 = vector.multi_reduction <maximumf>, %196, %cst_62 [1] : vector<32x32xf32> to vector<32xf32>
    %198 = vector.shape_cast %197 : vector<32xf32> to vector<32x1xf32>
    %199 = vector.broadcast %198 : vector<32x1xf32> to vector<32x32xf32>
    %200 = arith.subf %196, %199 : vector<32x32xf32>
    %201 = math.exp %200 : vector<32x32xf32>
    %cst_63 = arith.constant dense<0.000000e+00> : vector<32xf32>
    %202 = vector.multi_reduction <add>, %201, %cst_63 [1] : vector<32x32xf32> to vector<32xf32>
    %203 = vector.shape_cast %202 : vector<32xf32> to vector<32x1xf32>
    %204 = tpu.reciprocal %203 {approx = true} : vector<32x1xf32> -> vector<32x1xf32>
    %205 = vector.broadcast %204 : vector<32x1xf32> to vector<32x32xf32>
    %206 = arith.mulf %201, %205 : vector<32x32xf32>
    %cst_64 = arith.constant dense<0.000000e+00> : vector<32x8xf32>
    %207 = tpu.matmul %206, %180, %cst_64 {dimension_numbers = #tpu.dot_dimension_numbers<[1], [0], [0], [1], [0, 0, 1, 1], [], []>} : vector<32x32xf32>, vector<32x8xf32>, vector<32x8xf32> -> vector<32x8xf32>
    %208 = tpu.concatenate %111, %143, %175, %207 in 1 : vector<32x8xf32>, vector<32x8xf32>, vector<32x8xf32>, vector<32x8xf32> -> vector<32x32xf32>
    %c65 = arith.constant 65 : index
    %c0_65 = arith.constant 0 : index
    %209 = vector.load %arg3[%c65, %c0_65] : memref<228x32xf32, #tpu.memory_space<vmem>>, vector<32x32xf32>
    %cst_66 = arith.constant dense<0.000000e+00> : vector<32x32xf32>
    %210 = tpu.matmul %208, %209, %cst_66 {dimension_numbers = #tpu.dot_dimension_numbers<[1], [0], [0], [1], [0, 0, 1, 1], [], []>} : vector<32x32xf32>, vector<32x32xf32>, vector<32x32xf32> -> vector<32x32xf32>
    %211 = arith.addf %51, %210 : vector<32x32xf32>
    %c97 = arith.constant 97 : index
    %c0_67 = arith.constant 0 : index
    %212 = vector.load %arg3[%c97, %c0_67] : memref<228x32xf32, #tpu.memory_space<vmem>>, vector<1x32xf32>
    %213 = vector.broadcast %212 : vector<1x32xf32> to vector<32x32xf32>
    %214 = arith.addf %211, %213 : vector<32x32xf32>
    %c45 = arith.constant 45 : index
    %c0_68 = arith.constant 0 : index
    %215 = vector.load %arg1[%c45, %c0_68] : memref<51x32xf32, #tpu.memory_space<vmem>>, vector<1x32xf32>
    %c46 = arith.constant 46 : index
    %c0_69 = arith.constant 0 : index
    %216 = vector.load %arg1[%c46, %c0_69] : memref<51x32xf32, #tpu.memory_space<vmem>>, vector<1x32xf32>
    %cst_70 = arith.constant dense<0.000000e+00> : vector<32xf32>
    %217 = vector.multi_reduction <add>, %214, %cst_70 [1] : vector<32x32xf32> to vector<32xf32>
    %218 = vector.shape_cast %217 : vector<32xf32> to vector<32x1xf32>
    %cst_71 = arith.constant 3.200000e+01 : f32
    %219 = vector.broadcast %cst_71 : f32 to vector<32x1xf32>
    %220 = arith.divf %218, %219 : vector<32x1xf32>
    %221 = vector.broadcast %220 : vector<32x1xf32> to vector<32x32xf32>
    %222 = arith.subf %214, %221 : vector<32x32xf32>
    %223 = arith.mulf %222, %222 : vector<32x32xf32>
    %cst_72 = arith.constant dense<0.000000e+00> : vector<32xf32>
    %224 = vector.multi_reduction <add>, %223, %cst_72 [1] : vector<32x32xf32> to vector<32xf32>
    %225 = vector.shape_cast %224 : vector<32xf32> to vector<32x1xf32>
    %cst_73 = arith.constant 3.200000e+01 : f32
    %226 = vector.broadcast %cst_73 : f32 to vector<32x1xf32>
    %227 = arith.divf %225, %226 : vector<32x1xf32>
    %228 = vector.broadcast %220 : vector<32x1xf32> to vector<32x32xf32>
    %229 = arith.subf %214, %228 : vector<32x32xf32>
    %cst_74 = arith.constant 9.99999974E-6 : f32
    %230 = vector.broadcast %cst_74 : f32 to vector<32x1xf32>
    %231 = arith.addf %227, %230 : vector<32x1xf32>
    %232 = math.rsqrt %231 : vector<32x1xf32>
    %233 = vector.broadcast %232 : vector<32x1xf32> to vector<32x32xf32>
    %234 = arith.mulf %229, %233 : vector<32x32xf32>
    %235 = vector.broadcast %215 : vector<1x32xf32> to vector<32x32xf32>
    %236 = arith.mulf %234, %235 : vector<32x32xf32>
    %237 = vector.broadcast %216 : vector<1x32xf32> to vector<32x32xf32>
    %238 = arith.addf %236, %237 : vector<32x32xf32>
    %c0_75 = arith.constant 0 : index
    %c0_76 = arith.constant 0 : index
    %239 = vector.load %arg8[%c0_75, %c0_76] : memref<33x128xf32, #tpu.memory_space<vmem>>, vector<32x128xf32>
    %cst_77 = arith.constant dense<0.000000e+00> : vector<32x128xf32>
    %240 = tpu.matmul %238, %239, %cst_77 {dimension_numbers = #tpu.dot_dimension_numbers<[1], [0], [0], [1], [0, 0, 1, 1], [], []>} : vector<32x32xf32>, vector<32x128xf32>, vector<32x128xf32> -> vector<32x128xf32>
    %c32_78 = arith.constant 32 : index
    %c0_79 = arith.constant 0 : index
    %241 = vector.load %arg8[%c32_78, %c0_79] : memref<33x128xf32, #tpu.memory_space<vmem>>, vector<1x128xf32>
    %242 = vector.broadcast %241 : vector<1x128xf32> to vector<32x128xf32>
    %243 = arith.addf %240, %242 : vector<32x128xf32>
    %244 = vector.extract_strided_slice %243 {offsets = [0, 0], sizes = [32, 64], strides = [1, 1]} : vector<32x128xf32> to vector<32x64xf32>
    %245 = vector.extract_strided_slice %243 {offsets = [0, 64], sizes = [32, 64], strides = [1, 1]} : vector<32x128xf32> to vector<32x64xf32>
    %246 = arith.negf %245 : vector<32x64xf32>
    %247 = math.exp %246 : vector<32x64xf32>
    %cst_80 = arith.constant 1.000000e+00 : f32
    %248 = vector.broadcast %cst_80 : f32 to vector<32x64xf32>
    %249 = arith.addf %248, %247 : vector<32x64xf32>
    %250 = arith.divf %248, %249 : vector<32x64xf32>
    %251 = arith.mulf %244, %250 : vector<32x64xf32>
    %c0_81 = arith.constant 0 : index
    %c0_82 = arith.constant 0 : index
    %252 = vector.load %arg9[%c0_81, %c0_82] : memref<8x64xf32, #tpu.memory_space<vmem>>, vector<8x64xf32>
    %cst_83 = arith.constant 0.000000e+00 : f32
    %253 = vector.broadcast %cst_83 : f32 to vector<32x64xf32>
    %c3_i32 = arith.constant 3 : i32
    %254 = tpu.dynamic_rotate %251 by %c3_i32 dim 0 : vector<32x64xf32>, i32 -> vector<32x64xf32>
    %255 = vector.extract_strided_slice %252 {offsets = [0, 0], sizes = [1, 64], strides = [1, 1]} : vector<8x64xf32> to vector<1x64xf32>
    %256 = vector.broadcast %255 : vector<1x64xf32> to vector<32x64xf32>
    %257 = arith.mulf %254, %256 : vector<32x64xf32>
    %258 = vector.extract_strided_slice %1 {offsets = [0, 0], sizes = [32, 1], strides = [1, 1]} : vector<32x7xf32> to vector<32x1xf32>
    %259 = vector.broadcast %258 : vector<32x1xf32> to vector<32x64xf32>
    %260 = arith.mulf %257, %259 : vector<32x64xf32>
    %261 = arith.addf %253, %260 : vector<32x64xf32>
    %c2_i32 = arith.constant 2 : i32
    %262 = tpu.dynamic_rotate %251 by %c2_i32 dim 0 : vector<32x64xf32>, i32 -> vector<32x64xf32>
    %263 = vector.extract_strided_slice %252 {offsets = [1, 0], sizes = [1, 64], strides = [1, 1]} : vector<8x64xf32> to vector<1x64xf32>
    %264 = vector.broadcast %263 : vector<1x64xf32> to vector<32x64xf32>
    %265 = arith.mulf %262, %264 : vector<32x64xf32>
    %266 = vector.extract_strided_slice %1 {offsets = [0, 1], sizes = [32, 1], strides = [1, 1]} : vector<32x7xf32> to vector<32x1xf32>
    %267 = vector.broadcast %266 : vector<32x1xf32> to vector<32x64xf32>
    %268 = arith.mulf %265, %267 : vector<32x64xf32>
    %269 = arith.addf %261, %268 : vector<32x64xf32>
    %c1_i32 = arith.constant 1 : i32
    %270 = tpu.dynamic_rotate %251 by %c1_i32 dim 0 : vector<32x64xf32>, i32 -> vector<32x64xf32>
    %271 = vector.extract_strided_slice %252 {offsets = [2, 0], sizes = [1, 64], strides = [1, 1]} : vector<8x64xf32> to vector<1x64xf32>
    %272 = vector.broadcast %271 : vector<1x64xf32> to vector<32x64xf32>
    %273 = arith.mulf %270, %272 : vector<32x64xf32>
    %274 = vector.extract_strided_slice %1 {offsets = [0, 2], sizes = [32, 1], strides = [1, 1]} : vector<32x7xf32> to vector<32x1xf32>
    %275 = vector.broadcast %274 : vector<32x1xf32> to vector<32x64xf32>
    %276 = arith.mulf %273, %275 : vector<32x64xf32>
    %277 = arith.addf %269, %276 : vector<32x64xf32>
    %278 = vector.extract_strided_slice %252 {offsets = [3, 0], sizes = [1, 64], strides = [1, 1]} : vector<8x64xf32> to vector<1x64xf32>
    %279 = vector.broadcast %278 : vector<1x64xf32> to vector<32x64xf32>
    %280 = arith.mulf %251, %279 : vector<32x64xf32>
    %281 = vector.extract_strided_slice %1 {offsets = [0, 3], sizes = [32, 1], strides = [1, 1]} : vector<32x7xf32> to vector<32x1xf32>
    %282 = vector.broadcast %281 : vector<32x1xf32> to vector<32x64xf32>
    %283 = arith.mulf %280, %282 : vector<32x64xf32>
    %284 = arith.addf %277, %283 : vector<32x64xf32>
    %c31_i32 = arith.constant 31 : i32
    %285 = tpu.dynamic_rotate %251 by %c31_i32 dim 0 : vector<32x64xf32>, i32 -> vector<32x64xf32>
    %286 = vector.extract_strided_slice %252 {offsets = [4, 0], sizes = [1, 64], strides = [1, 1]} : vector<8x64xf32> to vector<1x64xf32>
    %287 = vector.broadcast %286 : vector<1x64xf32> to vector<32x64xf32>
    %288 = arith.mulf %285, %287 : vector<32x64xf32>
    %289 = vector.extract_strided_slice %1 {offsets = [0, 4], sizes = [32, 1], strides = [1, 1]} : vector<32x7xf32> to vector<32x1xf32>
    %290 = vector.broadcast %289 : vector<32x1xf32> to vector<32x64xf32>
    %291 = arith.mulf %288, %290 : vector<32x64xf32>
    %292 = arith.addf %284, %291 : vector<32x64xf32>
    %c30_i32 = arith.constant 30 : i32
    %293 = tpu.dynamic_rotate %251 by %c30_i32 dim 0 : vector<32x64xf32>, i32 -> vector<32x64xf32>
    %294 = vector.extract_strided_slice %252 {offsets = [5, 0], sizes = [1, 64], strides = [1, 1]} : vector<8x64xf32> to vector<1x64xf32>
    %295 = vector.broadcast %294 : vector<1x64xf32> to vector<32x64xf32>
    %296 = arith.mulf %293, %295 : vector<32x64xf32>
    %297 = vector.extract_strided_slice %1 {offsets = [0, 5], sizes = [32, 1], strides = [1, 1]} : vector<32x7xf32> to vector<32x1xf32>
    %298 = vector.broadcast %297 : vector<32x1xf32> to vector<32x64xf32>
    %299 = arith.mulf %296, %298 : vector<32x64xf32>
    %300 = arith.addf %292, %299 : vector<32x64xf32>
    %c29_i32 = arith.constant 29 : i32
    %301 = tpu.dynamic_rotate %251 by %c29_i32 dim 0 : vector<32x64xf32>, i32 -> vector<32x64xf32>
    %302 = vector.extract_strided_slice %252 {offsets = [6, 0], sizes = [1, 64], strides = [1, 1]} : vector<8x64xf32> to vector<1x64xf32>
    %303 = vector.broadcast %302 : vector<1x64xf32> to vector<32x64xf32>
    %304 = arith.mulf %301, %303 : vector<32x64xf32>
    %305 = vector.extract_strided_slice %1 {offsets = [0, 6], sizes = [32, 1], strides = [1, 1]} : vector<32x7xf32> to vector<32x1xf32>
    %306 = vector.broadcast %305 : vector<32x1xf32> to vector<32x64xf32>
    %307 = arith.mulf %304, %306 : vector<32x64xf32>
    %308 = arith.addf %300, %307 : vector<32x64xf32>
    %309 = vector.extract_strided_slice %252 {offsets = [7, 0], sizes = [1, 64], strides = [1, 1]} : vector<8x64xf32> to vector<1x64xf32>
    %310 = vector.broadcast %309 : vector<1x64xf32> to vector<32x64xf32>
    %311 = arith.addf %308, %310 : vector<32x64xf32>
    %312 = arith.negf %311 : vector<32x64xf32>
    %313 = math.exp %312 : vector<32x64xf32>
    %cst_84 = arith.constant 1.000000e+00 : f32
    %314 = vector.broadcast %cst_84 : f32 to vector<32x64xf32>
    %315 = arith.addf %314, %313 : vector<32x64xf32>
    %316 = arith.divf %314, %315 : vector<32x64xf32>
    %317 = arith.mulf %311, %316 : vector<32x64xf32>
    %c98 = arith.constant 98 : index
    %c0_85 = arith.constant 0 : index
    %318 = vector.load %arg3[%c98, %c0_85] : memref<228x32xf32, #tpu.memory_space<vmem>>, vector<64x32xf32>
    %cst_86 = arith.constant dense<0.000000e+00> : vector<32x32xf32>
    %319 = tpu.matmul %317, %318, %cst_86 {dimension_numbers = #tpu.dot_dimension_numbers<[1], [0], [0], [1], [0, 0, 1, 1], [], []>} : vector<32x64xf32>, vector<64x32xf32>, vector<32x32xf32> -> vector<32x32xf32>
    %c162 = arith.constant 162 : index
    %c0_87 = arith.constant 0 : index
    %320 = vector.load %arg3[%c162, %c0_87] : memref<228x32xf32, #tpu.memory_space<vmem>>, vector<1x32xf32>
    %321 = vector.broadcast %320 : vector<1x32xf32> to vector<32x32xf32>
    %322 = arith.addf %319, %321 : vector<32x32xf32>
    %323 = arith.addf %214, %322 : vector<32x32xf32>
    %c47 = arith.constant 47 : index
    %c0_88 = arith.constant 0 : index
    %324 = vector.load %arg1[%c47, %c0_88] : memref<51x32xf32, #tpu.memory_space<vmem>>, vector<1x32xf32>
    %c48 = arith.constant 48 : index
    %c0_89 = arith.constant 0 : index
    %325 = vector.load %arg1[%c48, %c0_89] : memref<51x32xf32, #tpu.memory_space<vmem>>, vector<1x32xf32>
    %cst_90 = arith.constant dense<0.000000e+00> : vector<32xf32>
    %326 = vector.multi_reduction <add>, %323, %cst_90 [1] : vector<32x32xf32> to vector<32xf32>
    %327 = vector.shape_cast %326 : vector<32xf32> to vector<32x1xf32>
    %cst_91 = arith.constant 3.200000e+01 : f32
    %328 = vector.broadcast %cst_91 : f32 to vector<32x1xf32>
    %329 = arith.divf %327, %328 : vector<32x1xf32>
    %330 = vector.broadcast %329 : vector<32x1xf32> to vector<32x32xf32>
    %331 = arith.subf %323, %330 : vector<32x32xf32>
    %332 = arith.mulf %331, %331 : vector<32x32xf32>
    %cst_92 = arith.constant dense<0.000000e+00> : vector<32xf32>
    %333 = vector.multi_reduction <add>, %332, %cst_92 [1] : vector<32x32xf32> to vector<32xf32>
    %334 = vector.shape_cast %333 : vector<32xf32> to vector<32x1xf32>
    %cst_93 = arith.constant 3.200000e+01 : f32
    %335 = vector.broadcast %cst_93 : f32 to vector<32x1xf32>
    %336 = arith.divf %334, %335 : vector<32x1xf32>
    %337 = vector.broadcast %329 : vector<32x1xf32> to vector<32x32xf32>
    %338 = arith.subf %323, %337 : vector<32x32xf32>
    %cst_94 = arith.constant 9.99999974E-6 : f32
    %339 = vector.broadcast %cst_94 : f32 to vector<32x1xf32>
    %340 = arith.addf %336, %339 : vector<32x1xf32>
    %341 = math.rsqrt %340 : vector<32x1xf32>
    %342 = vector.broadcast %341 : vector<32x1xf32> to vector<32x32xf32>
    %343 = arith.mulf %338, %342 : vector<32x32xf32>
    %344 = vector.broadcast %324 : vector<1x32xf32> to vector<32x32xf32>
    %345 = arith.mulf %343, %344 : vector<32x32xf32>
    %346 = vector.broadcast %325 : vector<1x32xf32> to vector<32x32xf32>
    %347 = arith.addf %345, %346 : vector<32x32xf32>
    %c33 = arith.constant 33 : index
    %c0_95 = arith.constant 0 : index
    %348 = vector.load %arg2[%c33, %c0_95] : memref<66x64xf32, #tpu.memory_space<vmem>>, vector<32x64xf32>
    %cst_96 = arith.constant dense<0.000000e+00> : vector<32x64xf32>
    %349 = tpu.matmul %347, %348, %cst_96 {dimension_numbers = #tpu.dot_dimension_numbers<[1], [0], [0], [1], [0, 0, 1, 1], [], []>} : vector<32x32xf32>, vector<32x64xf32>, vector<32x64xf32> -> vector<32x64xf32>
    %c65_97 = arith.constant 65 : index
    %c0_98 = arith.constant 0 : index
    %350 = vector.load %arg2[%c65_97, %c0_98] : memref<66x64xf32, #tpu.memory_space<vmem>>, vector<1x64xf32>
    %351 = vector.broadcast %350 : vector<1x64xf32> to vector<32x64xf32>
    %352 = arith.addf %349, %351 : vector<32x64xf32>
    %353 = arith.negf %352 : vector<32x64xf32>
    %354 = math.exp %353 : vector<32x64xf32>
    %cst_99 = arith.constant 1.000000e+00 : f32
    %355 = vector.broadcast %cst_99 : f32 to vector<32x64xf32>
    %356 = arith.addf %355, %354 : vector<32x64xf32>
    %357 = arith.divf %355, %356 : vector<32x64xf32>
    %358 = arith.mulf %352, %357 : vector<32x64xf32>
    %c163 = arith.constant 163 : index
    %c0_100 = arith.constant 0 : index
    %359 = vector.load %arg3[%c163, %c0_100] : memref<228x32xf32, #tpu.memory_space<vmem>>, vector<64x32xf32>
    %cst_101 = arith.constant dense<0.000000e+00> : vector<32x32xf32>
    %360 = tpu.matmul %358, %359, %cst_101 {dimension_numbers = #tpu.dot_dimension_numbers<[1], [0], [0], [1], [0, 0, 1, 1], [], []>} : vector<32x64xf32>, vector<64x32xf32>, vector<32x32xf32> -> vector<32x32xf32>
    %c227 = arith.constant 227 : index
    %c0_102 = arith.constant 0 : index
    %361 = vector.load %arg3[%c227, %c0_102] : memref<228x32xf32, #tpu.memory_space<vmem>>, vector<1x32xf32>
    %362 = vector.broadcast %361 : vector<1x32xf32> to vector<32x32xf32>
    %363 = arith.addf %360, %362 : vector<32x32xf32>
    %cst_103 = arith.constant 5.000000e-01 : f32
    %364 = vector.broadcast %cst_103 : f32 to vector<32x32xf32>
    %365 = arith.mulf %364, %363 : vector<32x32xf32>
    %366 = arith.addf %323, %365 : vector<32x32xf32>
    %c49 = arith.constant 49 : index
    %c0_104 = arith.constant 0 : index
    %367 = vector.load %arg1[%c49, %c0_104] : memref<51x32xf32, #tpu.memory_space<vmem>>, vector<1x32xf32>
    %c50 = arith.constant 50 : index
    %c0_105 = arith.constant 0 : index
    %368 = vector.load %arg1[%c50, %c0_105] : memref<51x32xf32, #tpu.memory_space<vmem>>, vector<1x32xf32>
    %cst_106 = arith.constant dense<0.000000e+00> : vector<32xf32>
    %369 = vector.multi_reduction <add>, %366, %cst_106 [1] : vector<32x32xf32> to vector<32xf32>
    %370 = vector.shape_cast %369 : vector<32xf32> to vector<32x1xf32>
    %cst_107 = arith.constant 3.200000e+01 : f32
    %371 = vector.broadcast %cst_107 : f32 to vector<32x1xf32>
    %372 = arith.divf %370, %371 : vector<32x1xf32>
    %373 = vector.broadcast %372 : vector<32x1xf32> to vector<32x32xf32>
    %374 = arith.subf %366, %373 : vector<32x32xf32>
    %375 = arith.mulf %374, %374 : vector<32x32xf32>
    %cst_108 = arith.constant dense<0.000000e+00> : vector<32xf32>
    %376 = vector.multi_reduction <add>, %375, %cst_108 [1] : vector<32x32xf32> to vector<32xf32>
    %377 = vector.shape_cast %376 : vector<32xf32> to vector<32x1xf32>
    %cst_109 = arith.constant 3.200000e+01 : f32
    %378 = vector.broadcast %cst_109 : f32 to vector<32x1xf32>
    %379 = arith.divf %377, %378 : vector<32x1xf32>
    %380 = vector.broadcast %372 : vector<32x1xf32> to vector<32x32xf32>
    %381 = arith.subf %366, %380 : vector<32x32xf32>
    %cst_110 = arith.constant 9.99999974E-6 : f32
    %382 = vector.broadcast %cst_110 : f32 to vector<32x1xf32>
    %383 = arith.addf %379, %382 : vector<32x1xf32>
    %384 = math.rsqrt %383 : vector<32x1xf32>
    %385 = vector.broadcast %384 : vector<32x1xf32> to vector<32x32xf32>
    %386 = arith.mulf %381, %385 : vector<32x32xf32>
    %387 = vector.broadcast %367 : vector<1x32xf32> to vector<32x32xf32>
    %388 = arith.mulf %386, %387 : vector<32x32xf32>
    %389 = vector.broadcast %368 : vector<1x32xf32> to vector<32x32xf32>
    %390 = arith.addf %388, %389 : vector<32x32xf32>
    %cst_111 = arith.constant dense<0.000000e+00> : vector<2x32xf32>
    %391 = tpu.matmul %2, %390, %cst_111 {dimension_numbers = #tpu.dot_dimension_numbers<[0], [0], [1], [1], [0, 1, 1, 1], [], []>} : vector<32x2xf32>, vector<32x32xf32>, vector<2x32xf32> -> vector<2x32xf32>
    %cst_112 = arith.constant 6.250000e-02 : f32
    %392 = vector.broadcast %cst_112 : f32 to vector<2x32xf32>
    %393 = arith.mulf %391, %392 : vector<2x32xf32>
    %c0_113 = arith.constant 0 : index
    %c0_114 = arith.constant 0 : index
    %394 = vector.load %arg10[%c0_113, %c0_114] : memref<33x128xf32, #tpu.memory_space<vmem>>, vector<32x128xf32>
    %cst_115 = arith.constant dense<0.000000e+00> : vector<2x128xf32>
    %395 = tpu.matmul %393, %394, %cst_115 {dimension_numbers = #tpu.dot_dimension_numbers<[1], [0], [0], [1], [0, 0, 1, 1], [], []>} : vector<2x32xf32>, vector<32x128xf32>, vector<2x128xf32> -> vector<2x128xf32>
    %c32_116 = arith.constant 32 : index
    %c0_117 = arith.constant 0 : index
    %396 = vector.load %arg10[%c32_116, %c0_117] : memref<33x128xf32, #tpu.memory_space<vmem>>, vector<1x128xf32>
    %397 = vector.broadcast %396 : vector<1x128xf32> to vector<2x128xf32>
    %398 = arith.addf %395, %397 : vector<2x128xf32>
    %c0_118 = arith.constant 0 : index
    %c0_119 = arith.constant 0 : index
    %399 = vector.load %arg11[%c0_118, %c0_119] : memref<2x128xf32, #tpu.memory_space<vmem>>, vector<2x128xf32>
    tpu.vector_store %arg11[%c0_118, %c0_119], %398 {strides = array<i32>} : memref<2x128xf32, #tpu.memory_space<vmem>>, vector<2x128xf32>,
    return
  }
}

</mosaic_0001>

<bundles_post_ra>
// kernel: classifier_forward.1
= control target key start
LH: loop header
LB: loop body
LE: loop exit
PB: predicated region body
PF: predicated region fallthrough
CT: control target
= control target key end

     0   :  { %vm54_vm0 = vcmask 326656   ;;  %s6932_s0 = inlined_call_operand.vmem [shape: f32[32,40], index: 0, kind: input, shape index: {}]   ;;  %s6933_s1 = inlined_call_operand.vmem [shape: f32[51,32], index: 1, kind: input, shape index: {}]   ;;  %s6934_s2 = inlined_call_operand.vmem [shape: f32[66,64], index: 2, kind: input, shape index: {}]   ;;  %s6935_s3 = inlined_call_operand.vmem [shape: f32[228,32], index: 3, kind: input, shape index: {}]   ;;  %s6936_s4 = inlined_call_operand.vmem [shape: f32[32,96], index: 4, kind: input, shape index: {}]   ;;  %s6937_s5 = inlined_call_operand.vmem [shape: f32[8,4], index: 5, kind: input, shape index: {}]   ;;  %s6938_s6 = inlined_call_operand.vmem [shape: f32[32,32], index: 6, kind: input, shape index: {}]   ;;  %s6939_s7 = inlined_call_operand.vmem [shape: f32[32,9], index: 7, kind: input, shape index: {}]   ;;  %s6940_s8 = inlined_call_operand.vmem [shape: f32[33,128], index: 8, kind: input, shape index: {}]   ;;  %s6941_s9 = inlined_call_operand.vmem [shape: f32[8,64], index: 9, kind: input, shape index: {}]   ;;  %s6942_s10 = inlined_call_operand.vmem [shape: f32[33,128], index: 10, kind: input, shape index: {}]   ;;  %s6943_s11 = inlined_call_operand.hbm [shape: f32[2,128], index: 11, kind: output, shape index: {}]  }
   0x1   :  { %v51_v0 = vld [vmem:[%s6933_s1 + $0x20] sm:$0xff]  ;;  %v50_v1 = vld [vmem:[%s6933_s1 + $0x18] sm:$0xff]  ;;  %v49_v2 = vld [vmem:[%s6933_s1 + $0x10] sm:$0xff] }
   0x2   :  { %78 = vmatpush.msra.mxu0 %v51_v0  ;;  %v48_v3 = vld [vmem:[%s6933_s1 + $0x8] sm:$0xff]  ;;  %v47_v4 = vld [vmem:[%s6933_s1] sm:$0xff] }
   0x3   :  { %v43_v5 = vld [vmem:[%s6932_s0] sm:$0xff] }
   0x4   :  { %79 = vmatpush.msra.mxu0 %v50_v1 }
   0x6   :  { %80 = vmatpush.msra.mxu0 %v49_v2 }
   0x8   :  { %81 = vmatpush.msra.mxu0 %v48_v3 }
   0xa   :  { %82 = vmatpush.msra.mxu0 %v47_v4 }
   0xb   :  { %16 = vsyncpa [#allocation3], 0  ;;  %3738 = vmatmul.msk.f32.vlgmr.msra.gmra.mxu0 %vm54_vm0, %v43_v5  ;;  %v44_v6 = vld [vmem:[%s6932_s0 + $0x8] sm:$0xff]  ;;  %v45_v7 = vld [vmem:[%s6932_s0 + $0x10] sm:$0xff]  ;;  %vm98_vm1 = vcmask 261120   ;;  %v4201_v22 = vmov 32.0  }
   0xc   :  { %v46_v8 = vld [vmem:[%s6932_s0 + $0x18] sm:$0xff]  ;;  %v3973_v9 = vld [vmem:[%s6933_s1 + $0x28] ss:$0 sm:$0xff]  ;;  %3992 = vrcp.f32 %v4201_v22  ;;  %v206_v50 = vld [vmem:[%s6934_s2 + $0x10] sm:$0xff]  ;;  %s4204_s30 = smov 88   ;;  %s4205_s12 = smov 96  }
   0xd   :  { %v207_v49 = vld [vmem:[%s6934_s2 + $0x18] sm:$0xff]  ;;  %v205_v51 = vld [vmem:[%s6934_s2 + $0x8] sm:$0xff]  ;;  %v204_v52 = vld [vmem:[%s6934_s2] sm:$0xff]  ;;  %s4206_s13 = smov 112   ;;  %s4207_s14 = smov 80  }
   0xe   :  { %234 = vmatpush.msra.mxu1 %v207_v49  ;;  %3856 = vmatpush.msra.mxu2 %v207_v49  ;;  %s4208_s15 = smov 72   ;;  %s4209_s16 = smov 104  }
   0xf   :  { %s4210_s17 = smov 120   ;;  %s4211_s0 = smov 64  }
  0x10   :  { %235 = vmatpush.msra.mxu1 %v206_v50  ;;  %3857 = vmatpush.msra.mxu2 %v206_v50  ;;  %v337_v50 = vld [vmem:[%s6935_s3 + $0x30] sm:$0xff]  ;;  %s4212_s18 = smov 56   ;;  %s4213_s19 = smov 126  }
  0x11   :  { %s4214_s20 = smov 6   ;;  %s4215_s21 = smov 4  }
  0x12   :  { %v3993_v23 = vpop.eup %3992  ;;  %236 = vmatpush.msra.mxu1 %v205_v51  ;;  %3858 = vmatpush.msra.mxu2 %v205_v51  ;;  %v336_v51 = vld [vmem:[%s6935_s3 + $0x28] sm:$0xff]  ;;  %s4216_s22 = smov 2   ;;  %s4217_s23 = smov 12  }
  0x13   :  { %3739 = vmatmul.msk.f32.gmra.mxu0 %vm54_vm0, %v44_v6  ;;  %v112_v24 = vmul.f32 32.0, %v3993_v23  ;;  %vm116_vm2 = vweird.f32 %v3993_v23  ;;  %v3974_v6 = vld [vmem:[%s6933_s1 + $0x29] ss:$0 sm:$0xff]  ;;  %s4218_s24 = smov 10   ;;  %s4220_s25 = smov 20  }
  0x14   :  { %237 = vmatpush.msra.mxu1 %v204_v52  ;;  %3859 = vmatpush.msra.mxu2 %v204_v52  ;;  %v334_v52 = vld [vmem:[%s6935_s3 + $0x18] sm:$0xff]  ;;  %s4221_s26 = smov 16   ;;  %s4222_s27 = smov 14  }
  0x15   :  { %v113_v25 = vsub.f32 1.0, %v112_v24  ;;  %s4223_s28 = smov 26   ;;  %s4224_s29 = smov 22  }
  0x17   :  { %v114_v26 = vmul.f32 %v3993_v23, %v113_v25 }
  0x19   :  { %v115_v27 = vadd.f32 %v3993_v23, %v114_v26 }
  0x1b   :  { %3740 = vmatmul.msk.f32.gmra.mxu0 %vm54_vm0, %v45_v7  ;;  %v4346_v28 = vsel %vm116_vm2, %v3993_v23, %v115_v27 }
  0x1c   :  { %6982 = vst [vmem:[#allocation5_spill] sm:$0xff] %v4346_v28 }
  0x23   :  { %3741 = vmatmul.msk.f32.gmra.mxu0 %vm54_vm0, %v46_v8 }
  0x88   :  { %v84_v10 = vpop.f32.mrf.mxu0 }
  0x89   :  { %v4330_v11 = vadd.f32 %v3973_v9, %v84_v10  ;;  %v3975_v10 = vld [vmem:[%s6933_s1 + $0x2a] ss:$0 sm:$0xff] }
  0x8b   :  { %v99_v12 = vsel %vm98_vm1, %v4330_v11, 0.0 }
  0x8c   :  { %100 = vadd.xlane.f32.xlu0 %v99_v12 }
  0x90   :  { %v87_v13 = vpop.f32.mrf.mxu0 }
  0x91   :  { %v4334_v14 = vadd.f32 %v3973_v9, %v87_v13 }
  0x93   :  { %v102_v15 = vsel %vm98_vm1, %v4334_v14, 0.0 }
  0x94   :  { %103 = vadd.xlane.f32.xlu0 %v102_v15 }
  0x98   :  { %v90_v16 = vpop.f32.mrf.mxu0 }
  0x99   :  { %v4338_v17 = vadd.f32 %v3973_v9, %v90_v16 }
  0x9b   :  { %v105_v18 = vsel %vm98_vm1, %v4338_v17, 0.0 }
  0x9c   :  { %106 = vadd.xlane.f32.xlu1 %v105_v18 }
  0xa0   :  { %v93_v19 = vpop.f32.mrf.mxu0 }
  0xa1   :  { %v4342_v20 = vadd.f32 %v3973_v9, %v93_v19 }
  0xa3   :  { %v108_v21 = vsel %vm98_vm1, %v4342_v20, 0.0 }
  0xa4   :  { %109 = vadd.xlane.f32.xlu1 %v108_v21 }
  0xff   :  { %v101_v29 = vpop.xlane.xlu0 %100 }
 0x100   :  { %v118_v30 = vmul.f32 %v4346_v28, %v101_v29 }
 0x102   :  { %v122_v31 = vsub.f32 %v4330_v11, %v118_v30 }
 0x104   :  { %v126_v32 = vmul.f32 %v122_v31, %v122_v31 }
 0x106   :  { %v130_v33 = vsel %vm98_vm1, %v126_v32, 0.0 }
 0x107   :  { %131 = vadd.xlane.f32.xlu2 %v130_v33  ;;  %v104_v34 = vpop.xlane.xlu0 %103 }
 0x108   :  { %v119_v35 = vmul.f32 %v4346_v28, %v104_v34 }
 0x10a   :  { %v4353_v36 = vsub.f32 %v4334_v14, %v119_v35 }
 0x10c   :  { %v127_v37 = vmul.f32 %v4353_v36, %v4353_v36 }
 0x10e   :  { %v133_v38 = vsel %vm98_vm1, %v127_v37, 0.0 }
 0x10f   :  { %v107_v39 = vpop.xlane.xlu1 %106  ;;  %134 = vadd.xlane.f32.xlu2 %v133_v38 }
 0x110   :  { %v120_v40 = vmul.f32 %v4346_v28, %v107_v39 }
 0x112   :  { %v4360_v41 = vsub.f32 %v4338_v17, %v120_v40 }
 0x114   :  { %v128_v42 = vmul.f32 %v4360_v41, %v4360_v41 }
 0x116   :  { %v136_v43 = vsel %vm98_vm1, %v128_v42, 0.0 }
 0x117   :  { %v110_v44 = vpop.xlane.xlu1 %109  ;;  %137 = vadd.xlane.f32.xlu0 %v136_v43 }
 0x118   :  { %v121_v45 = vmul.f32 %v4346_v28, %v110_v44 }
 0x11a   :  { %v4367_v46 = vsub.f32 %v4342_v20, %v121_v45 }
 0x11c   :  { %v129_v47 = vmul.f32 %v4367_v46, %v4367_v46 }
 0x11e   :  { %v139_v48 = vsel %vm98_vm1, %v129_v47, 0.0 }
 0x11f   :  { %140 = vadd.xlane.f32.xlu1 %v139_v48 }
 0x17a   :  { %v132_v53 = vpop.xlane.xlu2 %131 }
 0x17b   :  { %v142_v54 = vmul.f32 %v132_v53, %v4346_v28  ;;  %v333_v53 = vld [vmem:[%s6935_s3 + $0x10] sm:$0xff] }
 0x17d   :  { %v146_v55 = vadd.f32 1e-05, %v142_v54  ;;  %v3976_v54 = vld [vmem:[%s6934_s2 + $0x20] ss:$0 sm:$0xff] }
 0x17f   :  { %3994 = vrsqrt.f32 %v146_v55  ;;  %vm156_vm4 = vweird.f32 %v146_v55 }
 0x182   :  { %v135_v56 = vpop.xlane.xlu2 %134 }
 0x183   :  { %v143_v57 = vmul.f32 %v135_v56, %v4346_v28  ;;  %v331_v56 = vld [vmem:[%s6935_s3] sm:$0xff] }
 0x185   :  { %v3995_v58 = vpop.eup %3994  ;;  %v147_v59 = vadd.f32 1e-05, %v143_v57 }
 0x186   :  { %v151_v60 = vmul.f32 %v3995_v58, %v146_v55  ;;  %vm157_vm3 = vweird.f32 %v3995_v58  ;;  %v332_v55 = vld [vmem:[%s6935_s3 + $0x8] sm:$0xff] }
 0x187   :  { %3996 = vrsqrt.f32 %v147_v59  ;;  %vm158_vm5 = vmor %vm156_vm4, %vm157_vm3  ;;  %vm166_vm7 = vweird.f32 %v147_v59  ;;  %vm6959_vm4 = vcmask 523264  }
 0x188   :  { %v152_v61 = vmul.f32 %v3995_v58, %v151_v60 }
 0x18a   :  { %v153_v62 = vmul.f32 0.5, %v152_v61  ;;  %v138_v63 = vpop.xlane.xlu0 %137 }
 0x18b   :  { %v144_v0 = vmul.f32 %v138_v63, %v4346_v28 }
 0x18c   :  { %v154_v1 = vsub.f32 1.5, %v153_v62 }
 0x18d   :  { %v3997_v2 = vpop.eup %3996  ;;  %v148_v3 = vadd.f32 1e-05, %v144_v0 }
 0x18e   :  { %v155_v4 = vmul.f32 %v3995_v58, %v154_v1  ;;  %v161_v5 = vmul.f32 %v3997_v2, %v147_v59  ;;  %vm167_vm6 = vweird.f32 %v3997_v2 }
 0x18f   :  { %3998 = vrsqrt.f32 %v148_v3  ;;  %vm168_vm8 = vmor %vm166_vm7, %vm167_vm6  ;;  %vm176_vm10 = vweird.f32 %v148_v3 }
 0x190   :  { %v162_v7 = vmul.f32 %v3997_v2, %v161_v5  ;;  %v159_v8 = vsel %vm158_vm5, %v3995_v58, %v155_v4 }
 0x191   :  { %v190_v9 = vmul.f32 %v159_v8, %v122_v31 }
 0x192   :  { %v163_v12 = vmul.f32 0.5, %v162_v7  ;;  %v141_v13 = vpop.xlane.xlu1 %140 }
 0x193   :  { %v145_v15 = vmul.f32 %v141_v13, %v4346_v28  ;;  %v195_v16 = vmul.f32 %v3974_v6, %v190_v9 }
 0x194   :  { %v164_v18 = vsub.f32 1.5, %v163_v12 }
 0x195   :  { %v3999_v19 = vpop.eup %3998  ;;  %v149_v21 = vadd.f32 1e-05, %v145_v15  ;;  %v200_v22 = vadd.f32 %v3975_v10, %v195_v16 }
 0x196   :  { %v165_v23 = vmul.f32 %v3997_v2, %v164_v18  ;;  %v171_v24 = vmul.f32 %v3999_v19, %v148_v3  ;;  %vm177_vm9 = vweird.f32 %v3999_v19 }
 0x197   :  { %4000 = vrsqrt.f32 %v149_v21  ;;  %3742 = vmatmul.msk.f32.vlgmr.msra.gmra.mxu1 %vm98_vm1, %v200_v22  ;;  %vm178_vm11 = vmor %vm176_vm10, %vm177_vm9  ;;  %vm186_vm13 = vweird.f32 %v149_v21 }
 0x198   :  { %v172_v25 = vmul.f32 %v3999_v19, %v171_v24  ;;  %v169_v26 = vsel %vm168_vm8, %v3997_v2, %v165_v23 }
 0x199   :  { %v191_v27 = vmul.f32 %v169_v26, %v4353_v36  ;;  %v4436_v26 = vld [vmem:[%s6939_s7 + $0x18] sm:$0xff] }
 0x19a   :  { %v173_v29 = vmul.f32 0.5, %v172_v25 }
 0x19b   :  { %v196_v30 = vmul.f32 %v3974_v6, %v191_v27  ;;  %v40_v27 = vld [vmem:[%s6939_s7 + $0x8] sm:$0xff] }
 0x19c   :  { %v174_v31 = vsub.f32 1.5, %v173_v29 }
 0x19d   :  { %v4001_v32 = vpop.eup %4000  ;;  %v201_v33 = vadd.f32 %v3975_v10, %v196_v30  ;;  %v4202_v30 = vmov 8  }
 0x19e   :  { %v175_v34 = vmul.f32 %v3999_v19, %v174_v31  ;;  %v181_v35 = vmul.f32 %v4001_v32, %v149_v21  ;;  %vm187_vm12 = vweird.f32 %v4001_v32  ;;  %3902 = vset.pattern.permute.xlu2 %v4202_v30  ;;  %3901 = vset.pattern.permute.xlu1 %v4202_v30  ;;  %v39_v31 = vld [vmem:[%s6939_s7] sm:$0xff] }
 0x19f   :  { %3743 = vmatmul.msk.f32.gmra.mxu1 %vm98_vm1, %v201_v33  ;;  %vm188_vm14 = vmor %vm186_vm13, %vm187_vm12  ;;  %681 = vperm.xlu2 %3902, %v4436_v26  }
 0x1a0   :  { %v182_v37 = vmul.f32 %v4001_v32, %v181_v35  ;;  %v179_v38 = vsel %vm178_vm11, %v3999_v19, %v175_v34  ;;  %673 = vperm.xlu1 %3901, %v40_v27   ;;  %3900 = vset.pattern.permute.xlu0 %v4202_v30 }
 0x1a1   :  { %v192_v39 = vmul.f32 %v179_v38, %v4360_v41  ;;  %v338_v41 = vld [vmem:[%s6935_s3 + $0x38] sm:$0xff]  ;;  %669 = vperm.xlu0 %3900, %v39_v31  }
 0x1a2   :  { %v183_v40 = vmul.f32 0.5, %v182_v37  ;;  %362 = vmatpush.msrb.mxu2 %v338_v41 }
 0x1a3   :  { %v197_v42 = vmul.f32 %v3974_v6, %v192_v39 }
 0x1a4   :  { %v184_v43 = vsub.f32 1.5, %v183_v40  ;;  %363 = vmatpush.msrb.mxu2 %v337_v50 }
 0x1a5   :  { %v202_v36 = vadd.f32 %v3975_v10, %v197_v42 }
 0x1a6   :  { %v185_v44 = vmul.f32 %v4001_v32, %v184_v43  ;;  %364 = vmatpush.msrb.mxu2 %v336_v51 }
 0x1a7   :  { %3744 = vmatmul.msk.f32.vlgmr.msra.gmra.mxu2 %vm98_vm1, %v202_v36  ;;  %v41_v36 = vld [vmem:[%s6939_s7 + $0x10] sm:$0xff] }
 0x1a8   :  { %v189_v45 = vsel %vm188_vm14, %v4001_v32, %v185_v44  ;;  %677 = vperm.xlu1 %3901, %v41_v36  }
 0x1a9   :  { %v193_v47 = vmul.f32 %v189_v45, %v4367_v46  ;;  %v335_v46 = vld [vmem:[%s6935_s3 + $0x20] sm:$0xff]  ;;  %v4203_v45 = vmov 7  }
 0x1aa   :  { %365 = vmatpush.msrb.mxu2 %v335_v46  ;;  %3904 = vset.pattern.permute.xlu2 %v4203_v45 }
 0x1ab   :  { %v198_v48 = vmul.f32 %v3974_v6, %v193_v47  ;;  %647 = vperm.xlu2 %3904, %v40_v27   ;;  %3905 = vset.pattern.permute.xlu0 %v4203_v45 }
 0x1ac   :  { %366 = vmatpush.msrb.mxu2 %v334_v52  ;;  %652 = vperm.xlu0 %3905, %v41_v36  }
 0x1ad   :  { %v203_v49 = vadd.f32 %v3975_v10, %v198_v48 }
 0x1ae   :  { %367 = vmatpush.msrb.mxu2 %v333_v53 }
 0x1af   :  { %3745 = vmatmul.msk.f32.gmra.mxu2 %vm98_vm1, %v203_v49 }
 0x1b0   :  { %368 = vmatpush.msrb.mxu2 %v332_v55  ;;  %3903 = vset.pattern.permute.xlu1 %v4203_v45 }
 0x1b1   :  { %642 = vperm.xlu1 %3903, %v39_v31  }
 0x1b2   :  { %369 = vmatpush.msrb.mxu2 %v331_v56 }
 0x1b9   :  { %657 = vperm.xlu1 %3903, %v4436_v26  }
 0x1f9   :  { %v4479_v27 = vpop.permute.xlu2 %681 }
 0x1fa   :  { %6987 = vst [vmem:[#allocation10_spill] sm:$0xff] %v4479_v27 }
 0x205   :  { %v4485_v30 = vpop.permute.xlu2 %647 }
 0x206   :  { %6990 = vst [vmem:[#allocation13_spill] sm:$0xff] %v4485_v30 }
 0x214   :  { %v239_v57 = vpop.f32.mrf.mxu1 }
 0x215   :  { %v240_v58 = vadd.f32 %v3976_v54, %v239_v57 }
 0x217   :  { %v3746_v59 = vmul.f32 -1.442695, %v240_v58 }
 0x219   :  { %4002 = vpow2.f32 %v3746_v59 }
 0x21c   :  { %v242_v60 = vpop.f32.mrf.mxu1 }
 0x21d   :  { %v243_v61 = vadd.f32 %v3976_v54, %v242_v60 }
 0x21f   :  { %v4003_v62 = vpop.eup %4002  ;;  %v3747_v63 = vmul.f32 -1.442695, %v243_v61 }
 0x220   :  { %v263_v0 = vadd.f32 1.0, %v4003_v62 }
 0x221   :  { %4004 = vpow2.f32 %v3747_v63 }
 0x222   :  { %4006 = vrcp.f32 %v263_v0  ;;  %v278_v8 = vand.u32 2147483648, %v263_v0  ;;  %v276_v10 = vand.u32 2147483647, %v263_v0  ;;  %vm272_vm0 = vweird.f32 %v263_v0 }
 0x224   :  { %v279_v16 = vor.u32 1.1754944e-38, %v278_v8  ;;  %vm277_vm3 = vcmp.eq.f32.partialorder %v276_v10, 8.507059e+37 }
 0x227   :  { %v4005_v1 = vpop.eup %4004 }
 0x228   :  { %v4007_v2 = vpop.eup %4006  ;;  %v264_v3 = vadd.f32 1.0, %v4005_v1 }
 0x229   :  { %v268_v4 = vmul.f32 %v4007_v2, %v263_v0  ;;  %vm273_vm15 = vweird.f32 %v4007_v2 }
 0x22a   :  { %4008 = vrcp.f32 %v264_v3  ;;  %v245_v5 = vpop.f32.mrf.mxu2  ;;  %vm274_vm2 = vmor %vm272_vm0, %vm273_vm15  ;;  %v293_v29 = vand.u32 2147483648, %v264_v3  ;;  %v291_v34 = vand.u32 2147483647, %v264_v3  ;;  %vm287_vm6 = vweird.f32 %v264_v3 }
 0x22b   :  { %v269_v6 = vsub.f32 1.0, %v268_v4  ;;  %v4428_v7 = vadd.f32 %v3976_v54, %v245_v5  ;;  %v3977_v4 = vld [vmem:[%s6935_s3 + $0x40] ss:$0 sm:$0xff] }
 0x22c   :  { %v294_v39 = vor.u32 1.1754944e-38, %v293_v29  ;;  %vm292_vm8 = vcmp.eq.f32.partialorder %v291_v34, 8.507059e+37  ;;  %v4481_v29 = vpop.permute.xlu1 %673 }
 0x22d   :  { %v270_v9 = vmul.f32 %v4007_v2, %v269_v6  ;;  %v3748_v12 = vmul.f32 -1.442695, %v4428_v7  ;;  %6988 = vst [vmem:[#allocation11_spill] sm:$0xff] %v4481_v29 }
 0x22f   :  { %v271_v13 = vadd.f32 %v4007_v2, %v270_v9  ;;  %4010 = vpow2.f32 %v3748_v12 }
 0x230   :  { %v4009_v15 = vpop.eup %4008 }
 0x231   :  { %v275_v18 = vsel %vm274_vm2, %v4007_v2, %v271_v13  ;;  %v283_v19 = vmul.f32 %v4009_v15, %v264_v3  ;;  %vm288_vm5 = vweird.f32 %v4009_v15 }
 0x232   :  { %v280_v21 = vsel %vm277_vm3, %v279_v16, %v275_v18  ;;  %v248_v22 = vpop.f32.mrf.mxu2  ;;  %vm289_vm7 = vmor %vm287_vm6, %vm288_vm5 }
 0x233   :  { %v327_v23 = vmul.f32 %v280_v21, %v240_v58  ;;  %v284_v24 = vsub.f32 1.0, %v283_v19  ;;  %v4431_v25 = vadd.f32 %v3976_v54, %v248_v22 }
 0x234   :  { %v4487_v31 = vpop.permute.xlu1 %677 }
 0x235   :  { %v4011_v32 = vpop.eup %4010  ;;  %v285_v33 = vmul.f32 %v4009_v15, %v284_v24  ;;  %v3749_v35 = vmul.f32 -1.442695, %v4431_v25  ;;  %3750 = vmatmul.msk.f32.vlgmr.msrb.gmra.mxu2 %vm6959_vm4, %v327_v23  ;;  %6991 = vst [vmem:[#allocation14_spill] sm:$0xff] %v4487_v31 }
 0x236   :  { %v265_v37 = vadd.f32 1.0, %v4011_v32 }
 0x237   :  { %v286_v38 = vadd.f32 %v4009_v15, %v285_v33  ;;  %4012 = vpow2.f32 %v3749_v35 }
 0x238   :  { %4014 = vrcp.f32 %v265_v37  ;;  %v308_v50 = vand.u32 2147483648, %v265_v37  ;;  %v306_v46 = vand.u32 2147483647, %v265_v37  ;;  %vm302_vm10 = vweird.f32 %v265_v37 }
 0x239   :  { %v290_v40 = vsel %vm289_vm7, %v4009_v15, %v286_v38 }
 0x23a   :  { %v295_v42 = vsel %vm292_vm8, %v294_v39, %v290_v40  ;;  %v309_v54 = vor.u32 1.1754944e-38, %v308_v50  ;;  %vm307_vm12 = vcmp.eq.f32.partialorder %v306_v46, 8.507059e+37 }
 0x23b   :  { %v328_v43 = vmul.f32 %v295_v42, %v243_v61 }
 0x23c   :  { %v4492_v34 = vpop.permute.xlu1 %642 }
 0x23d   :  { %v4013_v44 = vpop.eup %4012  ;;  %3751 = vmatmul.msk.f32.gmra.mxu2 %vm6959_vm4, %v328_v43  ;;  %6993 = vst [vmem:[#allocation16_spill] sm:$0xff] %v4492_v34 }
 0x23e   :  { %v4015_v47 = vpop.eup %4014  ;;  %v266_v48 = vadd.f32 1.0, %v4013_v44 }
 0x23f   :  { %v298_v49 = vmul.f32 %v4015_v47, %v265_v37  ;;  %vm303_vm9 = vweird.f32 %v4015_v47 }
 0x240   :  { %4016 = vrcp.f32 %v266_v48  ;;  %vm304_vm11 = vmor %vm302_vm10, %vm303_vm9  ;;  %v323_v60 = vand.u32 2147483648, %v266_v48  ;;  %v321_v62 = vand.u32 2147483647, %v266_v48  ;;  %vm317_vm14 = vweird.f32 %v266_v48 }
 0x241   :  { %v299_v41 = vsub.f32 1.0, %v298_v49 }
 0x242   :  { %v324_v0 = vor.u32 1.1754944e-38, %v323_v60  ;;  %vm322_vm0 = vcmp.eq.f32.partialorder %v321_v62, 8.507059e+37 }
 0x243   :  { %v300_v51 = vmul.f32 %v4015_v47, %v299_v41 }
 0x244   :  { %v4500_v43 = vpop.permute.xlu1 %657 }
 0x245   :  { %v301_v52 = vadd.f32 %v4015_v47, %v300_v51  ;;  %6994 = vst [vmem:[#allocation17_spill] sm:$0xff] %v4500_v43 }
 0x246   :  { %v4017_v53 = vpop.eup %4016 }
 0x247   :  { %v305_v55 = vsel %vm304_vm11, %v4015_v47, %v301_v52  ;;  %v313_v56 = vmul.f32 %v4017_v53, %v266_v48  ;;  %vm318_vm13 = vweird.f32 %v4017_v53 }
 0x248   :  { %v310_v57 = vsel %vm307_vm12, %v309_v54, %v305_v55  ;;  %vm319_vm15 = vmor %vm317_vm14, %vm318_vm13  ;;  %v494_v54 = vld [vmem:[%s6936_s4 + $0x18] sm:$0xff]  ;;  %v493_v55 = vld [vmem:[%s6936_s4 + $0x10] sm:$0xff] }
 0x249   :  { %v329_v58 = vmul.f32 %v310_v57, %v4428_v7  ;;  %v314_v59 = vsub.f32 1.0, %v313_v56  ;;  %519 = vmatpush.msra.mxu3 %v494_v54  ;;  %v492_v56 = vld [vmem:[%s6936_s4 + $0x8] sm:$0xff]  ;;  %v491_v57 = vld [vmem:[%s6936_s4] sm:$0xff]  ;;  %s4219_s4 = smov 8  }
 0x24b   :  { %v315_v61 = vmul.f32 %v4017_v53, %v314_v59  ;;  %3752 = vmatmul.msk.f32.gmra.mxu2 %vm6959_vm4, %v329_v58  ;;  %520 = vmatpush.msra.mxu3 %v493_v55 }
 0x24d   :  { %v316_v63 = vadd.f32 %v4017_v53, %v315_v61  ;;  %521 = vmatpush.msra.mxu3 %v492_v56 }
 0x24f   :  { %v320_v1 = vsel %vm319_vm15, %v4017_v53, %v316_v63  ;;  %522 = vmatpush.msra.mxu3 %v491_v57  ;;  %vm557_vm15 = vcmask 64512  }
 0x250   :  { %v325_v2 = vsel %vm322_vm0, %v324_v0, %v320_v1  ;;  %vm892_vm0 = vcmask 15360  }
 0x251   :  { %v330_v3 = vmul.f32 %v325_v2, %v4431_v25 }
 0x253   :  { %3753 = vmatmul.msk.f32.gmra.mxu2 %vm6959_vm4, %v330_v3  ;;  %vm961_vm4 = vcmask 244736  }
 0x2b8   :  { %v371_v5 = vpop.f32.mrf.mxu2 }
 0x2b9   :  { %v372_v6 = vadd.f32 %v3977_v4, %v371_v5 }
 0x2bb   :  { %v383_v7 = vmul.f32 0.5, %v372_v6 }
 0x2bd   :  { %v4460_v8 = vadd.f32 %v383_v7, %v4330_v11 }
 0x2bf   :  { %6983 = vst [vmem:[#allocation6_spill] sm:$0xff] %v4460_v8  ;;  %v393_v9 = vsel %vm98_vm1, %v4460_v8, 0.0 }
 0x2c0   :  { %v374_v10 = vpop.f32.mrf.mxu2  ;;  %394 = vadd.xlane.f32.xlu2 %v393_v9  ;;  %v3978_v9 = vld [vmem:[%s6933_s1 + $0x2b] ss:$0 sm:$0xff] }
 0x2c1   :  { %v375_v12 = vadd.f32 %v3977_v4, %v374_v10 }
 0x2c3   :  { %v384_v13 = vmul.f32 0.5, %v375_v12 }
 0x2c5   :  { %v4465_v15 = vadd.f32 %v384_v13, %v4334_v14 }
 0x2c7   :  { %6984 = vst [vmem:[#allocation7_spill] sm:$0xff] %v4465_v15  ;;  %v396_v16 = vsel %vm98_vm1, %v4465_v15, 0.0 }
 0x2c8   :  { %397 = vadd.xlane.f32.xlu0 %v396_v16 }
 0x2ce   :  { %v377_v18 = vpop.f32.mrf.mxu2 }
 0x2cf   :  { %v378_v19 = vadd.f32 %v3977_v4, %v377_v18 }
 0x2d1   :  { %v385_v21 = vmul.f32 0.5, %v378_v19  ;;  %v3979_v19 = vld [vmem:[%s6933_s1 + $0x2c] ss:$0 sm:$0xff] }
 0x2d3   :  { %v4470_v11 = vadd.f32 %v385_v21, %v4338_v17  ;;  %v4483_v17 = vpop.permute.xlu0 %669 }
 0x2d4   :  { %6989 = vst [vmem:[#allocation12_spill] sm:$0xff] %v4483_v17 }
 0x2d5   :  { %6985 = vst [vmem:[#allocation8_spill] sm:$0xff] %v4470_v11  ;;  %v399_v22 = vsel %vm98_vm1, %v4470_v11, 0.0 }
 0x2d6   :  { %v380_v23 = vpop.f32.mrf.mxu2  ;;  %400 = vadd.xlane.f32.xlu1 %v399_v22 }
 0x2d7   :  { %v381_v24 = vadd.f32 %v3977_v4, %v380_v23 }
 0x2d9   :  { %v386_v25 = vmul.f32 0.5, %v381_v24 }
 0x2db   :  { %v4475_v14 = vadd.f32 %v386_v25, %v4342_v20  ;;  %v4489_v32 = vpop.permute.xlu0 %652 }
 0x2dc   :  { %6992 = vst [vmem:[#allocation15_spill] sm:$0xff] %v4489_v32 }
 0x2dd   :  { %6986 = vst [vmem:[#allocation9_spill] sm:$0xff] %v4475_v14  ;;  %v402_v26 = vsel %vm98_vm1, %v4475_v14, 0.0 }
 0x2de   :  { %403 = vadd.xlane.f32.xlu2 %v402_v26  ;;  %v4543_v26 = vld [vmem:[%s6937_s5] sm:$0xff] }
 0x2df   :  { %626 = vmatpush.msrb.mxu3 %v4543_v26 }
 0x333   :  { %v395_v33 = vpop.xlane.xlu2 %394 }
 0x334   :  { %v405_v20 = vmul.f32 %v395_v33, %v4346_v28 }
 0x336   :  { %v409_v35 = vsub.f32 %v4460_v8, %v405_v20 }
 0x338   :  { %v413_v37 = vmul.f32 %v409_v35, %v409_v35 }
 0x33a   :  { %v417_v38 = vsel %vm98_vm1, %v413_v37, 0.0 }
 0x33b   :  { %418 = vadd.xlane.f32.xlu0 %v417_v38  ;;  %v398_v39 = vpop.xlane.xlu0 %397 }
 0x33c   :  { %v406_v40 = vmul.f32 %v398_v39, %v4346_v28 }
 0x33e   :  { %v4498_v42 = vsub.f32 %v4465_v15, %v406_v40 }
 0x340   :  { %v414_v36 = vmul.f32 %v4498_v42, %v4498_v42 }
 0x342   :  { %v420_v44 = vsel %vm98_vm1, %v414_v36, 0.0 }
 0x343   :  { %421 = vadd.xlane.f32.xlu1 %v420_v44 }
 0x349   :  { %v401_v45 = vpop.xlane.xlu1 %400 }
 0x34a   :  { %v407_v47 = vmul.f32 %v401_v45, %v4346_v28 }
 0x34c   :  { %v4507_v48 = vsub.f32 %v4470_v11, %v407_v47 }
 0x34e   :  { %v415_v49 = vmul.f32 %v4507_v48, %v4507_v48 }
 0x350   :  { %v423_v41 = vsel %vm98_vm1, %v415_v49, 0.0 }
 0x351   :  { %v404_v50 = vpop.xlane.xlu2 %403  ;;  %424 = vadd.xlane.f32.xlu2 %v423_v41 }
 0x352   :  { %v408_v51 = vmul.f32 %v404_v50, %v4346_v28 }
 0x354   :  { %v4514_v46 = vsub.f32 %v4475_v14, %v408_v51 }
 0x356   :  { %v416_v52 = vmul.f32 %v4514_v46, %v4514_v46 }
 0x358   :  { %v426_v53 = vsel %vm98_vm1, %v416_v52, 0.0 }
 0x359   :  { %427 = vadd.xlane.f32.xlu0 %v426_v53 }
 0x3ae   :  { %v419_v58 = vpop.xlane.xlu0 %418 }
 0x3af   :  { %v429_v59 = vmul.f32 %v419_v58, %v4346_v28 }
 0x3b1   :  { %v433_v60 = vadd.f32 1e-05, %v429_v59 }
 0x3b3   :  { %4018 = vrsqrt.f32 %v433_v60  ;;  %vm443_vm3 = vweird.f32 %v433_v60 }
 0x3b6   :  { %v422_v61 = vpop.xlane.xlu1 %421 }
 0x3b7   :  { %v430_v62 = vmul.f32 %v422_v61, %v4346_v28 }
 0x3b9   :  { %v4019_v63 = vpop.eup %4018  ;;  %v434_v0 = vadd.f32 1e-05, %v430_v62 }
 0x3ba   :  { %v438_v1 = vmul.f32 %v4019_v63, %v433_v60  ;;  %vm444_vm2 = vweird.f32 %v4019_v63 }
 0x3bb   :  { %4020 = vrsqrt.f32 %v434_v0  ;;  %vm445_vm5 = vmor %vm443_vm3, %vm444_vm2  ;;  %vm453_vm7 = vweird.f32 %v434_v0  ;;  %vm897_vm2 = vcmask 31744   ;;  %vm902_vm3 = vcmask 48128  }
 0x3bc   :  { %v439_v2 = vmul.f32 %v4019_v63, %v438_v1 }
 0x3be   :  { %v440_v3 = vmul.f32 0.5, %v439_v2 }
 0x3c0   :  { %v441_v4 = vsub.f32 1.5, %v440_v3 }
 0x3c1   :  { %v4021_v5 = vpop.eup %4020 }
 0x3c2   :  { %v442_v6 = vmul.f32 %v4019_v63, %v441_v4  ;;  %v448_v7 = vmul.f32 %v4021_v5, %v434_v0  ;;  %vm454_vm6 = vweird.f32 %v4021_v5 }
 0x3c3   :  { %vm455_vm8 = vmor %vm453_vm7, %vm454_vm6  ;;  %vm916_vm6 = vcmask 97280   ;;  %vm921_vm7 = vcmask 113664  }
 0x3c4   :  { %v449_v10 = vmul.f32 %v4021_v5, %v448_v7  ;;  %v425_v12 = vpop.xlane.xlu2 %424  ;;  %v446_v13 = vsel %vm445_vm5, %v4019_v63, %v442_v6  ;;  %vm911_vm5 = vcmask 80896  }
 0x3c5   :  { %v431_v16 = vmul.f32 %v425_v12, %v4346_v28  ;;  %v477_v18 = vmul.f32 %v446_v13, %v409_v35 }
 0x3c6   :  { %v450_v21 = vmul.f32 0.5, %v449_v10 }
 0x3c7   :  { %v435_v22 = vadd.f32 1e-05, %v431_v16  ;;  %v482_v23 = vmul.f32 %v3978_v9, %v477_v18 }
 0x3c8   :  { %v451_v24 = vsub.f32 1.5, %v450_v21 }
 0x3c9   :  { %4022 = vrsqrt.f32 %v435_v22  ;;  %v487_v25 = vadd.f32 %v3979_v19, %v482_v23  ;;  %vm463_vm10 = vweird.f32 %v435_v22 }
 0x3ca   :  { %v452_v33 = vmul.f32 %v4021_v5, %v451_v24 }
 0x3cb   :  { %3754 = vmatmul.msk.f32.vlgmr.msra.gmra.mxu3 %vm98_vm1, %v487_v25 }
 0x3cc   :  { %v428_v20 = vpop.xlane.xlu0 %427  ;;  %v456_v35 = vsel %vm455_vm8, %v4021_v5, %v452_v33  ;;  %vm926_vm8 = vcmask 130048  }
 0x3cd   :  { %v432_v37 = vmul.f32 %v428_v20, %v4346_v28  ;;  %v478_v38 = vmul.f32 %v456_v35, %v4498_v42 }
 0x3cf   :  { %v4023_v39 = vpop.eup %4022  ;;  %v436_v40 = vadd.f32 1e-05, %v432_v37  ;;  %v483_v36 = vmul.f32 %v3978_v9, %v478_v38 }
 0x3d0   :  { %v458_v44 = vmul.f32 %v4023_v39, %v435_v22  ;;  %vm464_vm9 = vweird.f32 %v4023_v39 }
 0x3d1   :  { %4024 = vrsqrt.f32 %v436_v40  ;;  %v488_v45 = vadd.f32 %v3979_v19, %v483_v36  ;;  %vm465_vm11 = vmor %vm463_vm10, %vm464_vm9  ;;  %vm473_vm13 = vweird.f32 %v436_v40  ;;  %vm931_vm9 = vcmask 146432  }
 0x3d2   :  { %v459_v47 = vmul.f32 %v4023_v39, %v458_v44  ;;  %vm936_vm10 = vcmask 162816  }
 0x3d3   :  { %3755 = vmatmul.msk.f32.gmra.mxu3 %vm98_vm1, %v488_v45 }
 0x3d4   :  { %v460_v49 = vmul.f32 0.5, %v459_v47 }
 0x3d6   :  { %v461_v41 = vsub.f32 1.5, %v460_v49 }
 0x3d7   :  { %v4025_v50 = vpop.eup %4024 }
 0x3d8   :  { %v462_v51 = vmul.f32 %v4023_v39, %v461_v41  ;;  %v468_v52 = vmul.f32 %v4025_v50, %v436_v40  ;;  %vm474_vm12 = vweird.f32 %v4025_v50 }
 0x3d9   :  { %vm475_vm14 = vmor %vm473_vm13, %vm474_vm12  ;;  %vm946_vm12 = vcmask 195584   ;;  %vm951_vm13 = vcmask 211968  }
 0x3da   :  { %v469_v53 = vmul.f32 %v4025_v50, %v468_v52  ;;  %v466_v54 = vsel %vm465_vm11, %v4023_v39, %v462_v51  ;;  %vm941_vm11 = vcmask 179200  }
 0x3db   :  { %v479_v42 = vmul.f32 %v466_v54, %v4507_v48 }
 0x3dc   :  { %v470_v55 = vmul.f32 0.5, %v469_v53 }
 0x3dd   :  { %v484_v56 = vmul.f32 %v3978_v9, %v479_v42 }
 0x3de   :  { %v471_v57 = vsub.f32 1.5, %v470_v55 }
 0x3df   :  { %v489_v58 = vadd.f32 %v3979_v19, %v484_v56 }
 0x3e0   :  { %v472_v59 = vmul.f32 %v4025_v50, %v471_v57 }
 0x3e1   :  { %3756 = vmatmul.msk.f32.gmra.mxu3 %vm98_vm1, %v489_v58 }
 0x3e2   :  { %v476_v60 = vsel %vm475_vm14, %v4025_v50, %v472_v59  ;;  %vm956_vm14 = vcmask 228352  }
 0x3e3   :  { %v480_v61 = vmul.f32 %v476_v60, %v4514_v46 }
 0x3e5   :  { %v485_v62 = vmul.f32 %v3978_v9, %v480_v61 }
 0x3e7   :  { %v490_v63 = vadd.f32 %v3979_v19, %v485_v62 }
 0x3e9   :  { %3757 = vmatmul.msk.f32.gmra.mxu3 %vm98_vm1, %v490_v63 }
 0x44e   :  { %v524_v0 = vpop.f32.mrf.mxu3 }
 0x44f   :  { %1075 = vrot.lane.b32.xlu1 %v524_v0, %s4204_s30  ;;  %549 = vrot.lane.b32.xlu2 %v524_v0, %s4205_s12  ;;  %v4556_v48 = vmul.f32 0.35355338, %v524_v0 }
 0x451   :  { %1538 = vrot.lane.b32.xlu0 %v4556_v48, %s4206_s13  ;;  %3766 = vmatmul.msk.f32.vlgmr.msrb.gmra.mxu3 %vm557_vm15, %v4556_v48 }
 0x456   :  { %v527_v46 = vpop.f32.mrf.mxu3 }
 0x457   :  { %1546 = vrot.lane.b32.xlu1 %v524_v0, %s4207_s14  ;;  %2017 = vrot.lane.b32.xlu2 %v524_v0, %s4208_s15  ;;  %v4564_v1 = vmul.f32 0.35355338, %v527_v46  ;;  %v4566_v2 = vpack.i.bf16 %v524_v0, %v527_v46 }
 0x459   :  { %6995 = vst [vmem:[#allocation18_spill] sm:$0xff] %v4566_v2  ;;  %551 = vrot.lane.b32.xlu0 %v527_v46, %s4205_s12  ;;  %3767 = vmatmul.msk.f32.gmra.mxu3 %vm557_vm15, %v4564_v1 }
 0x45f   :  { %2009 = vrot.lane.b32.xlu2 %v4556_v48, %s4209_s16  ;;  %1067 = vrot.lane.b32.xlu1 %v4556_v48, %s4210_s17 }
 0x461   :  { %2019 = vrot.lane.b32.xlu0 %v527_v46, %s4208_s15 }
 0x464   :  { %v530_v3 = vpop.f32.mrf.mxu3 }
 0x465   :  { %v4576_v4 = vmul.f32 0.35355338, %v530_v3 }
 0x467   :  { %1548 = vrot.lane.b32.xlu1 %v527_v46, %s4207_s14  ;;  %1077 = vrot.lane.b32.xlu2 %v527_v46, %s4204_s30 }
 0x468   :  { %3768 = vmatmul.msk.f32.gmra.mxu3 %vm557_vm15, %v4576_v4 }
 0x469   :  { %1540 = vrot.lane.b32.xlu0 %v4564_v1, %s4206_s13 }
 0x46c   :  { %v533_v5 = vpop.f32.mrf.mxu3 }
 0x46d   :  { %v4584_v6 = vmul.f32 0.35355338, %v533_v5  ;;  %v4600_v7 = vpack.i.bf16 %v530_v3, %v533_v5 }
 0x46f   :  { %3907 = vrot.lane.b32.xlu2 %v4566_v2, %s4211_s0  ;;  %2021 = vrot.lane.b32.xlu1 %v530_v3, %s4208_s15  ;;  %6996 = vst [vmem:[#allocation19_spill] sm:$0xff] %v4600_v7 }
 0x470   :  { %3769 = vmatmul.msk.f32.gmra.mxu3 %vm557_vm15, %v4584_v6 }
 0x471   :  { %1079 = vrot.lane.b32.xlu0 %v530_v3, %s4204_s30 }
 0x477   :  { %3912 = vrot.lane.b32.xlu2 %v4566_v2, %s4212_s18  ;;  %555 = vrot.lane.b32.xlu1 %v533_v5, %s4205_s12 }
 0x479   :  { %1550 = vrot.lane.b32.xlu0 %v530_v3, %s4207_s14 }
 0x47f   :  { %1069 = vrot.lane.b32.xlu2 %v4564_v1, %s4210_s17  ;;  %1081 = vrot.lane.b32.xlu1 %v533_v5, %s4204_s30  ;;  %s4225_s30 = smov 18  }
 0x481   :  { %2013 = vrot.lane.b32.xlu0 %v4576_v4, %s4209_s16 }
 0x487   :  { %2011 = vrot.lane.b32.xlu2 %v4564_v1, %s4209_s16  ;;  %3917 = vrot.lane.b32.xlu1 %v4600_v7, %s4211_s0 }
 0x489   :  { %1552 = vrot.lane.b32.xlu0 %v533_v5, %s4207_s14  ;;  %s4228_s14 = smov 30  }
 0x48f   :  { %553 = vrot.lane.b32.xlu2 %v530_v3, %s4205_s12  ;;  %1544 = vrot.lane.b32.xlu1 %v4584_v6, %s4206_s13  ;;  %s4226_s12 = smov 28  }
 0x491   :  { %3922 = vrot.lane.b32.xlu0 %v4600_v7, %s4212_s18 }
 0x497   :  { %1071 = vrot.lane.b32.xlu2 %v4576_v4, %s4210_s17  ;;  %2015 = vrot.lane.b32.xlu1 %v4584_v6, %s4209_s16 }
 0x499   :  { %2023 = vrot.lane.b32.xlu0 %v533_v5, %s4208_s15 }
 0x49f   :  { %1542 = vrot.lane.b32.xlu2 %v4576_v4, %s4206_s13  ;;  %s4227_s13 = smov 24  }
 0x4a1   :  { %1073 = vrot.lane.b32.xlu0 %v4584_v6, %s4210_s17 }
 0x4a9   :  { %v550_v9 = vpop.permute.xlu2 %549 }
 0x4b1   :  { %v4620_v10 = vpop.permute.xlu2 %2017 }
 0x4b9   :  { %v4622_v12 = vpop.permute.xlu2 %2009 }
 0x4ba   :  { %6997 = vst [vmem:[#allocation20_spill] sm:$0xff] %v4622_v12 }
 0x4c1   :  { %v1076_v13 = vpop.permute.xlu1 %1075  ;;  %v1078_v16 = vpop.permute.xlu2 %1077 }
 0x4c3   :  { %v4624_v18 = vpop.permute.xlu0 %1538 }
 0x4c4   :  { %6998 = vst [vmem:[#allocation21_spill] sm:$0xff] %v4624_v18 }
 0x4c9   :  { %v4626_v19 = vpop.permute.xlu1 %1546  ;;  %v3908_v21 = vpop.permute.xlu2 %3907 }
 0x4ca   :  { %v3909_v59 = vunpack.i.l.bf16 %v3908_v21  ;;  %v3910_v60 = vunpack.i.h.bf16 %v3908_v21 }
 0x4cb   :  { %v552_v22 = vpop.permute.xlu0 %551 }
 0x4d1   :  { %v4628_v23 = vpop.permute.xlu1 %1067  ;;  %v4630_v24 = vpop.permute.xlu2 %3912 }
 0x4d2   :  { %v3914_v0 = vunpack.i.l.bf16 %v4630_v24 }
 0x4d3   :  { %v4632_v25 = vpop.permute.xlu0 %2019 }
 0x4d4   :  { %v4634_v33 = vpop.f32.mrf.mxu3 }
 0x4d5   :  { %v684_v20 = vmul.f32 %v4483_v17, %v4634_v33  ;;  %v660_v5 = vmul.f32 %v4492_v34, %v4634_v33 }
 0x4d7   :  { %692 = vrot.lane.b32.xlu0 %v684_v20, %s4213_s19 }
 0x4d9   :  { %v1549_v35 = vpop.permute.xlu1 %1548  ;;  %v4639_v37 = vpop.permute.xlu2 %1069 }
 0x4db   :  { %v4641_v38 = vpop.permute.xlu0 %1540 }
 0x4dc   :  { %6999 = vst [vmem:[#allocation22_spill] sm:$0xff] %v4641_v38  ;;  %v4643_v39 = vpop.f32.mrf.mxu3 }
 0x4dd   :  { %v685_v40 = vmul.f32 %v4481_v29, %v4643_v39 }
 0x4df   :  { %694 = vrot.lane.b32.xlu1 %v685_v40, %s4213_s19 }
 0x4e1   :  { %v2022_v36 = vpop.permute.xlu1 %2021  ;;  %v4648_v44 = vpop.permute.xlu2 %2011 }
 0x4e2   :  { %7000 = vst [vmem:[#allocation23_spill] sm:$0xff] %v4648_v44 }
 0x4e3   :  { %v1080_v45 = vpop.permute.xlu0 %1079 }
 0x4e9   :  { %v556_v47 = vpop.permute.xlu1 %555  ;;  %v554_v51 = vpop.permute.xlu2 %553 }
 0x4ea   :  { %3758 = vmatpush.xpose.msk.msrb.mxu1 %vm557_vm15, %v556_v47 }
 0x4eb   :  { %v4651_v49 = vpop.f32.mrf.mxu3  ;;  %v1551_v41 = vpop.permute.xlu0 %1550 }
 0x4ec   :  { %v686_v50 = vmul.f32 %v4487_v31, %v4651_v49 }
 0x4ee   :  { %696 = vrot.lane.b32.xlu2 %v686_v50, %s4213_s19  ;;  %3759 = vmatpush.xpose.msk.msrb.mxu1 %vm557_vm15, %v554_v51 }
 0x4f1   :  { %v1082_v52 = vpop.permute.xlu1 %1081  ;;  %v1072_v46 = vpop.permute.xlu2 %1071 }
 0x4f2   :  { %3760 = vmatpush.xpose.msk.msrb.mxu1 %vm557_vm15, %v552_v22  ;;  %3774 = vmatpush.xpose.msk.msra.mxu2 %vm557_vm15, %v1082_v52  ;;  %v662_v22 = vmul.f32 %v4489_v32, %v4651_v49 }
 0x4f3   :  { %v4659_v53 = vpop.f32.mrf.mxu3  ;;  %v4661_v54 = vpop.permute.xlu0 %2013 }
 0x4f4   :  { %7001 = vst [vmem:[#allocation24_spill] sm:$0xff] %v4661_v54  ;;  %v687_v42 = vmul.f32 %v4479_v27, %v4659_v53 }
 0x4f6   :  { %698 = vrot.lane.b32.xlu2 %v687_v42, %s4213_s19  ;;  %3761 = vmatpush.xpose.msk.msrb.mxu1 %vm557_vm15, %v550_v9 }
 0x4f7   :  { %3775 = vmatpush.xpose.msk.msra.mxu2 %vm557_vm15, %v1080_v45 }
 0x4f9   :  { %v3918_v55 = vpop.permute.xlu1 %3917  ;;  %3762 = vmatmul.msk.f32.vlgmr.msrb.gmra.mxu1 %vm557_vm15, %v4556_v48  ;;  %v4708_v3 = vpop.permute.xlu2 %1542 }
 0x4fa   :  { %1147 = vmatpush.msra.mxu1 %v4543_v26  ;;  %v3919_v56 = vunpack.i.l.bf16 %v3918_v55  ;;  %v3920_v58 = vunpack.i.h.bf16 %v3918_v55  ;;  %7002 = vst [vmem:[#allocation25_spill] sm:$0xff] %v4708_v3 }
 0x4fb   :  { %3776 = vmatpush.xpose.msk.msra.mxu2 %vm557_vm15, %v1078_v16  ;;  %v1553_v57 = vpop.permute.xlu0 %1552  ;;  %v661_v16 = vmul.f32 %v4485_v30, %v4643_v39 }
 0x4fc   :  { %1050 = vmatpush.msrb.mxu0 %v3919_v56 }
 0x4fe   :  { %1051 = vmatpush.msrb.mxu0 %v3920_v58 }
 0x4ff   :  { %3777 = vmatpush.xpose.msk.msra.mxu2 %vm557_vm15, %v1076_v13 }
 0x500   :  { %1052 = vmatpush.msrb.mxu0 %v3909_v59 }
 0x501   :  { %3763 = vmatmul.msk.f32.gmra.mxu1 %vm557_vm15, %v4564_v1 }
 0x502   :  { %3778 = vmatmul.msk.f32.vlgmr.msra.gmra.mxu2 %vm557_vm15, %v4628_v23  ;;  %1053 = vmatpush.msrb.mxu0 %v3910_v60 }
 0x503   :  { %1618 = vmatpush.msrb.mxu2 %v4543_v26  ;;  %v3923_v61 = vpop.permute.xlu0 %3922  ;;  %v3915_v26 = vunpack.i.h.bf16 %v4630_v24 }
 0x504   :  { %3790 = vmatpush.xpose.msk.msra.mxu0 %vm557_vm15, %v1553_v57  ;;  %v3924_v62 = vunpack.i.l.bf16 %v3923_v61  ;;  %v3925_v63 = vunpack.i.h.bf16 %v3923_v61 }
 0x506   :  { %1521 = vmatpush.msra.mxu3 %v3924_v62 }
 0x508   :  { %3791 = vmatpush.xpose.msk.msra.mxu0 %vm557_vm15, %v1551_v41  ;;  %1522 = vmatpush.msra.mxu3 %v3925_v63 }
 0x509   :  { %3764 = vmatmul.msk.f32.gmra.mxu1 %vm557_vm15, %v4576_v4  ;;  %v4713_v4 = vpop.permute.xlu1 %1544 }
 0x50a   :  { %3779 = vmatmul.msk.f32.gmra.mxu2 %vm557_vm15, %v4639_v37  ;;  %1523 = vmatpush.msra.mxu3 %v3914_v0  ;;  %7003 = vst [vmem:[#allocation26_spill] sm:$0xff] %v4713_v4 }
 0x50b   :  { %v2024_v48 = vpop.permute.xlu0 %2023 }
 0x50c   :  { %3792 = vmatpush.xpose.msk.msra.mxu0 %vm557_vm15, %v1549_v35  ;;  %1524 = vmatpush.msra.mxu3 %v3915_v26 }
 0x50e   :  { %3806 = vmatpush.xpose.msk.msrb.mxu3 %vm557_vm15, %v2024_v48 }
 0x510   :  { %3793 = vmatpush.xpose.msk.msra.mxu0 %vm557_vm15, %v4626_v19 }
 0x511   :  { %3765 = vmatmul.msk.f32.gmra.mxu1 %vm557_vm15, %v4584_v6 }
 0x512   :  { %3807 = vmatpush.xpose.msk.msrb.mxu3 %vm557_vm15, %v2022_v36  ;;  %3780 = vmatmul.msk.f32.gmra.mxu2 %vm557_vm15, %v1072_v46  ;;  %v663_v36 = vmul.f32 %v4500_v43, %v4659_v53 }
 0x513   :  { %v1074_v1 = vpop.permute.xlu0 %1073 }
 0x516   :  { %3808 = vmatpush.xpose.msk.msrb.mxu3 %vm557_vm15, %v4632_v25 }
 0x519   :  { %3782 = vmatmul.msk.f32.vlgmr.msra.gmra.mxu1 %vm557_vm15, %v4628_v23 }
 0x51a   :  { %3809 = vmatpush.xpose.msk.msrb.mxu3 %vm557_vm15, %v4620_v10  ;;  %3781 = vmatmul.msk.f32.gmra.mxu2 %vm557_vm15, %v1074_v1  ;;  %v4739_v10 = vpop.permute.xlu1 %2015 }
 0x51b   :  { %7004 = vst [vmem:[#allocation27_spill] sm:$0xff] %v4739_v10 }
 0x521   :  { %3783 = vmatmul.msk.f32.gmra.mxu1 %vm557_vm15, %v4639_v37 }
 0x522   :  { %3798 = vmatmul.msk.f32.vlgmr.msrb.gmra.mxu2 %vm557_vm15, %v4624_v18 }
 0x529   :  { %3784 = vmatmul.msk.f32.gmra.mxu1 %vm557_vm15, %v1072_v46 }
 0x52a   :  { %3799 = vmatmul.msk.f32.gmra.mxu2 %vm557_vm15, %v4641_v38 }
 0x531   :  { %3785 = vmatmul.msk.f32.gmra.mxu1 %vm557_vm15, %v1074_v1 }
 0x532   :  { %3800 = vmatmul.msk.f32.gmra.mxu2 %vm557_vm15, %v4708_v3 }
 0x53a   :  { %3801 = vmatmul.msk.f32.gmra.mxu2 %vm557_vm15, %v4713_v4 }
 0x548   :  { %v697_v21 = vpop.permute.xlu2 %696 }
 0x549   :  { %v693_v6 = vpop.permute.xlu0 %692  ;;  %v4783_v23 = vadd.f32 %v697_v21, %v662_v22 }
 0x54a   :  { %v4719_v9 = vadd.f32 %v693_v6, %v660_v5 }
 0x54c   :  { %736 = vrot.lane.b32.xlu1 %v4719_v9, %s4214_s20  ;;  %724 = vrot.lane.b32.xlu2 %v4719_v9, %s4215_s21 }
 0x54d   :  { %712 = vrot.lane.b32.xlu0 %v4719_v9, %s4216_s22 }
 0x550   :  { %v699_v24 = vpop.permute.xlu2 %698 }
 0x551   :  { %v695_v13 = vpop.permute.xlu1 %694  ;;  %v4831_v45 = vadd.f32 %v699_v24, %v663_v36 }
 0x552   :  { %v4749_v19 = vadd.f32 %v695_v13, %v661_v16 }
 0x554   :  { %772 = vrot.lane.b32.xlu1 %v4719_v9, %s4217_s23  ;;  %760 = vrot.lane.b32.xlu2 %v4719_v9, %s4218_s24 }
 0x555   :  { %748 = vrot.lane.b32.xlu0 %v4719_v9, %s4219_s4 }
 0x55c   :  { %820 = vrot.lane.b32.xlu1 %v4719_v9, %s4220_s25  ;;  %796 = vrot.lane.b32.xlu2 %v4719_v9, %s4221_s26 }
 0x55d   :  { %784 = vrot.lane.b32.xlu0 %v4719_v9, %s4222_s27 }
 0x564   :  { %856 = vrot.lane.b32.xlu1 %v4719_v9, %s4223_s28  ;;  %832 = vrot.lane.b32.xlu2 %v4719_v9, %s4224_s29 }
 0x565   :  { %808 = vrot.lane.b32.xlu0 %v4719_v9, %s4225_s30 }
 0x56c   :  { %714 = vrot.lane.b32.xlu1 %v4749_v19, %s4216_s22  ;;  %868 = vrot.lane.b32.xlu2 %v4719_v9, %s4226_s12 }
 0x56d   :  { %844 = vrot.lane.b32.xlu0 %v4719_v9, %s4227_s13 }
 0x574   :  { %750 = vrot.lane.b32.xlu1 %v4749_v19, %s4219_s4  ;;  %726 = vrot.lane.b32.xlu2 %v4749_v19, %s4215_s21 }
 0x575   :  { %880 = vrot.lane.b32.xlu0 %v4719_v9, %s4228_s14 }
 0x576   :  { %v4807_v20 = vpop.f32.mrf.mxu1 }
 0x57c   :  { %786 = vrot.lane.b32.xlu1 %v4749_v19, %s4222_s27  ;;  %762 = vrot.lane.b32.xlu2 %v4749_v19, %s4218_s24 }
 0x57d   :  { %738 = vrot.lane.b32.xlu0 %v4749_v19, %s4214_s20 }
 0x57e   :  { %v4823_v39 = vpop.f32.mrf.mxu1 }
 0x584   :  { %822 = vrot.lane.b32.xlu1 %v4749_v19, %s4220_s25  ;;  %798 = vrot.lane.b32.xlu2 %v4749_v19, %s4221_s26 }
 0x585   :  { %774 = vrot.lane.b32.xlu0 %v4749_v19, %s4217_s23  ;;  %v4805_v33 = vpop.f32.mrf.mxu2 }
 0x586   :  { %v4845_v50 = vpop.f32.mrf.mxu1 }
 0x58c   :  { %858 = vrot.lane.b32.xlu1 %v4749_v19, %s4223_s28  ;;  %834 = vrot.lane.b32.xlu2 %v4749_v19, %s4224_s29 }
 0x58d   :  { %810 = vrot.lane.b32.xlu0 %v4749_v19, %s4225_s30  ;;  %v4817_v37 = vpop.f32.mrf.mxu2 }
 0x58e   :  { %v4863_v56 = vpop.f32.mrf.mxu1 }
 0x594   :  { %716 = vrot.lane.b32.xlu1 %v4783_v23, %s4216_s22  ;;  %870 = vrot.lane.b32.xlu2 %v4749_v19, %s4226_s12 }
 0x595   :  { %846 = vrot.lane.b32.xlu0 %v4749_v19, %s4227_s13  ;;  %v4837_v47 = vpop.f32.mrf.mxu2 }
 0x596   :  { %v4877_v61 = vpop.f32.mrf.mxu1 }
 0x597   :  { %v1169_v28 = vmul.f32 %v4877_v61, %v4483_v17 }
 0x59c   :  { %752 = vrot.lane.b32.xlu1 %v4783_v23, %s4219_s4  ;;  %728 = vrot.lane.b32.xlu2 %v4783_v23, %s4215_s21 }
 0x59d   :  { %882 = vrot.lane.b32.xlu0 %v4749_v19, %s4228_s14  ;;  %v4859_v42 = vpop.f32.mrf.mxu2 }
 0x59e   :  { %v4895_v48 = vpop.f32.mrf.mxu1 }
 0x59f   :  { %v1170_v22 = vmul.f32 %v4895_v48, %v4481_v29 }
 0x5a4   :  { %788 = vrot.lane.b32.xlu1 %v4783_v23, %s4222_s27  ;;  %764 = vrot.lane.b32.xlu2 %v4783_v23, %s4218_s24 }
 0x5a5   :  { %740 = vrot.lane.b32.xlu0 %v4783_v23, %s4214_s20  ;;  %v4875_v60 = vpop.f32.mrf.mxu2 }
 0x5a6   :  { %v4803_v25 = vpop.permute.xlu2 %724  ;;  %v4909_v16 = vpop.f32.mrf.mxu1  ;;  %v1640_v2 = vmul.f32 %v4875_v60, %v4483_v17 }
 0x5a7   :  { %v1171_v24 = vmul.f32 %v4909_v16, %v4487_v31 }
 0x5ac   :  { %824 = vrot.lane.b32.xlu1 %v4783_v23, %s4220_s25  ;;  %800 = vrot.lane.b32.xlu2 %v4783_v23, %s4221_s26 }
 0x5ad   :  { %776 = vrot.lane.b32.xlu0 %v4783_v23, %s4217_s23  ;;  %v4889_v26 = vpop.f32.mrf.mxu2 }
 0x5ae   :  { %v4815_v35 = vpop.permute.xlu2 %760  ;;  %v1641_v17 = vmul.f32 %v4889_v26, %v4481_v29  ;;  %v4942_v44 = vpop.f32.mrf.mxu1 }
 0x5b4   :  { %860 = vrot.lane.b32.xlu1 %v4783_v23, %s4223_s28  ;;  %836 = vrot.lane.b32.xlu2 %v4783_v23, %s4224_s29 }
 0x5b5   :  { %812 = vrot.lane.b32.xlu0 %v4783_v23, %s4225_s30  ;;  %v4905_v6 = vpop.f32.mrf.mxu2 }
 0x5b6   :  { %v4827_v40 = vpop.permute.xlu2 %796  ;;  %v1642_v8 = vmul.f32 %v4905_v6, %v4487_v31 }
 0x5bc   :  { %718 = vrot.lane.b32.xlu1 %v4831_v45, %s4216_s22  ;;  %872 = vrot.lane.b32.xlu2 %v4783_v23, %s4226_s12 }
 0x5bd   :  { %848 = vrot.lane.b32.xlu0 %v4783_v23, %s4227_s13  ;;  %v4922_v11 = vpop.f32.mrf.mxu2 }
 0x5be   :  { %v4841_v49 = vpop.permute.xlu1 %736  ;;  %v4843_v41 = vpop.permute.xlu2 %832  ;;  %v1643_v7 = vmul.f32 %v4922_v11, %v4479_v27 }
 0x5bf   :  { %v4847_v51 = vpop.permute.xlu0 %712 }
 0x5c4   :  { %754 = vrot.lane.b32.xlu1 %v4831_v45, %s4219_s4  ;;  %730 = vrot.lane.b32.xlu2 %v4831_v45, %s4215_s21 }
 0x5c5   :  { %884 = vrot.lane.b32.xlu0 %v4783_v23, %s4228_s14 }
 0x5c6   :  { %v4855_v52 = vpop.permute.xlu1 %772  ;;  %v4857_v53 = vpop.permute.xlu2 %868 }
 0x5c7   :  { %v4861_v55 = vpop.permute.xlu0 %748 }
 0x5cc   :  { %790 = vrot.lane.b32.xlu1 %v4831_v45, %s4222_s27  ;;  %766 = vrot.lane.b32.xlu2 %v4831_v45, %s4218_s24 }
 0x5cd   :  { %742 = vrot.lane.b32.xlu0 %v4831_v45, %s4214_s20 }
 0x5ce   :  { %v4871_v57 = vpop.permute.xlu1 %820  ;;  %v727_v58 = vpop.permute.xlu2 %726 }
 0x5cf   :  { %v4873_v59 = vpop.permute.xlu0 %784 }
 0x5d4   :  { %814 = vrot.lane.b32.xlu1 %v4831_v45, %s4225_s30  ;;  %802 = vrot.lane.b32.xlu2 %v4831_v45, %s4221_s26 }
 0x5d5   :  { %778 = vrot.lane.b32.xlu0 %v4831_v45, %s4217_s23 }
 0x5d6   :  { %v4885_v62 = vpop.permute.xlu1 %856  ;;  %v763_v63 = vpop.permute.xlu2 %762 }
 0x5d7   :  { %v4887_v0 = vpop.permute.xlu0 %808 }
 0x5dc   :  { %850 = vrot.lane.b32.xlu1 %v4831_v45, %s4227_s13  ;;  %838 = vrot.lane.b32.xlu2 %v4831_v45, %s4224_s29 }
 0x5dd   :  { %826 = vrot.lane.b32.xlu0 %v4831_v45, %s4220_s25 }
 0x5de   :  { %v715_v46 = vpop.permute.xlu1 %714  ;;  %v799_v5 = vpop.permute.xlu2 %798 }
 0x5df   :  { %v4899_v1 = vpop.permute.xlu0 %844 }
 0x5e4   :  { %886 = vrot.lane.b32.xlu1 %v4831_v45, %s4228_s14  ;;  %874 = vrot.lane.b32.xlu2 %v4831_v45, %s4226_s12 }
 0x5e5   :  { %862 = vrot.lane.b32.xlu0 %v4831_v45, %s4223_s28 }
 0x5e6   :  { %v751_v13 = vpop.permute.xlu1 %750  ;;  %v835_v36 = vpop.permute.xlu2 %834 }
 0x5e7   :  { %v4911_v21 = vpop.permute.xlu0 %880 }
 0x5ec   :  { %1179 = vrot.lane.b32.xlu1 %v1170_v22, %s4213_s19  ;;  %1181 = vrot.lane.b32.xlu2 %v1171_v24, %s4213_s19 }
 0x5ed   :  { %1177 = vrot.lane.b32.xlu0 %v1169_v28, %s4213_s19  ;;  %v894_v28 = vsel %vm892_vm0, %v4749_v19, %v715_v46 }
 0x5ee   :  { %v787_v14 = vpop.permute.xlu1 %786  ;;  %v871_v10 = vpop.permute.xlu2 %870  ;;  %v899_v31 = vsel %vm897_vm2, %v894_v28, %v727_v58 }
 0x5ef   :  { %v739_v15 = vpop.permute.xlu0 %738 }
 0x5f0   :  { %v904_v54 = vsel %vm902_vm3, %v899_v31, %v739_v15  ;;  %v1172_v15 = vmul.f32 %v4942_v44, %v4479_v27 }
 0x5f4   :  { %1652 = vrot.lane.b32.xlu1 %v1642_v8, %s4213_s19  ;;  %1654 = vrot.lane.b32.xlu2 %v1643_v7, %s4213_s19  ;;  %v908_v8 = vsel %vm557_vm15, %v904_v54, %v751_v13 }
 0x5f5   :  { %1648 = vrot.lane.b32.xlu0 %v1640_v2, %s4213_s19  ;;  %v913_v2 = vsel %vm911_vm5, %v908_v8, %v763_v63  ;;  %v893_v63 = vsel %vm892_vm0, %v4719_v9, %v4847_v51 }
 0x5f6   :  { %v823_v22 = vpop.permute.xlu1 %822  ;;  %v729_v7 = vpop.permute.xlu2 %728  ;;  %v898_v8 = vsel %vm897_vm2, %v893_v63, %v4803_v25 }
 0x5f7   :  { %v775_v24 = vpop.permute.xlu0 %774 }
 0x5f8   :  { %v918_v58 = vsel %vm916_vm6, %v913_v2, %v775_v24  ;;  %v903_v2 = vsel %vm902_vm3, %v898_v8, %v4841_v49  ;;  %v4969_v49 = vld [vmem:[%s6938_s6 + $0x8] sm:$0xff] }
 0x5f9   :  { %v923_v31 = vsel %vm921_vm7, %v918_v58, %v787_v14  ;;  %v907_v9 = vsel %vm557_vm15, %v903_v2, %v4861_v55 }
 0x5fa   :  { %v912_v25 = vsel %vm911_vm5, %v907_v9, %v4815_v35 }
 0x5fb   :  { %v917_v55 = vsel %vm916_vm6, %v912_v25, %v4855_v52 }
 0x5fd   :  { %1650 = vrot.lane.b32.xlu0 %v1641_v17, %s4213_s19  ;;  %v928_v17 = vsel %vm926_vm8, %v923_v31, %v799_v5  ;;  %v922_v31 = vsel %vm921_vm7, %v917_v55, %v4873_v59 }
 0x5fe   :  { %v859_v19 = vpop.permute.xlu1 %858  ;;  %v765_v24 = vpop.permute.xlu2 %764 }
 0x5ff   :  { %v811_v46 = vpop.permute.xlu0 %810 }
 0x600   :  { %v933_v13 = vsel %vm931_vm9, %v928_v17, %v811_v46 }
 0x601   :  { %v938_v14 = vsel %vm936_vm10, %v933_v13, %v823_v22  ;;  %v927_v13 = vsel %vm926_vm8, %v922_v31, %v4827_v40 }
 0x602   :  { %v943_v5 = vsel %vm941_vm11, %v938_v14, %v835_v36 }
 0x605   :  { %1183 = vrot.lane.b32.xlu0 %v1172_v15, %s4213_s19 }
 0x606   :  { %v717_v54 = vpop.permute.xlu1 %716  ;;  %v801_v15 = vpop.permute.xlu2 %800 }
 0x607   :  { %v847_v28 = vpop.permute.xlu0 %846 }
 0x608   :  { %v948_v51 = vsel %vm946_vm12, %v943_v5, %v847_v28  ;;  %v895_v28 = vsel %vm892_vm0, %v4783_v23, %v717_v54 }
 0x609   :  { %v953_v22 = vsel %vm951_vm13, %v948_v51, %v859_v19  ;;  %v608_v19 = vadd.f32 %v4823_v39, %v4969_v49  ;;  %v900_v59 = vsel %vm897_vm2, %v895_v28, %v729_v7  ;;  %v5005_v51 = vld [vmem:[%s6938_s6] sm:$0xff] }
 0x60a   :  { %v958_v36 = vsel %vm956_vm14, %v953_v22, %v871_v10  ;;  %v932_v10 = vsel %vm931_vm9, %v927_v13, %v4887_v0 }
 0x60b   :  { %v937_v8 = vsel %vm936_vm10, %v932_v10, %v4871_v57 }
 0x60c   :  { %v942_v23 = vsel %vm941_vm11, %v937_v8, %v4843_v41 }
 0x60d   :  { %v947_v0 = vsel %vm946_vm12, %v942_v23, %v4899_v1 }
 0x60e   :  { %v753_v46 = vpop.permute.xlu1 %752  ;;  %v837_v14 = vpop.permute.xlu2 %836  ;;  %v952_v57 = vsel %vm951_vm13, %v947_v0, %v4885_v62  ;;  %v607_v62 = vadd.f32 %v4807_v20, %v5005_v51  ;;  %v5026_v20 = vld [vmem:[%s6938_s6 + $0x10] sm:$0xff] }
 0x60f   :  { %v883_v58 = vpop.permute.xlu0 %882  ;;  %v957_v41 = vsel %vm956_vm14, %v952_v57, %v4857_v53  ;;  %v609_v28 = vadd.f32 %v4845_v50, %v5026_v20 }
 0x610   :  { %v963_v35 = vsel %vm961_vm4, %v958_v36, %v883_v58  ;;  %v962_v1 = vsel %vm961_vm4, %v957_v41, %v4911_v21 }
 0x611   :  { %v4983_v52 = vadd.f32 %v963_v35, %v608_v19  ;;  %v5016_v36 = vadd.f32 %v962_v1, %v607_v62 }
 0x613   :  { %v973_v2 = vsel %vm98_vm1, %v4983_v52, -inf  ;;  %v970_v35 = vsel %vm98_vm1, %v5016_v36, -inf }
 0x616   :  { %v789_v17 = vpop.permute.xlu1 %788 }
 0x617   :  { %v741_v63 = vpop.permute.xlu0 %740 }
 0x618   :  { %v905_v39 = vsel %vm902_vm3, %v900_v59, %v741_v63 }
 0x619   :  { %v909_v54 = vsel %vm557_vm15, %v905_v39, %v753_v46  ;;  %v873_v46 = vpop.permute.xlu2 %872 }
 0x61a   :  { %v914_v7 = vsel %vm911_vm5, %v909_v54, %v765_v24 }
 0x61d   :  { %974 = vmax.xlane.f32.xlu2 %v973_v2 }
 0x61e   :  { %v825_v40 = vpop.permute.xlu1 %824 }
 0x61f   :  { %v777_v5 = vpop.permute.xlu0 %776 }
 0x620   :  { %v919_v9 = vsel %vm916_vm6, %v914_v7, %v777_v5 }
 0x621   :  { %v924_v58 = vsel %vm921_vm7, %v919_v9, %v789_v17  ;;  %v731_v17 = vpop.permute.xlu2 %730 }
 0x622   :  { %v929_v22 = vsel %vm926_vm8, %v924_v58, %v801_v15 }
 0x626   :  { %v861_v25 = vpop.permute.xlu1 %860 }
 0x627   :  { %v813_v24 = vpop.permute.xlu0 %812 }
 0x628   :  { %v934_v55 = vsel %vm931_vm9, %v929_v22, %v813_v24 }
 0x629   :  { %v939_v31 = vsel %vm936_vm10, %v934_v55, %v825_v40 }
 0x62a   :  { %v944_v21 = vsel %vm941_vm11, %v939_v31, %v837_v14  ;;  %v767_v14 = vpop.permute.xlu2 %766  ;;  %v5052_v31 = vld [vmem:[%s6938_s6 + $0x18] sm:$0xff] }
 0x62e   :  { %v719_v53 = vpop.permute.xlu1 %718 }
 0x62f   :  { %971 = vmax.xlane.f32.xlu0 %v970_v35  ;;  %v849_v19 = vpop.permute.xlu0 %848  ;;  %v896_v40 = vsel %vm892_vm0, %v4831_v45, %v719_v53 }
 0x630   :  { %v949_v63 = vsel %vm946_vm12, %v944_v21, %v849_v19  ;;  %v901_v5 = vsel %vm897_vm2, %v896_v40, %v731_v17  ;;  %v610_v21 = vadd.f32 %v4863_v56, %v5052_v31  ;;  %v1162_v40 = vmul.f32 %v4895_v48, %v4485_v30 }
 0x631   :  { %v954_v15 = vsel %vm951_vm13, %v949_v63, %v861_v25 }
 0x632   :  { %v959_v10 = vsel %vm956_vm14, %v954_v15, %v873_v46  ;;  %v803_v0 = vpop.permute.xlu2 %802 }
 0x636   :  { %v755_v13 = vpop.permute.xlu1 %754 }
 0x637   :  { %v885_v59 = vpop.permute.xlu0 %884 }
 0x638   :  { %v964_v8 = vsel %vm961_vm4, %v959_v10, %v885_v59  ;;  %v1161_v59 = vmul.f32 %v4877_v61, %v4492_v34  ;;  %v1632_v61 = vmul.f32 %v4875_v60, %v4492_v34 }
 0x639   :  { %v5033_v39 = vadd.f32 %v964_v8, %v609_v28 }
 0x63a   :  { %v839_v45 = vpop.permute.xlu2 %838 }
 0x63b   :  { %v976_v2 = vsel %vm98_vm1, %v5033_v39, -inf }
 0x63c   :  { %977 = vmax.xlane.f32.xlu1 %v976_v2 }
 0x63e   :  { %v791_v23 = vpop.permute.xlu1 %790 }
 0x63f   :  { %v743_v54 = vpop.permute.xlu0 %742 }
 0x640   :  { %v906_v50 = vsel %vm902_vm3, %v901_v5, %v743_v54  ;;  %v1633_v5 = vmul.f32 %v4889_v26, %v4485_v30  ;;  %v1164_v30 = vmul.f32 %v4942_v44, %v4500_v43 }
 0x641   :  { %v910_v7 = vsel %vm557_vm15, %v906_v50, %v755_v13 }
 0x642   :  { %v915_v9 = vsel %vm911_vm5, %v910_v7, %v767_v14  ;;  %v875_v19 = vpop.permute.xlu2 %874 }
 0x646   :  { %v815_v57 = vpop.permute.xlu1 %814 }
 0x647   :  { %v779_v41 = vpop.permute.xlu0 %778 }
 0x648   :  { %v920_v46 = vsel %vm916_vm6, %v915_v9, %v779_v41 }
 0x649   :  { %v925_v58 = vsel %vm921_vm7, %v920_v46, %v791_v23 }
 0x64a   :  { %v930_v25 = vsel %vm926_vm8, %v925_v58, %v803_v0  ;;  %v1182_v48 = vpop.permute.xlu2 %1181 }
 0x64b   :  { %v935_v62 = vsel %vm931_vm9, %v930_v25, %v815_v57 }
 0x64e   :  { %v851_v1 = vpop.permute.xlu1 %850 }
 0x64f   :  { %v827_v24 = vpop.permute.xlu0 %826 }
 0x650   :  { %v940_v22 = vsel %vm936_vm10, %v935_v62, %v827_v24 }
 0x651   :  { %v945_v55 = vsel %vm941_vm11, %v940_v22, %v839_v45  ;;  %v1163_v22 = vmul.f32 %v4909_v16, %v4489_v32 }
 0x652   :  { %v950_v53 = vsel %vm946_vm12, %v945_v55, %v851_v1  ;;  %v5148_v0 = vpop.permute.xlu2 %1654 }
 0x653   :  { %v5204_v55 = vadd.f32 %v1182_v48, %v1163_v22 }
 0x656   :  { %v887_v63 = vpop.permute.xlu1 %886 }
 0x657   :  { %v863_v35 = vpop.permute.xlu0 %862 }
 0x658   :  { %v955_v17 = vsel %vm951_vm13, %v950_v53, %v863_v35 }
 0x659   :  { %v960_v15 = vsel %vm956_vm14, %v955_v17, %v875_v19 }
 0x65a   :  { %v965_v13 = vsel %vm961_vm4, %v960_v15, %v887_v63 }
 0x65b   :  { %v5060_v28 = vadd.f32 %v965_v13, %v610_v21 }
 0x65d   :  { %v979_v10 = vsel %vm98_vm1, %v5060_v28, -inf }
 0x65e   :  { %980 = vmax.xlane.f32.xlu2 %v979_v10  ;;  %v1180_v60 = vpop.permute.xlu1 %1179 }
 0x65f   :  { %v1178_v8 = vpop.permute.xlu0 %1177  ;;  %v5100_v23 = vadd.f32 %v1180_v60, %v1162_v40  ;;  %v1634_v60 = vmul.f32 %v4905_v6, %v4489_v32 }
 0x660   :  { %v5066_v14 = vadd.f32 %v1178_v8, %v1161_v59 }
 0x662   :  { %1269 = vrot.lane.b32.xlu1 %v5066_v14, %s4222_s27  ;;  %1257 = vrot.lane.b32.xlu0 %v5066_v14, %s4217_s23 }
 0x666   :  { %v1653_v46 = vpop.permute.xlu1 %1652 }
 0x667   :  { %v1649_v56 = vpop.permute.xlu0 %1648  ;;  %v5266_v40 = vadd.f32 %v1653_v46, %v1634_v60 }
 0x668   :  { %v5078_v2 = vadd.f32 %v1649_v56, %v1632_v61 }
 0x66a   :  { %1305 = vrot.lane.b32.xlu1 %v5066_v14, %s4220_s25  ;;  %1293 = vrot.lane.b32.xlu0 %v5066_v14, %s4225_s30  ;;  %7005 = vst [vmem:[#allocation28_spill] sm:$0xff] %v5078_v2 }
 0x66f   :  { %v1651_v54 = vpop.permute.xlu0 %1650 }
 0x670   :  { %v5146_v50 = vadd.f32 %v1651_v54, %v1633_v5 }
 0x672   :  { %1329 = vrot.lane.b32.xlu0 %v5066_v14, %s4227_s13  ;;  %1692 = vrot.lane.b32.xlu1 %v5078_v2, %s4214_s20  ;;  %7006 = vst [vmem:[#allocation29_spill] sm:$0xff] %v5146_v50 }
 0x676   :  { %1197 = vrot.lane.b32.xlu2 %v5066_v14, %s4216_s22 }
 0x677   :  { %v5154_v7 = vpop.permute.xlu0 %1183 }
 0x678   :  { %v5305_v34 = vadd.f32 %v5154_v7, %v1164_v30 }
 0x67a   :  { %1341 = vrot.lane.b32.xlu0 %v5066_v14, %s4223_s28  ;;  %1764 = vrot.lane.b32.xlu1 %v5078_v2, %s4225_s30 }
 0x67e   :  { %1209 = vrot.lane.b32.xlu2 %v5066_v14, %s4215_s21 }
 0x682   :  { %1353 = vrot.lane.b32.xlu0 %v5066_v14, %s4226_s12  ;;  %1812 = vrot.lane.b32.xlu1 %v5078_v2, %s4223_s28 }
 0x686   :  { %1221 = vrot.lane.b32.xlu2 %v5066_v14, %s4214_s20 }
 0x68a   :  { %1365 = vrot.lane.b32.xlu0 %v5066_v14, %s4228_s14  ;;  %1235 = vrot.lane.b32.xlu1 %v5100_v23, %s4219_s4 }
 0x68e   :  { %1233 = vrot.lane.b32.xlu2 %v5066_v14, %s4219_s4 }
 0x690   :  { %v5158_v57 = vpop.xlane.xlu2 %974 }
 0x692   :  { %1247 = vrot.lane.b32.xlu1 %v5100_v23, %s4218_s24  ;;  %1680 = vrot.lane.b32.xlu0 %v5078_v2, %s4215_s21 }
 0x696   :  { %1245 = vrot.lane.b32.xlu2 %v5066_v14, %s4218_s24 }
 0x69a   :  { %1259 = vrot.lane.b32.xlu1 %v5100_v23, %s4217_s23  ;;  %1776 = vrot.lane.b32.xlu0 %v5078_v2, %s4220_s25 }
 0x69e   :  { %1281 = vrot.lane.b32.xlu2 %v5066_v14, %s4221_s26 }
 0x6a2   :  { %1271 = vrot.lane.b32.xlu1 %v5100_v23, %s4222_s27  ;;  %1824 = vrot.lane.b32.xlu0 %v5078_v2, %s4226_s12  ;;  %v5164_v26 = vpop.xlane.xlu0 %971 }
 0x6a3   :  { %v982_v18 = vsub.f32 %v5016_v36, %v5164_v26 }
 0x6a6   :  { %1317 = vrot.lane.b32.xlu2 %v5066_v14, %s4224_s29 }
 0x6aa   :  { %1283 = vrot.lane.b32.xlu1 %v5100_v23, %s4221_s26  ;;  %1223 = vrot.lane.b32.xlu0 %v5100_v23, %s4214_s20 }
 0x6ae   :  { %1668 = vrot.lane.b32.xlu2 %v5078_v2, %s4216_s22 }
 0x6af   :  { %v5186_v45 = vpop.xlane.xlu1 %977 }
 0x6b2   :  { %1307 = vrot.lane.b32.xlu1 %v5100_v23, %s4220_s25  ;;  %1295 = vrot.lane.b32.xlu0 %v5100_v23, %s4225_s30 }
 0x6b6   :  { %1704 = vrot.lane.b32.xlu2 %v5078_v2, %s4219_s4 }
 0x6ba   :  { %1319 = vrot.lane.b32.xlu1 %v5100_v23, %s4224_s29  ;;  %1367 = vrot.lane.b32.xlu0 %v5100_v23, %s4228_s14 }
 0x6be   :  { %1716 = vrot.lane.b32.xlu2 %v5078_v2, %s4218_s24 }
 0x6c2   :  { %1331 = vrot.lane.b32.xlu1 %v5100_v23, %s4227_s13  ;;  %1694 = vrot.lane.b32.xlu0 %v5146_v50, %s4214_s20 }
 0x6c6   :  { %1728 = vrot.lane.b32.xlu2 %v5078_v2, %s4217_s23 }
 0x6ca   :  { %1343 = vrot.lane.b32.xlu1 %v5100_v23, %s4223_s28  ;;  %1706 = vrot.lane.b32.xlu0 %v5146_v50, %s4219_s4 }
 0x6ce   :  { %1740 = vrot.lane.b32.xlu2 %v5078_v2, %s4222_s27 }
 0x6d1   :  { %v5168_v9 = vpop.xlane.xlu2 %980 }
 0x6d2   :  { %1742 = vrot.lane.b32.xlu0 %v5146_v50, %s4222_s27  ;;  %1682 = vrot.lane.b32.xlu1 %v5146_v50, %s4215_s21 }
 0x6d4   :  { %v5174_v41 = vpop.permute.xlu0 %1257  ;;  %v5198_v62 = vpop.permute.xlu1 %1269 }
 0x6d6   :  { %1752 = vrot.lane.b32.xlu2 %v5078_v2, %s4221_s26 }
 0x6d9   :  { %v5178_v58 = vpop.permute.xlu2 %1197 }
 0x6da   :  { %1778 = vrot.lane.b32.xlu0 %v5146_v50, %s4220_s25  ;;  %1730 = vrot.lane.b32.xlu1 %v5146_v50, %s4217_s23 }
 0x6dc   :  { %v5184_v25 = vpop.permute.xlu0 %1293  ;;  %v5216_v19 = vpop.permute.xlu1 %1305 }
 0x6de   :  { %1788 = vrot.lane.b32.xlu2 %v5078_v2, %s4224_s29 }
 0x6e1   :  { %v5190_v1 = vpop.permute.xlu2 %1209 }
 0x6e2   :  { %1826 = vrot.lane.b32.xlu0 %v5146_v50, %s4226_s12  ;;  %1766 = vrot.lane.b32.xlu1 %v5146_v50, %s4225_s30 }
 0x6e4   :  { %v5196_v24 = vpop.permute.xlu0 %1329  ;;  %v5228_v21 = vpop.permute.xlu1 %1692 }
 0x6e5   :  { %7007 = vst [vmem:[#allocation30_spill] sm:$0xff] %v5228_v21 }
 0x6e6   :  { %1800 = vrot.lane.b32.xlu2 %v5078_v2, %s4227_s13 }
 0x6e9   :  { %v5206_v53 = vpop.permute.xlu2 %1221 }
 0x6ea   :  { %1225 = vrot.lane.b32.xlu0 %v5204_v55, %s4214_s20  ;;  %1814 = vrot.lane.b32.xlu1 %v5146_v50, %s4223_s28 }
 0x6ec   :  { %v5212_v35 = vpop.permute.xlu0 %1341  ;;  %v5246_v10 = vpop.permute.xlu1 %1764 }
 0x6ed   :  { %7008 = vst [vmem:[#allocation31_spill] sm:$0xff] %v5246_v10 }
 0x6ee   :  { %1836 = vrot.lane.b32.xlu2 %v5078_v2, %s4228_s14  ;;  %v983_v2 = vsub.f32 %v4983_v52, %v5158_v57 }
 0x6f1   :  { %v5218_v16 = vpop.permute.xlu2 %1233 }
 0x6f2   :  { %1237 = vrot.lane.b32.xlu0 %v5204_v55, %s4219_s4  ;;  %1201 = vrot.lane.b32.xlu1 %v5204_v55, %s4216_s22 }
 0x6f4   :  { %v5224_v17 = vpop.permute.xlu0 %1353  ;;  %v5260_v61 = vpop.permute.xlu1 %1812 }
 0x6f5   :  { %7011 = vst [vmem:[#allocation34_spill] sm:$0xff] %v5260_v61 }
 0x6f6   :  { %1199 = vrot.lane.b32.xlu2 %v5100_v23, %s4216_s22 }
 0x6f9   :  { %v5230_v63 = vpop.permute.xlu2 %1245 }
 0x6fa   :  { %1261 = vrot.lane.b32.xlu0 %v5204_v55, %s4217_s23  ;;  %1273 = vrot.lane.b32.xlu1 %v5204_v55, %s4222_s27 }
 0x6fc   :  { %v5236_v15 = vpop.permute.xlu0 %1365  ;;  %v5278_v5 = vpop.permute.xlu1 %1235 }
 0x6fe   :  { %1211 = vrot.lane.b32.xlu2 %v5100_v23, %s4215_s21 }
 0x701   :  { %v5240_v13 = vpop.permute.xlu2 %1281 }
 0x702   :  { %1309 = vrot.lane.b32.xlu0 %v5204_v55, %s4220_s25  ;;  %1321 = vrot.lane.b32.xlu1 %v5204_v55, %s4224_s29 }
 0x704   :  { %v5248_v59 = vpop.permute.xlu0 %1680  ;;  %v5290_v22 = vpop.permute.xlu1 %1247 }
 0x705   :  { %7009 = vst [vmem:[#allocation32_spill] sm:$0xff] %v5248_v59 }
 0x706   :  { %1355 = vrot.lane.b32.xlu2 %v5100_v23, %s4226_s12 }
 0x709   :  { %v5252_v8 = vpop.permute.xlu2 %1317 }
 0x70a   :  { %1357 = vrot.lane.b32.xlu0 %v5204_v55, %s4226_s12  ;;  %1369 = vrot.lane.b32.xlu1 %v5204_v55, %s4228_s14 }
 0x70c   :  { %v5258_v56 = vpop.permute.xlu0 %1776  ;;  %v5313_v29 = vpop.permute.xlu1 %1259 }
 0x70d   :  { %7010 = vst [vmem:[#allocation33_spill] sm:$0xff] %v5258_v56 }
 0x70e   :  { %1670 = vrot.lane.b32.xlu2 %v5146_v50, %s4216_s22 }
 0x711   :  { %v5268_v48 = vpop.permute.xlu2 %1668 }
 0x712   :  { %7012 = vst [vmem:[#allocation35_spill] sm:$0xff] %v5268_v48  ;;  %1696 = vrot.lane.b32.xlu0 %v5266_v40, %s4214_s20  ;;  %1684 = vrot.lane.b32.xlu1 %v5266_v40, %s4215_s21  ;;  %v988_v48 = vmul.f32 1.442695, %v983_v2 }
 0x714   :  { %v5274_v54 = vpop.permute.xlu0 %1824  ;;  %v5327_v7 = vpop.permute.xlu1 %1271  ;;  %4026 = vpow2.f32 %v988_v48 }
 0x715   :  { %7013 = vst [vmem:[#allocation36_spill] sm:$0xff] %v5274_v54 }
 0x716   :  { %1718 = vrot.lane.b32.xlu2 %v5146_v50, %s4218_s24 }
 0x719   :  { %v5280_v6 = vpop.permute.xlu2 %1704 }
 0x71a   :  { %7014 = vst [vmem:[#allocation37_spill] sm:$0xff] %v5280_v6  ;;  %1708 = vrot.lane.b32.xlu0 %v5266_v40, %s4219_s4  ;;  %1732 = vrot.lane.b32.xlu1 %v5266_v40, %s4217_s23  ;;  %v5428_v52 = vpop.eup %4026 }
 0x71b   :  { %v997_v48 = vsel %vm98_vm1, %v5428_v52, 0.0 }
 0x71c   :  { %v5286_v46 = vpop.permute.xlu0 %1223  ;;  %v5341_v10 = vpop.permute.xlu1 %1283 }
 0x71e   :  { %1754 = vrot.lane.b32.xlu2 %v5146_v50, %s4221_s26 }
 0x721   :  { %v5292_v60 = vpop.permute.xlu2 %1716 }
 0x722   :  { %7015 = vst [vmem:[#allocation38_spill] sm:$0xff] %v5292_v60  ;;  %1744 = vrot.lane.b32.xlu0 %v5266_v40, %s4222_s27  ;;  %1768 = vrot.lane.b32.xlu1 %v5266_v40, %s4225_s30 }
 0x724   :  { %v5298_v32 = vpop.permute.xlu0 %1295 }
 0x726   :  { %1790 = vrot.lane.b32.xlu2 %v5146_v50, %s4224_s29 }
 0x729   :  { %v5307_v27 = vpop.permute.xlu2 %1728 }
 0x72a   :  { %7016 = vst [vmem:[#allocation39_spill] sm:$0xff] %v5307_v27  ;;  %1780 = vrot.lane.b32.xlu0 %v5266_v40, %s4220_s25  ;;  %1215 = vrot.lane.b32.xlu1 %v5305_v34, %s4215_s21  ;;  %v5353_v27 = vpop.permute.xlu1 %1307 }
 0x72c   :  { %v5315_v54 = vpop.permute.xlu0 %1367 }
 0x72e   :  { %1802 = vrot.lane.b32.xlu2 %v5146_v50, %s4227_s13 }
 0x731   :  { %v5319_v44 = vpop.permute.xlu2 %1740 }
 0x732   :  { %7017 = vst [vmem:[#allocation40_spill] sm:$0xff] %v5319_v44  ;;  %1263 = vrot.lane.b32.xlu1 %v5305_v34, %s4217_s23  ;;  %1203 = vrot.lane.b32.xlu0 %v5305_v34, %s4216_s22 }
 0x734   :  { %v5325_v30 = vpop.permute.xlu0 %1694 }
 0x735   :  { %7018 = vst [vmem:[#allocation41_spill] sm:$0xff] %v5325_v30  ;;  %v1635_v30 = vmul.f32 %v4922_v11, %v4500_v43 }
 0x736   :  { %1838 = vrot.lane.b32.xlu2 %v5146_v50, %s4228_s14 }
 0x739   :  { %v5331_v61 = vpop.permute.xlu2 %1752 }
 0x73a   :  { %7019 = vst [vmem:[#allocation42_spill] sm:$0xff] %v5331_v61  ;;  %1299 = vrot.lane.b32.xlu1 %v5305_v34, %s4225_s30  ;;  %1239 = vrot.lane.b32.xlu0 %v5305_v34, %s4219_s4 }
 0x73c   :  { %v5337_v56 = vpop.permute.xlu0 %1706 }
 0x73d   :  { %7020 = vst [vmem:[#allocation43_spill] sm:$0xff] %v5337_v56 }
 0x73e   :  { %1213 = vrot.lane.b32.xlu2 %v5204_v55, %s4215_s21 }
 0x741   :  { %v5343_v44 = vpop.permute.xlu2 %1788 }
 0x742   :  { %7021 = vst [vmem:[#allocation44_spill] sm:$0xff] %v5343_v44  ;;  %1335 = vrot.lane.b32.xlu1 %v5305_v34, %s4227_s13  ;;  %1251 = vrot.lane.b32.xlu0 %v5305_v34, %s4218_s24 }
 0x744   :  { %v5349_v61 = vpop.permute.xlu0 %1742 }
 0x745   :  { %7022 = vst [vmem:[#allocation45_spill] sm:$0xff] %v5349_v61  ;;  %v5368_v61 = vadd.f32 %v5148_v0, %v1635_v30 }
 0x746   :  { %1249 = vrot.lane.b32.xlu2 %v5204_v55, %s4218_s24 }
 0x749   :  { %v5355_v56 = vpop.permute.xlu2 %1800 }
 0x74a   :  { %7023 = vst [vmem:[#allocation46_spill] sm:$0xff] %v5355_v56  ;;  %1371 = vrot.lane.b32.xlu1 %v5305_v34, %s4228_s14  ;;  %1311 = vrot.lane.b32.xlu0 %v5305_v34, %s4220_s25  ;;  %v5376_v56 = vpop.permute.xlu1 %1319 }
 0x74c   :  { %v5361_v44 = vpop.permute.xlu0 %1778 }
 0x74d   :  { %7024 = vst [vmem:[#allocation47_spill] sm:$0xff] %v5361_v44 }
 0x74e   :  { %1285 = vrot.lane.b32.xlu2 %v5204_v55, %s4221_s26 }
 0x751   :  { %v5370_v60 = vpop.permute.xlu2 %1836 }
 0x752   :  { %7025 = vst [vmem:[#allocation48_spill] sm:$0xff] %v5370_v60  ;;  %1686 = vrot.lane.b32.xlu1 %v5368_v61, %s4215_s21  ;;  %1347 = vrot.lane.b32.xlu0 %v5305_v34, %s4223_s28  ;;  %v5388_v30 = vpop.permute.xlu1 %1331 }
 0x754   :  { %v5378_v44 = vpop.permute.xlu0 %1826 }
 0x755   :  { %7026 = vst [vmem:[#allocation49_spill] sm:$0xff] %v5378_v44 }
 0x756   :  { %1297 = vrot.lane.b32.xlu2 %v5204_v55, %s4225_s30 }
 0x759   :  { %v1200_v11 = vpop.permute.xlu2 %1199 }
 0x75a   :  { %1770 = vrot.lane.b32.xlu1 %v5368_v61, %s4225_s30  ;;  %1698 = vrot.lane.b32.xlu0 %v5368_v61, %s4214_s20  ;;  %v5398_v60 = vpop.permute.xlu1 %1343 }
 0x75c   :  { %v5386_v0 = vpop.permute.xlu0 %1225 }
 0x75e   :  { %1333 = vrot.lane.b32.xlu2 %v5204_v55, %s4227_s13 }
 0x761   :  { %v1212_v43 = vpop.permute.xlu2 %1211 }
 0x762   :  { %1710 = vrot.lane.b32.xlu0 %v5368_v61, %s4219_s4  ;;  %v5408_v59 = vpop.permute.xlu1 %1682 }
 0x763   :  { %7027 = vst [vmem:[#allocation50_spill] sm:$0xff] %v5408_v59 }
 0x764   :  { %v5394_v44 = vpop.permute.xlu0 %1237 }
 0x766   :  { %1345 = vrot.lane.b32.xlu2 %v5204_v55, %s4223_s28 }
 0x769   :  { %v5400_v6 = vpop.permute.xlu2 %1355 }
 0x76a   :  { %1722 = vrot.lane.b32.xlu0 %v5368_v61, %s4218_s24  ;;  %v5424_v59 = vpop.permute.xlu1 %1730 }
 0x76b   :  { %7030 = vst [vmem:[#allocation53_spill] sm:$0xff] %v5424_v59 }
 0x76c   :  { %v5404_v21 = vpop.permute.xlu0 %1261 }
 0x76e   :  { %1672 = vrot.lane.b32.xlu2 %v5266_v40, %s4216_s22 }
 0x771   :  { %v5410_v50 = vpop.permute.xlu2 %1670 }
 0x772   :  { %7028 = vst [vmem:[#allocation51_spill] sm:$0xff] %v5410_v50  ;;  %1734 = vrot.lane.b32.xlu0 %v5368_v61, %s4217_s23 }
 0x774   :  { %v5418_v12 = vpop.permute.xlu0 %1309 }
 0x776   :  { %1720 = vrot.lane.b32.xlu2 %v5266_v40, %s4218_s24 }
 0x779   :  { %v5420_v4 = vpop.permute.xlu2 %1718 }
 0x77a   :  { %7029 = vst [vmem:[#allocation52_spill] sm:$0xff] %v5420_v4  ;;  %1746 = vrot.lane.b32.xlu0 %v5368_v61, %s4222_s27  ;;  %v5438_v4 = vpop.permute.xlu1 %1766 }
 0x77b   :  { %7032 = vst [vmem:[#allocation55_spill] sm:$0xff] %v5438_v4 }
 0x77c   :  { %v5430_v57 = vpop.permute.xlu0 %1357 }
 0x77e   :  { %1756 = vrot.lane.b32.xlu2 %v5266_v40, %s4221_s26 }
 0x781   :  { %v5432_v2 = vpop.permute.xlu2 %1754 }
 0x782   :  { %7031 = vst [vmem:[#allocation54_spill] sm:$0xff] %v5432_v2  ;;  %1758 = vrot.lane.b32.xlu0 %v5368_v61, %s4221_s26  ;;  %v5448_v2 = vpop.permute.xlu1 %1814 }
 0x783   :  { %7035 = vst [vmem:[#allocation58_spill] sm:$0xff] %v5448_v2 }
 0x784   :  { %998 = vadd.xlane.f32.xlu1 %v997_v48  ;;  %v5444_v50 = vpop.permute.xlu0 %1696  ;;  %v1378_v48 = vsel %vm892_vm0, %v5100_v23, %v1200_v11 }
 0x785   :  { %7034 = vst [vmem:[#allocation57_spill] sm:$0xff] %v5444_v50  ;;  %v1382_v4 = vsel %vm897_vm2, %v1378_v48, %v1212_v43 }
 0x786   :  { %1792 = vrot.lane.b32.xlu2 %v5266_v40, %s4224_s29  ;;  %v1386_v2 = vsel %vm902_vm3, %v1382_v4, %v5286_v46  ;;  %v984_v4 = vsub.f32 %v5033_v39, %v5186_v45 }
 0x788   :  { %v990_v26 = vmul.f32 1.442695, %v984_v4 }
 0x789   :  { %v5442_v59 = vpop.permute.xlu2 %1790 }
 0x78a   :  { %7033 = vst [vmem:[#allocation56_spill] sm:$0xff] %v5442_v59  ;;  %v5459_v59 = vpop.permute.xlu1 %1201 }
 0x78c   :  { %v5452_v38 = vpop.permute.xlu0 %1708 }
 0x78d   :  { %7037 = vst [vmem:[#allocation60_spill] sm:$0xff] %v5452_v38  ;;  %v1390_v38 = vsel %vm557_vm15, %v1386_v2, %v5278_v5 }
 0x78e   :  { %1804 = vrot.lane.b32.xlu2 %v5266_v40, %s4227_s13  ;;  %v1394_v23 = vsel %vm911_vm5, %v1390_v38, %v5290_v22 }
 0x791   :  { %v5450_v3 = vpop.permute.xlu2 %1802 }
 0x792   :  { %7036 = vst [vmem:[#allocation59_spill] sm:$0xff] %v5450_v3  ;;  %v986_v3 = vmul.f32 1.442695, %v982_v18  ;;  %v5481_v36 = vpop.permute.xlu1 %1273  ;;  %v1398_v18 = vsel %vm916_vm6, %v1394_v23, %v5313_v29 }
 0x793   :  { %v1402_v5 = vsel %vm921_vm7, %v1398_v18, %v5327_v7 }
 0x794   :  { %v5473_v43 = vpop.permute.xlu0 %1744  ;;  %4028 = vpow2.f32 %v986_v3  ;;  %v1406_v39 = vsel %vm926_vm8, %v1402_v5, %v5341_v10 }
 0x795   :  { %4030 = vpow2.f32 %v990_v26  ;;  %v1410_v45 = vsel %vm931_vm9, %v1406_v39, %v5298_v32  ;;  %v1129_v39 = vadd.f32 %v4817_v37, %v4969_v49  ;;  %v1377_v49 = vsel %vm892_vm0, %v5066_v14, %v5178_v58 }
 0x796   :  { %1816 = vrot.lane.b32.xlu2 %v5266_v40, %s4223_s28  ;;  %v1414_v2 = vsel %vm936_vm10, %v1410_v45, %v5353_v27 }
 0x797   :  { %v1418_v10 = vsel %vm941_vm11, %v1414_v2, %v5376_v56 }
 0x798   :  { %v1422_v4 = vsel %vm946_vm12, %v1418_v10, %v5388_v30  ;;  %v1381_v10 = vsel %vm897_vm2, %v1377_v49, %v5190_v1 }
 0x799   :  { %v5461_v50 = vpop.permute.xlu2 %1838  ;;  %v1426_v27 = vsel %vm951_vm13, %v1422_v4, %v5398_v60 }
 0x79a   :  { %v5489_v46 = vpop.eup %4028  ;;  %v5501_v22 = vpop.permute.xlu1 %1321  ;;  %v1430_v56 = vsel %vm956_vm14, %v1426_v27, %v5400_v6 }
 0x79b   :  { %v994_v29 = vsel %vm98_vm1, %v5489_v46, 0.0  ;;  %v5505_v7 = vpop.eup %4030  ;;  %v1434_v30 = vsel %vm961_vm4, %v1430_v56, %v5315_v54 }
 0x79c   :  { %v5491_v38 = vpop.permute.xlu0 %1780  ;;  %v1000_v32 = vsel %vm98_vm1, %v5505_v7, 0.0  ;;  %v5541_v60 = vadd.f32 %v1434_v30, %v1129_v39 }
 0x79d   :  { %1818 = vrot.lane.b32.xlu1 %v5368_v61, %s4223_s28 }
 0x79e   :  { %1828 = vrot.lane.b32.xlu2 %v5266_v40, %s4226_s12  ;;  %v1444_v6 = vsel %vm98_vm1, %v5541_v60, -inf }
 0x7a1   :  { %v5477_v11 = vpop.permute.xlu2 %1213 }
 0x7a2   :  { %v5521_v18 = vpop.permute.xlu1 %1369 }
 0x7a4   :  { %v5513_v23 = vpop.permute.xlu0 %1203 }
 0x7a6   :  { %1840 = vrot.lane.b32.xlu2 %v5266_v40, %s4228_s14 }
 0x7a9   :  { %v5493_v3 = vpop.permute.xlu2 %1249 }
 0x7ac   :  { %995 = vadd.xlane.f32.xlu0 %v994_v29  ;;  %v5529_v5 = vpop.permute.xlu0 %1239  ;;  %v5537_v29 = vpop.permute.xlu1 %1684 }
 0x7ae   :  { %1227 = vrot.lane.b32.xlu2 %v5305_v34, %s4214_s20 }
 0x7b1   :  { %v5509_v48 = vpop.permute.xlu2 %1285 }
 0x7b4   :  { %1001 = vadd.xlane.f32.xlu0 %v1000_v32  ;;  %v5547_v2 = vpop.permute.xlu0 %1251  ;;  %v5553_v37 = vpop.permute.xlu1 %1732  ;;  %v1385_v32 = vsel %vm902_vm3, %v1381_v10, %v5206_v53 }
 0x7b5   :  { %v1389_v4 = vsel %vm557_vm15, %v1385_v32, %v5218_v16 }
 0x7b6   :  { %1275 = vrot.lane.b32.xlu2 %v5305_v34, %s4222_s27  ;;  %v1393_v27 = vsel %vm911_vm5, %v1389_v4, %v5230_v63 }
 0x7b7   :  { %v1397_v14 = vsel %vm916_vm6, %v1393_v27, %v5174_v41  ;;  %v1128_v27 = vadd.f32 %v4805_v33, %v5005_v51 }
 0x7b8   :  { %v1401_v1 = vsel %vm921_vm7, %v1397_v14, %v5198_v62 }
 0x7b9   :  { %v5525_v26 = vpop.permute.xlu2 %1297  ;;  %v1405_v53 = vsel %vm926_vm8, %v1401_v1, %v5240_v13 }
 0x7ba   :  { %v1409_v63 = vsel %vm931_vm9, %v1405_v53, %v5184_v25  ;;  %v985_v53 = vsub.f32 %v5060_v28, %v5168_v9 }
 0x7bb   :  { %v1413_v41 = vsel %vm936_vm10, %v1409_v63, %v5216_v19 }
 0x7bc   :  { %v5568_v56 = vpop.permute.xlu0 %1311  ;;  %v5574_v58 = vpop.permute.xlu1 %1768  ;;  %v992_v63 = vmul.f32 1.442695, %v985_v53 }
 0x7be   :  { %1287 = vrot.lane.b32.xlu2 %v5305_v34, %s4221_s26  ;;  %4032 = vpow2.f32 %v992_v63 }
 0x7c1   :  { %v5539_v45 = vpop.permute.xlu2 %1333 }
 0x7c4   :  { %v5586_v39 = vpop.permute.xlu0 %1347  ;;  %v1216_v62 = vpop.permute.xlu1 %1215 }
 0x7c6   :  { %1323 = vrot.lane.b32.xlu2 %v5305_v34, %s4224_s29 }
 0x7c7   :  { %1445 = vmax.xlane.f32.xlu1 %v1444_v6  ;;  %v1417_v6 = vsel %vm941_vm11, %v1413_v41, %v5252_v8 }
 0x7c8   :  { %1794 = vrot.lane.b32.xlu0 %v5368_v61, %s4224_s29  ;;  %v1421_v13 = vsel %vm946_vm12, %v1417_v6, %v5196_v24  ;;  %v5626_v6 = vpop.eup %4032 }
 0x7c9   :  { %v5551_v54 = vpop.permute.xlu2 %1345  ;;  %v1425_v25 = vsel %vm951_vm13, %v1421_v13, %v5212_v35 }
 0x7ca   :  { %v1429_v19 = vsel %vm956_vm14, %v1425_v25, %v5224_v17  ;;  %v1003_v25 = vsel %vm98_vm1, %v5626_v6, 0.0 }
 0x7cb   :  { %v1433_v8 = vsel %vm961_vm4, %v1429_v19, %v5236_v15 }
 0x7cc   :  { %v5600_v10 = vpop.permute.xlu0 %1698  ;;  %v1264_v32 = vpop.permute.xlu1 %1263  ;;  %v5610_v24 = vadd.f32 %v1433_v8, %v1128_v27 }
 0x7ce   :  { %1359 = vrot.lane.b32.xlu2 %v5305_v34, %s4226_s12  ;;  %v1441_v35 = vsel %vm98_vm1, %v5610_v24, -inf }
 0x7d1   :  { %v5570_v30 = vpop.permute.xlu2 %1672 }
 0x7d4   :  { %v5612_v14 = vpop.permute.xlu0 %1710  ;;  %v1300_v17 = vpop.permute.xlu1 %1299 }
 0x7d6   :  { %1674 = vrot.lane.b32.xlu2 %v5368_v61, %s4216_s22 }
 0x7d9   :  { %v5582_v16 = vpop.permute.xlu2 %1720 }
 0x7dc   :  { %v5620_v41 = vpop.permute.xlu0 %1722  ;;  %v1336_v33 = vpop.permute.xlu1 %1335 }
 0x7dd   :  { %7038 = vst [vmem:[#allocation61_spill] sm:$0xff] %v5620_v41 }
 0x7de   :  { %1782 = vrot.lane.b32.xlu2 %v5368_v61, %s4220_s25 }
 0x7e1   :  { %v5596_v49 = vpop.permute.xlu2 %1756 }
 0x7e4   :  { %v5628_v13 = vpop.permute.xlu0 %1734  ;;  %v1372_v28 = vpop.permute.xlu1 %1371 }
 0x7e5   :  { %7040 = vst [vmem:[#allocation63_spill] sm:$0xff] %v5628_v13 }
 0x7e9   :  { %v5604_v4 = vpop.permute.xlu2 %1792 }
 0x7ec   :  { %v5636_v19 = vpop.permute.xlu0 %1746  ;;  %v5638_v8 = vpop.permute.xlu1 %1686 }
 0x7ed   :  { %7042 = vst [vmem:[#allocation65_spill] sm:$0xff] %v5636_v19 }
 0x7f1   :  { %v5614_v1 = vpop.permute.xlu2 %1804 }
 0x7f2   :  { %1442 = vmax.xlane.f32.xlu0 %v1441_v35  ;;  %v1380_v35 = vsel %vm892_vm0, %v5305_v34, %v5513_v23  ;;  %v1379_v23 = vsel %vm892_vm0, %v5204_v55, %v5459_v59 }
 0x7f3   :  { %v1384_v63 = vsel %vm897_vm2, %v1380_v35, %v1216_v62 }
 0x7f4   :  { %v5643_v53 = vpop.permute.xlu0 %1758  ;;  %v5647_v41 = vpop.permute.xlu1 %1770 }
 0x7f9   :  { %v5622_v15 = vpop.permute.xlu2 %1816 }
 0x7fc   :  { %v999_v35 = vpop.xlane.xlu1 %998 }
 0x801   :  { %v5624_v51 = vpop.permute.xlu2 %1828 }
 0x802   :  { %7039 = vst [vmem:[#allocation62_spill] sm:$0xff] %v5624_v51 }
 0x806   :  { %1830 = vrot.lane.b32.xlu0 %v5368_v61, %s4226_s12 }
 0x807   :  { %1004 = vadd.xlane.f32.xlu2 %v1003_v25 }
 0x809   :  { %v5634_v9 = vpop.permute.xlu2 %1840 }
 0x80a   :  { %7041 = vst [vmem:[#allocation64_spill] sm:$0xff] %v5634_v9 }
 0x811   :  { %v1228_v27 = vpop.permute.xlu2 %1227 }
 0x812   :  { %v1388_v13 = vsel %vm902_vm3, %v1384_v63, %v1228_v27  ;;  %v1383_v27 = vsel %vm897_vm2, %v1379_v23, %v5477_v11 }
 0x813   :  { %v1392_v25 = vsel %vm557_vm15, %v1388_v13, %v5529_v5  ;;  %v1387_v63 = vsel %vm902_vm3, %v1383_v27, %v5386_v0  ;;  %v4162_v0 = vld [vmem:[%s6937_s5] sm:$0xff]  ;;  %v5693_v27 = vpop.permute.xlu1 %1818 }
 0x814   :  { %v1396_v19 = vsel %vm911_vm5, %v1392_v25, %v5547_v2  ;;  %v1391_v55 = vsel %vm557_vm15, %v1387_v63, %v5394_v44 }
 0x815   :  { %v1400_v62 = vsel %vm916_vm6, %v1396_v19, %v1264_v32  ;;  %v1395_v11 = vsel %vm911_vm5, %v1391_v55, %v5493_v3 }
 0x816   :  { %v1399_v44 = vsel %vm916_vm6, %v1395_v11, %v5404_v21  ;;  %v1131_v21 = vadd.f32 %v4859_v42, %v5052_v31 }
 0x819   :  { %v1276_v51 = vpop.permute.xlu2 %1275 }
 0x81a   :  { %v1404_v5 = vsel %vm921_vm7, %v1400_v62, %v1276_v51 }
 0x81f   :  { %1806 = vrot.lane.b32.xlu2 %v5368_v61, %s4227_s13  ;;  %v996_v9 = vpop.xlane.xlu0 %995 }
 0x820   :  { %4034 = vrcp.f32 %v996_v9 }
 0x821   :  { %v1288_v34 = vpop.permute.xlu2 %1287  ;;  %4036 = vrcp.f32 %v999_v35 }
 0x822   :  { %v1408_v2 = vsel %vm926_vm8, %v1404_v5, %v1288_v34 }
 0x823   :  { %v1412_v9 = vsel %vm931_vm9, %v1408_v2, %v1300_v17 }
 0x824   :  { %v1416_v32 = vsel %vm936_vm10, %v1412_v9, %v5568_v56  ;;  %v1403_v56 = vsel %vm921_vm7, %v1399_v44, %v5481_v36  ;;  %v7046_v44 = vld [vmem:[#allocation26_spill] sm:$0xff] }
 0x825   :  { %v1407_v34 = vsel %vm926_vm8, %v1403_v56, %v5509_v48  ;;  %v7047_v56 = vld [vmem:[#allocation20_spill] sm:$0xff] }
 0x826   :  { %v4035_v13 = vpop.eup %4034 }
 0x827   :  { %v1010_v25 = vmul.f32 %v4035_v13, %v5489_v46  ;;  %v1002_v17 = vpop.xlane.xlu0 %1001  ;;  %v4037_v51 = vpop.eup %4036 }
 0x828   :  { %4038 = vrcp.f32 %v1002_v17  ;;  %v1011_v3 = vmul.f32 %v4037_v51, %v5428_v52  ;;  %v7045_v51 = vld [vmem:[#allocation25_spill] sm:$0xff] }
 0x829   :  { %v1324_v59 = vpop.permute.xlu2 %1323  ;;  %3770 = vmatmul.msk.f32.vlgmr.msrb.gmra.mxu0 %vm98_vm1, %v1010_v25 }
 0x82a   :  { %2089 = vmatpush.msrb.mxu0 %v4162_v0  ;;  %v1420_v46 = vsel %vm941_vm11, %v1416_v32, %v1324_v59 }
 0x82b   :  { %v1424_v19 = vsel %vm946_vm12, %v1420_v46, %v1336_v33  ;;  %v1411_v33 = vsel %vm931_vm9, %v1407_v34, %v5525_v26  ;;  %v7043_v46 = vld [vmem:[#allocation21_spill] sm:$0xff] }
 0x82c   :  { %v1428_v62 = vsel %vm951_vm13, %v1424_v19, %v5586_v39  ;;  %v1415_v5 = vsel %vm936_vm10, %v1411_v33, %v5418_v12 }
 0x82d   :  { %v1419_v42 = vsel %vm941_vm11, %v1415_v5, %v5501_v22  ;;  %v1130_v22 = vadd.f32 %v4837_v47, %v5026_v20 }
 0x82e   :  { %v4039_v35 = vpop.eup %4038  ;;  %v1423_v31 = vsel %vm946_vm12, %v1419_v42, %v5539_v45 }
 0x82f   :  { %v1012_v2 = vmul.f32 %v4039_v35, %v5505_v7  ;;  %v1427_v26 = vsel %vm951_vm13, %v1423_v31, %v5551_v54 }
 0x830   :  { %v1431_v12 = vsel %vm956_vm14, %v1427_v26, %v5430_v57 }
 0x831   :  { %v1360_v23 = vpop.permute.xlu2 %1359  ;;  %3771 = vmatmul.msk.f32.gmra.mxu0 %vm98_vm1, %v1011_v3  ;;  %v1435_v7 = vsel %vm961_vm4, %v1431_v12, %v5521_v18 }
 0x832   :  { %v1432_v52 = vsel %vm956_vm14, %v1428_v62, %v1360_v23  ;;  %v1439_v45 = vadd.f32 %v1435_v7, %v1130_v22  ;;  %v7048_v23 = vld [vmem:[#allocation23_spill] sm:$0xff]  ;;  %v7052_v7 = vld [vmem:[#allocation28_spill] sm:$0xff] }
 0x833   :  { %v1436_v36 = vsel %vm961_vm4, %v1432_v52, %v1372_v28 }
 0x834   :  { %v1440_v48 = vadd.f32 %v1436_v36, %v1131_v21  ;;  %v1447_v54 = vsel %vm98_vm1, %v1439_v45, -inf  ;;  %v7049_v36 = vld [vmem:[#allocation24_spill] sm:$0xff] }
 0x836   :  { %v1450_v39 = vsel %vm98_vm1, %v1440_v48, -inf }
 0x837   :  { %1451 = vmax.xlane.f32.xlu1 %v1450_v39 }
 0x839   :  { %3772 = vmatmul.msk.f32.gmra.mxu0 %vm98_vm1, %v1012_v2  ;;  %v5720_v59 = vpop.permute.xlu2 %1674 }
 0x83a   :  { %v1446_v28 = vpop.xlane.xlu1 %1445 }
 0x83b   :  { %v1454_v13 = vsub.f32 %v5541_v60, %v1446_v28  ;;  %v5717_v60 = vpop.permute.xlu0 %1794 }
 0x83d   :  { %v1459_v63 = vmul.f32 1.442695, %v1454_v13 }
 0x83f   :  { %4040 = vpow2.f32 %v1459_v63  ;;  %v7051_v63 = vld [vmem:[#allocation35_spill] sm:$0xff] }
 0x840   :  { %v1848_v22 = vsel %vm892_vm0, %v7052_v7, %v7051_v63  ;;  %v7066_v63 = vld [vmem:[#allocation31_spill] sm:$0xff] }
 0x841   :  { %v5723_v20 = vpop.permute.xlu2 %1782 }
 0x845   :  { %v4041_v9 = vpop.eup %4040 }
 0x846   :  { %v1468_v25 = vsel %vm98_vm1, %v4041_v9, 0.0 }
 0x847   :  { %1469 = vadd.xlane.f32.xlu0 %v1468_v25  ;;  %v7053_v25 = vld [vmem:[#allocation51_spill] sm:$0xff] }
 0x848   :  { %1448 = vmax.xlane.f32.xlu2 %v1447_v54  ;;  %v7054_v54 = vld [vmem:[#allocation29_spill] sm:$0xff] }
 0x865   :  { %v1443_v55 = vpop.xlane.xlu0 %1442 }
 0x866   :  { %v1453_v57 = vsub.f32 %v5610_v24, %v1443_v55  ;;  %v7044_v24 = vld [vmem:[#allocation22_spill] sm:$0xff]  ;;  %v1849_v55 = vsel %vm892_vm0, %v7054_v54, %v7053_v25 }
 0x868   :  { %v1457_v11 = vmul.f32 1.442695, %v1453_v57  ;;  %v7055_v57 = vld [vmem:[#allocation32_spill] sm:$0xff] }
 0x86a   :  { %4042 = vpow2.f32 %v1457_v11  ;;  %v1852_v11 = vsel %vm897_vm2, %v1848_v22, %v7055_v57  ;;  %v1850_v22 = vsel %vm892_vm0, %v5266_v40, %v5570_v30  ;;  %v7072_v30 = vld [vmem:[#allocation54_spill] sm:$0xff] }
 0x870   :  { %v4043_v18 = vpop.eup %4042 }
 0x871   :  { %v1465_v47 = vsel %vm98_vm1, %v4043_v18, 0.0 }
 0x872   :  { %1466 = vadd.xlane.f32.xlu2 %v1465_v47 }
 0x878   :  { %v5755_v2 = vpop.permute.xlu0 %1830 }
 0x87a   :  { %v1005_v32 = vpop.xlane.xlu2 %1004 }
 0x87b   :  { %4044 = vrcp.f32 %v1005_v32  ;;  %v7056_v32 = vld [vmem:[#allocation50_spill] sm:$0xff] }
 0x881   :  { %v4045_v0 = vpop.eup %4044 }
 0x882   :  { %v1013_v17 = vmul.f32 %v4045_v0, %v5626_v6  ;;  %v5737_v34 = vpop.permute.xlu2 %1806  ;;  %v7057_v0 = vld [vmem:[#allocation30_spill] sm:$0xff] }
 0x884   :  { %3773 = vmatmul.msk.f32.gmra.mxu0 %vm98_vm1, %v1013_v17  ;;  %v1856_v17 = vsel %vm902_vm3, %v1852_v11, %v7057_v0  ;;  %v1854_v11 = vsel %vm897_vm2, %v1850_v22, %v5537_v29  ;;  %v7080_v22 = vld [vmem:[#allocation56_spill] sm:$0xff] }
 0x88c   :  { %3794 = vmatmul.msk.f32.vlgmr.msra.gmra.mxu0 %vm557_vm15, %v7043_v46  ;;  %v7058_v46 = vld [vmem:[#allocation37_spill] sm:$0xff] }
 0x894   :  { %3795 = vmatmul.msk.f32.gmra.mxu0 %vm557_vm15, %v7044_v24  ;;  %v1860_v24 = vsel %vm557_vm15, %v1856_v17, %v7058_v46  ;;  %v7071_v17 = vld [vmem:[#allocation46_spill] sm:$0xff] }
 0x89c   :  { %3796 = vmatmul.msk.f32.gmra.mxu0 %vm557_vm15, %v7045_v51  ;;  %v7059_v51 = vld [vmem:[#allocation38_spill] sm:$0xff] }
 0x8a4   :  { %3797 = vmatmul.msk.f32.gmra.mxu0 %vm557_vm15, %v7046_v44  ;;  %v1864_v44 = vsel %vm911_vm5, %v1860_v24, %v7059_v51  ;;  %v7073_v24 = vld [vmem:[#allocation57_spill] sm:$0xff] }
 0x8a5   :  { %v1858_v51 = vsel %vm902_vm3, %v1854_v11, %v7073_v24  ;;  %v1851_v11 = vsel %vm892_vm0, %v5368_v61, %v5720_v59  ;;  %v5862_v59 = vld [vmem:[%s6938_s6 + $0x8] sm:$0xff] }
 0x8a6   :  { %v5757_v42 = vpop.f32.mrf.mxu0 }
 0x8aa   :  { %v1452_v19 = vpop.xlane.xlu1 %1451 }
 0x8ab   :  { %v1456_v3 = vsub.f32 %v1440_v48, %v1452_v19  ;;  %v7050_v48 = vld [vmem:[#allocation27_spill] sm:$0xff]  ;;  %v7060_v19 = vld [vmem:[#allocation41_spill] sm:$0xff] }
 0x8ac   :  { %3814 = vmatmul.msk.f32.vlgmr.msrb.gmra.mxu0 %vm557_vm15, %v7047_v56 }
 0x8ad   :  { %v1463_v6 = vmul.f32 1.442695, %v1456_v3 }
 0x8ae   :  { %v5759_v12 = vpop.f32.mrf.mxu0 }
 0x8af   :  { %4046 = vpow2.f32 %v1463_v6 }
 0x8b4   :  { %3815 = vmatmul.msk.f32.gmra.mxu0 %vm557_vm15, %v7048_v23 }
 0x8b5   :  { %v5741_v62 = vpop.eup %4046 }
 0x8b6   :  { %v1474_v21 = vsel %vm98_vm1, %v5741_v62, 0.0  ;;  %v5781_v6 = vpop.f32.mrf.mxu0 }
 0x8b7   :  { %1475 = vadd.xlane.f32.xlu2 %v1474_v21 }
 0x8ba   :  { %v1470_v26 = vpop.xlane.xlu0 %1469 }
 0x8bb   :  { %v1449_v33 = vpop.xlane.xlu2 %1448 }
 0x8bc   :  { %v1455_v52 = vsub.f32 %v1439_v45, %v1449_v33  ;;  %3816 = vmatmul.msk.f32.gmra.mxu0 %vm557_vm15, %v7049_v36  ;;  %v7062_v33 = vld [vmem:[#allocation40_spill] sm:$0xff] }
 0x8be   :  { %v1461_v35 = vmul.f32 1.442695, %v1455_v52 }
 0x8c0   :  { %4048 = vpow2.f32 %v1461_v35  ;;  %v7063_v35 = vld [vmem:[#allocation42_spill] sm:$0xff] }
 0x8c4   :  { %3817 = vmatmul.msk.f32.gmra.mxu0 %vm557_vm15, %v7050_v48 }
 0x8c6   :  { %v5749_v5 = vpop.eup %4048 }
 0x8c7   :  { %v1471_v39 = vsel %vm98_vm1, %v5749_v5, 0.0 }
 0x8c8   :  { %1472 = vadd.xlane.f32.xlu1 %v1471_v39 }
 0x8cf   :  { %1842 = vrot.lane.b32.xlu2 %v5368_v61, %s4228_s14 }
 0x8e5   :  { %v1467_v31 = vpop.xlane.xlu2 %1466 }
 0x8e6   :  { %4050 = vrcp.f32 %v1467_v31  ;;  %v7064_v31 = vld [vmem:[#allocation43_spill] sm:$0xff] }
 0x8e7   :  { %4052 = vrcp.f32 %v1470_v26 }
 0x8ec   :  { %v4051_v28 = vpop.eup %4050 }
 0x8ed   :  { %v1481_v13 = vmul.f32 %v4051_v28, %v4043_v18  ;;  %v4053_v45 = vpop.eup %4052  ;;  %v1853_v18 = vsel %vm897_vm2, %v1849_v55, %v7056_v32  ;;  %v7065_v28 = vld [vmem:[#allocation52_spill] sm:$0xff]  ;;  %v7068_v55 = vld [vmem:[#allocation33_spill] sm:$0xff] }
 0x8ee   :  { %v1482_v47 = vmul.f32 %v4053_v45, %v4041_v9  ;;  %v1857_v3 = vsel %vm902_vm3, %v1853_v18, %v7060_v19  ;;  %v7061_v9 = vld [vmem:[#allocation39_spill] sm:$0xff]  ;;  %v7067_v45 = vld [vmem:[#allocation53_spill] sm:$0xff] }
 0x8ef   :  { %3786 = vmatmul.msk.f32.vlgmr.msra.gmra.mxu3 %vm98_vm1, %v1481_v13  ;;  %v1868_v21 = vsel %vm916_vm6, %v1864_v44, %v7061_v9  ;;  %v1861_v26 = vsel %vm557_vm15, %v1857_v3, %v7064_v31  ;;  %v7070_v18 = vld [vmem:[#allocation45_spill] sm:$0xff]  ;;  %v7074_v44 = vld [vmem:[#allocation34_spill] sm:$0xff]  ;;  %v7075_v3 = vld [vmem:[#allocation55_spill] sm:$0xff] }
 0x8f0   :  { %v1872_v52 = vsel %vm921_vm7, %v1868_v21, %v7062_v33  ;;  %v1865_v13 = vsel %vm911_vm5, %v1861_v26, %v7065_v28  ;;  %v7076_v9 = vld [vmem:[#allocation60_spill] sm:$0xff]  ;;  %v7078_v31 = vld [vmem:[#allocation47_spill] sm:$0xff] }
 0x8f1   :  { %v1876_v39 = vsel %vm926_vm8, %v1872_v52, %v7063_v35  ;;  %v1869_v25 = vsel %vm916_vm6, %v1865_v13, %v7067_v45  ;;  %v1862_v21 = vsel %vm557_vm15, %v1858_v51, %v7076_v9  ;;  %v7077_v35 = vld [vmem:[#allocation36_spill] sm:$0xff]  ;;  %v7081_v45 = vld [vmem:[#allocation59_spill] sm:$0xff]  ;;  %v7085_v9 = vld [vmem:[#allocation62_spill] sm:$0xff] }
 0x8f2   :  { %v1880_v7 = vsel %vm931_vm9, %v1876_v39, %v7066_v63  ;;  %v1873_v0 = vsel %vm921_vm7, %v1869_v25, %v7070_v18  ;;  %v1866_v33 = vsel %vm911_vm5, %v1862_v21, %v5582_v16  ;;  %v5831_v28 = vld [vmem:[%s6938_s6] sm:$0xff]  ;;  %v5892_v21 = vld [vmem:[%s6938_s6 + $0x10] sm:$0xff] }
 0x8f3   :  { %v1884_v57 = vsel %vm936_vm10, %v1880_v7, %v7068_v55  ;;  %v1877_v46 = vsel %vm926_vm8, %v1873_v0, %v7072_v30  ;;  %v7079_v63 = vld [vmem:[#allocation48_spill] sm:$0xff]  ;;  %v1870_v55 = vsel %vm916_vm6, %v1866_v33, %v5553_v37  ;;  %v1855_v37 = vsel %vm897_vm2, %v1851_v11, %v5638_v8  ;;  %v7083_v30 = vld [vmem:[#allocation49_spill] sm:$0xff] }
 0x8f4   :  { %v1881_v29 = vsel %vm931_vm9, %v1877_v46, %v7075_v3  ;;  %v1874_v0 = vsel %vm921_vm7, %v1870_v55, %v5473_v43  ;;  %v1859_v8 = vsel %vm902_vm3, %v1855_v37, %v5600_v10  ;;  %v7084_v3 = vld [vmem:[#allocation61_spill] sm:$0xff]  ;;  %v7086_v33 = vld [vmem:[#allocation64_spill] sm:$0xff] }
 0x8f5   :  { %v1885_v26 = vsel %vm936_vm10, %v1881_v29, %v7078_v31  ;;  %v7088_v31 = vld [vmem:[#allocation65_spill] sm:$0xff] }
 0x8f6   :  { %v1889_v16 = vsel %vm941_vm11, %v1885_v26, %v7080_v22 }
 0x8f7   :  { %3787 = vmatmul.msk.f32.gmra.mxu3 %vm98_vm1, %v1482_v47  ;;  %v7069_v47 = vld [vmem:[#allocation44_spill] sm:$0xff]  ;;  %v1893_v25 = vsel %vm946_vm12, %v1889_v16, %v7081_v45 }
 0x8f8   :  { %v1888_v32 = vsel %vm941_vm11, %v1884_v57, %v7069_v47 }
 0x8f9   :  { %v1892_v40 = vsel %vm946_vm12, %v1888_v32, %v7071_v17  ;;  %v7082_v32 = vld [vmem:[#allocation58_spill] sm:$0xff]  ;;  %v1878_v17 = vsel %vm926_vm8, %v1874_v0, %v5596_v49 }
 0x8fa   :  { %v1896_v19 = vsel %vm951_vm13, %v1892_v40, %v7074_v44  ;;  %v1897_v18 = vsel %vm951_vm13, %v1893_v25, %v7082_v32  ;;  %v1882_v49 = vsel %vm931_vm9, %v1878_v17, %v5574_v58  ;;  %v1863_v44 = vsel %vm557_vm15, %v1859_v8, %v5612_v14 }
 0x8fb   :  { %v1900_v39 = vsel %vm956_vm14, %v1896_v19, %v7077_v35  ;;  %v1901_v61 = vsel %vm956_vm14, %v1897_v18, %v7083_v30  ;;  %v1886_v51 = vsel %vm936_vm10, %v1882_v49, %v5491_v38  ;;  %v1867_v29 = vsel %vm911_vm5, %v1863_v44, %v7084_v3  ;;  %v7090_v18 = vld [vmem:[#allocation11_spill] sm:$0xff]  ;;  %v7092_v44 = vld [vmem:[#allocation14_spill] sm:$0xff] }
 0x8fc   :  { %v1904_v7 = vsel %vm961_vm4, %v1900_v39, %v7079_v63  ;;  %v1905_v43 = vsel %vm961_vm4, %v1901_v61, %v5461_v50  ;;  %v1890_v50 = vsel %vm941_vm11, %v1886_v51, %v5604_v4 }
 0x8fd   :  { %v1894_v58 = vsel %vm946_vm12, %v1890_v50, %v5614_v1  ;;  %v7093_v50 = vld [vmem:[#allocation16_spill] sm:$0xff] }
 0x8fe   :  { %v1898_v10 = vsel %vm951_vm13, %v1894_v58, %v5622_v15 }
 0x8ff   :  { %v1902_v14 = vsel %vm956_vm14, %v1898_v10, %v7085_v9 }
 0x900   :  { %v1906_v1 = vsel %vm961_vm4, %v1902_v14, %v7086_v33  ;;  %v7095_v14 = vld [vmem:[#allocation15_spill] sm:$0xff] }
 0x901   :  { %v5800_v54 = vpop.f32.mrf.mxu0 }
 0x909   :  { %v1587_v52 = vpop.f32.mrf.mxu0 }
 0x90a   :  { %v1599_v13 = vadd.f32 %v5831_v28, %v1587_v52  ;;  %v7087_v52 = vld [vmem:[#allocation63_spill] sm:$0xff] }
 0x90b   :  { %v1871_v15 = vsel %vm916_vm6, %v1867_v29, %v7087_v52  ;;  %v7096_v52 = vld [vmem:[#allocation17_spill] sm:$0xff] }
 0x90c   :  { %v5842_v57 = vadd.f32 %v1904_v7, %v1599_v13  ;;  %v1875_v26 = vsel %vm921_vm7, %v1871_v15, %v7088_v31 }
 0x90d   :  { %v1879_v63 = vsel %vm926_vm8, %v1875_v26, %v5643_v53 }
 0x90e   :  { %v1912_v47 = vsel %vm98_vm1, %v5842_v57, -inf  ;;  %v1883_v7 = vsel %vm931_vm9, %v1879_v63, %v5647_v41  ;;  %v5921_v41 = vld [vmem:[%s6938_s6 + $0x18] sm:$0xff]  ;;  %s4229_s6 = smov 40  }
 0x90f   :  { %1913 = vmax.xlane.f32.xlu0 %v1912_v47  ;;  %v1887_v22 = vsel %vm936_vm10, %v1883_v7, %v5723_v20  ;;  %v7089_v47 = vld [vmem:[#allocation12_spill] sm:$0xff] }
 0x910   :  { %v1891_v25 = vsel %vm941_vm11, %v1887_v22, %v5717_v60 }
 0x911   :  { %v1590_v40 = vpop.f32.mrf.mxu0  ;;  %v1895_v55 = vsel %vm946_vm12, %v1891_v25, %v5737_v34 }
 0x912   :  { %v1600_v46 = vadd.f32 %v5862_v59, %v1590_v40  ;;  %v1899_v11 = vsel %vm951_vm13, %v1895_v55, %v5693_v27 }
 0x913   :  { %v1903_v60 = vsel %vm956_vm14, %v1899_v11, %v5755_v2 }
 0x914   :  { %v5871_v24 = vadd.f32 %v1905_v43, %v1600_v46  ;;  %v7091_v43 = vld [vmem:[#allocation10_spill] sm:$0xff] }
 0x916   :  { %v1915_v19 = vsel %vm98_vm1, %v5871_v24, -inf }
 0x917   :  { %1916 = vmax.xlane.f32.xlu1 %v1915_v19 }
 0x919   :  { %v1593_v38 = vpop.f32.mrf.mxu0 }
 0x91a   :  { %v1601_v4 = vadd.f32 %v5892_v21, %v1593_v38 }
 0x91c   :  { %v5899_v35 = vadd.f32 %v1906_v1, %v1601_v4 }
 0x91e   :  { %v1918_v39 = vsel %vm98_vm1, %v5899_v35, -inf }
 0x91f   :  { %1919 = vmax.xlane.f32.xlu0 %v1918_v39 }
 0x921   :  { %v1596_v13 = vpop.f32.mrf.mxu0 }
 0x922   :  { %v1602_v20 = vadd.f32 %v5921_v41, %v1596_v13 }
 0x929   :  { %v2091_v16 = vpop.f32.mrf.mxu0 }
 0x92a   :  { %v1476_v45 = vpop.xlane.xlu2 %1475  ;;  %v2111_v32 = vmul.f32 %v2091_v16, %v7089_v47  ;;  %v2103_v58 = vmul.f32 %v2091_v16, %v7093_v50 }
 0x931   :  { %v2094_v53 = vpop.f32.mrf.mxu0 }
 0x932   :  { %v2112_v0 = vmul.f32 %v2094_v53, %v7090_v18  ;;  %v1843_v17 = vpop.permute.xlu2 %1842 }
 0x933   :  { %v1907_v34 = vsel %vm961_vm4, %v1903_v60, %v1843_v17  ;;  %2119 = vrot.lane.b32.xlu0 %v2111_v32, %s4213_s19 }
 0x934   :  { %v5929_v27 = vadd.f32 %v1907_v34, %v1602_v20  ;;  %2121 = vrot.lane.b32.xlu1 %v2112_v0, %s4213_s19 }
 0x936   :  { %v1921_v37 = vsel %vm98_vm1, %v5929_v27, -inf }
 0x937   :  { %1922 = vmax.xlane.f32.xlu2 %v1921_v37 }
 0x939   :  { %v2097_v40 = vpop.f32.mrf.mxu0 }
 0x93a   :  { %v2113_v19 = vmul.f32 %v2097_v40, %v7092_v44  ;;  %v2105_v4 = vmul.f32 %v2097_v40, %v7095_v14 }
 0x93b   :  { %v1473_v30 = vpop.xlane.xlu1 %1472 }
 0x93c   :  { %4054 = vrcp.f32 %v1473_v30 }
 0x93d   :  { %4056 = vrcp.f32 %v1476_v45 }
 0x941   :  { %v2100_v61 = vpop.f32.mrf.mxu0 }
 0x942   :  { %v4055_v46 = vpop.eup %4054  ;;  %v2114_v2 = vmul.f32 %v2100_v61, %v7091_v43  ;;  %v2106_v15 = vmul.f32 %v2100_v61, %v7096_v52 }
 0x943   :  { %v1483_v49 = vmul.f32 %v4055_v46, %v5749_v5  ;;  %v4057_v8 = vpop.eup %4056 }
 0x944   :  { %2125 = vrot.lane.b32.xlu0 %v2114_v2, %s4213_s19  ;;  %v1484_v51 = vmul.f32 %v4057_v8, %v5741_v62  ;;  %v7097_v2 = vld [vmem:[#allocation18_spill] sm:$0xff] }
 0x945   :  { %3788 = vmatmul.msk.f32.gmra.mxu3 %vm98_vm1, %v1483_v49 }
 0x94d   :  { %3789 = vmatmul.msk.f32.gmra.mxu3 %vm98_vm1, %v1484_v51 }
 0x94f   :  { %2123 = vrot.lane.b32.xlu2 %v2113_v19, %s4213_s19  ;;  %s4230_s19 = smov 48  }
 0x955   :  { %3810 = vmatmul.msk.f32.vlgmr.msrb.gmra.mxu3 %vm557_vm15, %v7047_v56 }
 0x95d   :  { %3811 = vmatmul.msk.f32.gmra.mxu3 %vm557_vm15, %v7048_v23 }
 0x965   :  { %3812 = vmatmul.msk.f32.gmra.mxu3 %vm557_vm15, %v7049_v36  ;;  %v7094_v36 = vld [vmem:[#allocation13_spill] sm:$0xff] }
 0x96d   :  { %3813 = vmatmul.msk.f32.gmra.mxu3 %vm557_vm15, %v7050_v48  ;;  %v2104_v48 = vmul.f32 %v2094_v53, %v7094_v36 }
 0x972   :  { %v6067_v30 = vpop.f32.mrf.mxu3 }
 0x97a   :  { %v6078_v49 = vpop.f32.mrf.mxu3 }
 0x982   :  { %v5950_v5 = vpop.xlane.xlu0 %1913 }
 0x98a   :  { %v5961_v56 = vpop.xlane.xlu1 %1916 }
 0x992   :  { %v5952_v62 = vpop.xlane.xlu0 %1919 }
 0x9a5   :  { %v2120_v10 = vpop.permute.xlu0 %2119 }
 0x9a6   :  { %v2131_v3 = vadd.f32 %v2120_v10, %v2103_v58  ;;  %v2122_v23 = vpop.permute.xlu1 %2121 }
 0x9a7   :  { %v5967_v29 = vadd.f32 %v2122_v23, %v2104_v48 }
 0x9a8   :  { %2163 = vrot.lane.b32.xlu2 %v2131_v3, %s4214_s20  ;;  %2151 = vrot.lane.b32.xlu0 %v2131_v3, %s4215_s21 }
 0x9a9   :  { %2139 = vrot.lane.b32.xlu1 %v2131_v3, %s4216_s22 }
 0x9aa   :  { %v5976_v38 = vpop.xlane.xlu2 %1922 }
 0x9b0   :  { %2211 = vrot.lane.b32.xlu2 %v2131_v3, %s4222_s27  ;;  %2187 = vrot.lane.b32.xlu0 %v2131_v3, %s4218_s24 }
 0x9b1   :  { %2175 = vrot.lane.b32.xlu1 %v2131_v3, %s4219_s4 }
 0x9b2   :  { %v2124_v9 = vpop.permute.xlu2 %2123 }
 0x9b3   :  { %v5986_v33 = vadd.f32 %v2124_v9, %v2105_v4 }
 0x9b6   :  { %v2126_v1 = vpop.permute.xlu0 %2125 }
 0x9b7   :  { %v6011_v39 = vadd.f32 %v2126_v1, %v2106_v15 }
 0x9b8   :  { %2295 = vrot.lane.b32.xlu2 %v2131_v3, %s4226_s12  ;;  %2223 = vrot.lane.b32.xlu0 %v2131_v3, %s4221_s26 }
 0x9b9   :  { %2199 = vrot.lane.b32.xlu1 %v2131_v3, %s4217_s23 }
 0x9c0   :  { %2213 = vrot.lane.b32.xlu2 %v5967_v29, %s4222_s27  ;;  %2235 = vrot.lane.b32.xlu0 %v2131_v3, %s4225_s30 }
 0x9c1   :  { %2307 = vrot.lane.b32.xlu1 %v2131_v3, %s4228_s14 }
 0x9c8   :  { %2249 = vrot.lane.b32.xlu2 %v5967_v29, %s4220_s25  ;;  %2247 = vrot.lane.b32.xlu0 %v2131_v3, %s4220_s25  ;;  %v6083_v19 = vpop.f32.mrf.mxu3 }
 0x9c9   :  { %2141 = vrot.lane.b32.xlu1 %v5967_v29, %s4216_s22 }
 0x9d0   :  { %2297 = vrot.lane.b32.xlu2 %v5967_v29, %s4226_s12  ;;  %2259 = vrot.lane.b32.xlu0 %v2131_v3, %s4224_s29  ;;  %v6089_v9 = vpop.f32.mrf.mxu3 }
 0x9d1   :  { %2153 = vrot.lane.b32.xlu1 %v5967_v29, %s4215_s21 }
 0x9d8   :  { %2167 = vrot.lane.b32.xlu2 %v5986_v33, %s4214_s20  ;;  %2271 = vrot.lane.b32.xlu0 %v2131_v3, %s4227_s13 }
 0x9d9   :  { %2165 = vrot.lane.b32.xlu1 %v5967_v29, %s4214_s20 }
 0x9e0   :  { %2215 = vrot.lane.b32.xlu2 %v5986_v33, %s4222_s27  ;;  %2283 = vrot.lane.b32.xlu0 %v2131_v3, %s4223_s28 }
 0x9e1   :  { %2177 = vrot.lane.b32.xlu1 %v5967_v29, %s4219_s4 }
 0x9e8   :  { %2251 = vrot.lane.b32.xlu2 %v5986_v33, %s4220_s25  ;;  %2201 = vrot.lane.b32.xlu0 %v5967_v29, %s4217_s23 }
 0x9e9   :  { %2189 = vrot.lane.b32.xlu1 %v5967_v29, %s4218_s24 }
 0x9f0   :  { %2299 = vrot.lane.b32.xlu2 %v5986_v33, %s4226_s12  ;;  %2237 = vrot.lane.b32.xlu0 %v5967_v29, %s4225_s30 }
 0x9f1   :  { %2225 = vrot.lane.b32.xlu1 %v5967_v29, %s4221_s26 }
 0x9f8   :  { %2273 = vrot.lane.b32.xlu0 %v5967_v29, %s4227_s13  ;;  %2169 = vrot.lane.b32.xlu2 %v6011_v39, %s4214_s20 }
 0x9f9   :  { %2261 = vrot.lane.b32.xlu1 %v5967_v29, %s4224_s29 }
 0xa00   :  { %2285 = vrot.lane.b32.xlu0 %v5967_v29, %s4223_s28  ;;  %2217 = vrot.lane.b32.xlu2 %v6011_v39, %s4222_s27  ;;  %s3729_s27 = sshll.u32 %s6943_s11, 4  ;;  %s3730_s27 = int_to_ptr.hbm [resolvable:$true] %s3729_s27 }
 0xa01   :  { %2309 = vrot.lane.b32.xlu1 %v5967_v29, %s4228_s14 }
 0xa02   :  { %v2164_v63 = vpop.permute.xlu2 %2163 }
 0xa08   :  { %2155 = vrot.lane.b32.xlu0 %v5986_v33, %s4215_s21  ;;  %2289 = vrot.lane.b32.xlu2 %v6011_v39, %s4223_s28 }
 0xa09   :  { %2143 = vrot.lane.b32.xlu1 %v5986_v33, %s4216_s22 }
 0xa0a   :  { %v2212_v32 = vpop.permute.xlu2 %2211 }
 0xa10   :  { %2203 = vrot.lane.b32.xlu0 %v5986_v33, %s4217_s23 }
 0xa11   :  { %2179 = vrot.lane.b32.xlu1 %v5986_v33, %s4219_s4 }
 0xa12   :  { %v2296_v58 = vpop.permute.xlu2 %2295 }
 0xa18   :  { %2239 = vrot.lane.b32.xlu0 %v5986_v33, %s4225_s30 }
 0xa19   :  { %2191 = vrot.lane.b32.xlu1 %v5986_v33, %s4218_s24 }
 0xa1a   :  { %v2152_v31 = vpop.permute.xlu0 %2151  ;;  %v2214_v1 = vpop.permute.xlu2 %2213 }
 0xa1b   :  { %v2140_v26 = vpop.permute.xlu1 %2139 }
 0xa1c   :  { %v2319_v13 = vsel %vm892_vm0, %v2131_v3, %v2140_v26 }
 0xa1d   :  { %v2323_v7 = vsel %vm897_vm2, %v2319_v13, %v2152_v31 }
 0xa1e   :  { %v2327_v22 = vsel %vm902_vm3, %v2323_v7, %v2164_v63  ;;  %v2058_v7 = vpop.f32.mrf.mxu3 }
 0xa20   :  { %2275 = vrot.lane.b32.xlu0 %v5986_v33, %s4227_s13 }
 0xa21   :  { %2227 = vrot.lane.b32.xlu1 %v5986_v33, %s4221_s26 }
 0xa22   :  { %v2188_v16 = vpop.permute.xlu0 %2187 }
 0xa23   :  { %v2176_v45 = vpop.permute.xlu1 %2175 }
 0xa24   :  { %v2331_v25 = vsel %vm557_vm15, %v2327_v22, %v2176_v45 }
 0xa25   :  { %v2335_v55 = vsel %vm911_vm5, %v2331_v25, %v2188_v16  ;;  %v2250_v16 = vpop.permute.xlu2 %2249 }
 0xa28   :  { %2287 = vrot.lane.b32.xlu0 %v5986_v33, %s4223_s28 }
 0xa29   :  { %2263 = vrot.lane.b32.xlu1 %v5986_v33, %s4224_s29 }
 0xa2a   :  { %v2224_v11 = vpop.permute.xlu0 %2223 }
 0xa2b   :  { %v2200_v47 = vpop.permute.xlu1 %2199 }
 0xa2c   :  { %v2339_v53 = vsel %vm916_vm6, %v2335_v55, %v2200_v47 }
 0xa2d   :  { %v2343_v20 = vsel %vm921_vm7, %v2339_v53, %v2212_v32  ;;  %v2061_v32 = vpop.f32.mrf.mxu3 }
 0xa2e   :  { %v2347_v18 = vsel %vm926_vm8, %v2343_v20, %v2224_v11 }
 0xa30   :  { %2157 = vrot.lane.b32.xlu0 %v6011_v39, %s4215_s21 }
 0xa31   :  { %2311 = vrot.lane.b32.xlu1 %v5986_v33, %s4228_s14 }
 0xa32   :  { %v2236_v0 = vpop.permute.xlu0 %2235 }
 0xa33   :  { %v6059_v17 = vpop.permute.xlu1 %2307  ;;  %v2351_v60 = vsel %vm931_vm9, %v2347_v18, %v2236_v0  ;;  %v2298_v18 = vpop.permute.xlu2 %2297 }
 0xa38   :  { %2205 = vrot.lane.b32.xlu0 %v6011_v39, %s4217_s23 }
 0xa39   :  { %2145 = vrot.lane.b32.xlu1 %v6011_v39, %s4216_s22 }
 0xa3a   :  { %v2248_v34 = vpop.permute.xlu0 %2247 }
 0xa3b   :  { %v2142_v37 = vpop.permute.xlu1 %2141  ;;  %v2355_v40 = vsel %vm936_vm10, %v2351_v60, %v2248_v34  ;;  %v2071_v34 = vadd.f32 %v5862_v59, %v2061_v32  ;;  %v2064_v32 = vpop.f32.mrf.mxu3 }
 0xa3c   :  { %v2320_v14 = vsel %vm892_vm0, %v5967_v29, %v2142_v37 }
 0xa40   :  { %2301 = vrot.lane.b32.xlu0 %v6011_v39, %s4226_s12 }
 0xa41   :  { %2181 = vrot.lane.b32.xlu1 %v6011_v39, %s4219_s4 }
 0xa42   :  { %v2260_v61 = vpop.permute.xlu0 %2259 }
 0xa43   :  { %v2154_v46 = vpop.permute.xlu1 %2153  ;;  %v2359_v43 = vsel %vm941_vm11, %v2355_v40, %v2260_v61 }
 0xa44   :  { %v2324_v4 = vsel %vm897_vm2, %v2320_v14, %v2154_v46 }
 0xa48   :  { %3932 = vrot.lane.b32.xlu0 %v7097_v2, %s4229_s6 }
 0xa49   :  { %2193 = vrot.lane.b32.xlu1 %v6011_v39, %s4218_s24 }
 0xa4a   :  { %v2272_v8 = vpop.permute.xlu0 %2271 }
 0xa4b   :  { %v2166_v51 = vpop.permute.xlu1 %2165  ;;  %v2363_v44 = vsel %vm946_vm12, %v2359_v43, %v2272_v8 }
 0xa4c   :  { %v2328_v52 = vsel %vm902_vm3, %v2324_v4, %v2166_v51 }
 0xa51   :  { %2229 = vrot.lane.b32.xlu1 %v6011_v39, %s4221_s26 }
 0xa52   :  { %v2284_v50 = vpop.permute.xlu0 %2283 }
 0xa53   :  { %v2178_v10 = vpop.permute.xlu1 %2177  ;;  %v2367_v3 = vsel %vm951_vm13, %v2363_v44, %v2284_v50  ;;  %v2168_v50 = vpop.permute.xlu2 %2167 }
 0xa54   :  { %v2371_v23 = vsel %vm956_vm14, %v2367_v3, %v2296_v58  ;;  %v2332_v15 = vsel %vm557_vm15, %v2328_v52, %v2178_v10 }
 0xa59   :  { %2241 = vrot.lane.b32.xlu1 %v6011_v39, %s4225_s30 }
 0xa5a   :  { %v2202_v36 = vpop.permute.xlu0 %2201 }
 0xa5b   :  { %v2190_v48 = vpop.permute.xlu1 %2189  ;;  %v2216_v14 = vpop.permute.xlu2 %2215 }
 0xa5c   :  { %v2336_v31 = vsel %vm911_vm5, %v2332_v15, %v2190_v48 }
 0xa5d   :  { %v2340_v63 = vsel %vm916_vm6, %v2336_v31, %v2202_v36 }
 0xa5e   :  { %v2344_v22 = vsel %vm921_vm7, %v2340_v63, %v2214_v1 }
 0xa61   :  { %2253 = vrot.lane.b32.xlu1 %v6011_v39, %s4220_s25 }
 0xa62   :  { %v2238_v26 = vpop.permute.xlu0 %2237 }
 0xa63   :  { %v2226_v13 = vpop.permute.xlu1 %2225 }
 0xa64   :  { %v2348_v29 = vsel %vm926_vm8, %v2344_v22, %v2226_v13 }
 0xa65   :  { %v2352_v25 = vsel %vm931_vm9, %v2348_v29, %v2238_v26  ;;  %v2375_v29 = vsel %vm961_vm4, %v2371_v23, %v6059_v17  ;;  %v2072_v17 = vadd.f32 %v5892_v21, %v2064_v32 }
 0xa66   :  { %v2356_v11 = vsel %vm936_vm10, %v2352_v25, %v2250_v16  ;;  %v2070_v16 = vadd.f32 %v5831_v28, %v2058_v7 }
 0xa69   :  { %2265 = vrot.lane.b32.xlu1 %v6011_v39, %s4224_s29  ;;  %s4238_s29 = smov 121  }
 0xa6a   :  { %v2274_v45 = vpop.permute.xlu0 %2273 }
 0xa6b   :  { %v2262_v55 = vpop.permute.xlu1 %2261 }
 0xa6c   :  { %v2360_v47 = vsel %vm941_vm11, %v2356_v11, %v2262_v55  ;;  %v1924_v55 = vsub.f32 %v5842_v57, %v5950_v5  ;;  %v2379_v11 = vadd.f32 %v2375_v29, %v2070_v16 }
 0xa6d   :  { %v2364_v53 = vsel %vm946_vm12, %v2360_v47, %v2274_v45 }
 0xa71   :  { %2277 = vrot.lane.b32.xlu1 %v6011_v39, %s4227_s13 }
 0xa72   :  { %v2286_v20 = vpop.permute.xlu0 %2285 }
 0xa73   :  { %v2310_v0 = vpop.permute.xlu1 %2309  ;;  %v2368_v60 = vsel %vm951_vm13, %v2364_v53, %v2286_v20  ;;  %v1928_v20 = vmul.f32 1.442695, %v1924_v55 }
 0xa74   :  { %v2372_v37 = vsel %vm956_vm14, %v2368_v60, %v2298_v18 }
 0xa75   :  { %v2376_v40 = vsel %vm961_vm4, %v2372_v37, %v2310_v0  ;;  %v2383_v0 = vsel %vm98_vm1, %v2379_v11, -inf  ;;  %4058 = vpow2.f32 %v1928_v20 }
 0xa76   :  { %v6114_v61 = vadd.f32 %v2376_v40, %v2071_v34 }
 0xa78   :  { %v2386_v46 = vsel %vm98_vm1, %v6114_v61, -inf }
 0xa79   :  { %2313 = vrot.lane.b32.xlu1 %v6011_v39, %s4228_s14  ;;  %2387 = vmax.xlane.f32.xlu2 %v2386_v46 }
 0xa7a   :  { %v2156_v43 = vpop.permute.xlu0 %2155 }
 0xa7b   :  { %v2144_v8 = vpop.permute.xlu1 %2143  ;;  %v6144_v34 = vpop.eup %4058 }
 0xa7c   :  { %v2321_v59 = vsel %vm892_vm0, %v5986_v33, %v2144_v8  ;;  %v2252_v33 = vpop.permute.xlu2 %2251  ;;  %v1936_v37 = vsel %vm98_vm1, %v6144_v34, 0.0 }
 0xa7d   :  { %v2325_v58 = vsel %vm897_vm2, %v2321_v59, %v2156_v43  ;;  %v7098_v43 = vld [vmem:[#allocation19_spill] sm:$0xff] }
 0xa7e   :  { %v2329_v36 = vsel %vm902_vm3, %v2325_v58, %v2168_v50 }
 0xa82   :  { %v2204_v51 = vpop.permute.xlu0 %2203 }
 0xa83   :  { %v2180_v44 = vpop.permute.xlu1 %2179 }
 0xa84   :  { %v2333_v48 = vsel %vm557_vm15, %v2329_v36, %v2180_v44  ;;  %v2300_v18 = vpop.permute.xlu2 %2299 }
 0xa8a   :  { %v2240_v3 = vpop.permute.xlu0 %2239 }
 0xa8b   :  { %v2192_v10 = vpop.permute.xlu1 %2191 }
 0xa8c   :  { %v2337_v4 = vsel %vm911_vm5, %v2333_v48, %v2192_v10  ;;  %v2170_v50 = vpop.permute.xlu2 %2169 }
 0xa8d   :  { %v2341_v1 = vsel %vm916_vm6, %v2337_v4, %v2204_v51 }
 0xa8e   :  { %v2345_v15 = vsel %vm921_vm7, %v2341_v1, %v2216_v14 }
 0xa92   :  { %v2276_v26 = vpop.permute.xlu0 %2275 }
 0xa93   :  { %v2228_v52 = vpop.permute.xlu1 %2227 }
 0xa94   :  { %v2349_v31 = vsel %vm926_vm8, %v2345_v15, %v2228_v52  ;;  %v2218_v4 = vpop.permute.xlu2 %2217 }
 0xa95   :  { %v2353_v13 = vsel %vm931_vm9, %v2349_v31, %v2240_v3 }
 0xa96   :  { %v2357_v22 = vsel %vm936_vm10, %v2353_v13, %v2252_v33 }
 0xa9a   :  { %v2288_v47 = vpop.permute.xlu0 %2287 }
 0xa9b   :  { %v2264_v63 = vpop.permute.xlu1 %2263 }
 0xa9c   :  { %v2361_v45 = vsel %vm941_vm11, %v2357_v22, %v2264_v63  ;;  %v2290_v63 = vpop.permute.xlu2 %2289  ;;  %v2067_v22 = vpop.f32.mrf.mxu3 }
 0xa9d   :  { %v2365_v25 = vsel %vm946_vm12, %v2361_v45, %v2276_v26  ;;  %v2073_v45 = vadd.f32 %v5921_v41, %v2067_v22 }
 0xa9e   :  { %v2369_v53 = vsel %vm951_vm13, %v2365_v25, %v2288_v47 }
 0xa9f   :  { %v2373_v28 = vsel %vm956_vm14, %v2369_v53, %v2300_v18 }
 0xaa2   :  { %v2158_v51 = vpop.permute.xlu0 %2157 }
 0xaa3   :  { %v2312_v23 = vpop.permute.xlu1 %2311  ;;  %2384 = vmax.xlane.f32.xlu1 %v2383_v0 }
 0xaa4   :  { %v2377_v7 = vsel %vm961_vm4, %v2373_v28, %v2312_v23 }
 0xaa5   :  { %v2381_v60 = vadd.f32 %v2377_v7, %v2072_v17 }
 0xaa7   :  { %v2389_v57 = vsel %vm98_vm1, %v2381_v60, -inf }
 0xaa8   :  { %2390 = vmax.xlane.f32.xlu2 %v2389_v57 }
 0xaaa   :  { %v2206_v14 = vpop.permute.xlu0 %2205 }
 0xaab   :  { %v2146_v5 = vpop.permute.xlu1 %2145 }
 0xaac   :  { %v2322_v44 = vsel %vm892_vm0, %v6011_v39, %v2146_v5 }
 0xaad   :  { %v2326_v58 = vsel %vm897_vm2, %v2322_v44, %v2158_v51 }
 0xaae   :  { %v2330_v10 = vsel %vm902_vm3, %v2326_v58, %v2170_v50 }
 0xab0   :  { %1937 = vadd.xlane.f32.xlu2 %v1936_v37 }
 0xab2   :  { %v2302_v16 = vpop.permute.xlu0 %2301 }
 0xab3   :  { %v2182_v40 = vpop.permute.xlu1 %2181 }
 0xab4   :  { %v2334_v3 = vsel %vm557_vm15, %v2330_v10, %v2182_v40 }
 0xabb   :  { %v2194_v21 = vpop.permute.xlu1 %2193 }
 0xabc   :  { %v2338_v36 = vsel %vm911_vm5, %v2334_v3, %v2194_v21 }
 0xabd   :  { %v2342_v1 = vsel %vm916_vm6, %v2338_v36, %v2206_v14 }
 0xabe   :  { %v2346_v52 = vsel %vm921_vm7, %v2342_v1, %v2218_v4 }
 0xac3   :  { %v2230_v46 = vpop.permute.xlu1 %2229 }
 0xac4   :  { %v2350_v15 = vsel %vm926_vm8, %v2346_v52, %v2230_v46 }
 0xac8   :  { %3937 = vrot.lane.b32.xlu2 %v7098_v43, %s4230_s19 }
 0xacb   :  { %v2242_v8 = vpop.permute.xlu1 %2241 }
 0xacc   :  { %v2354_v39 = vsel %vm931_vm9, %v2350_v15, %v2242_v8 }
 0xad3   :  { %v2254_v59 = vpop.permute.xlu1 %2253 }
 0xad4   :  { %v2358_v31 = vsel %vm936_vm10, %v2354_v39, %v2254_v59 }
 0xadb   :  { %v2266_v48 = vpop.permute.xlu1 %2265 }
 0xadc   :  { %v2362_v33 = vsel %vm941_vm11, %v2358_v31, %v2266_v48  ;;  %v3933_v48 = vpop.permute.xlu0 %3932 }
 0xadd   :  { %v3934_v4 = vunpack.i.l.bf16 %v3933_v48  ;;  %v3935_v1 = vunpack.i.h.bf16 %v3933_v48 }
 0xae3   :  { %v2278_v26 = vpop.permute.xlu1 %2277 }
 0xae4   :  { %v2366_v13 = vsel %vm946_vm12, %v2362_v33, %v2278_v26 }
 0xae5   :  { %v2370_v29 = vsel %vm951_vm13, %v2366_v13, %v2290_v63 }
 0xae6   :  { %v2374_v55 = vsel %vm956_vm14, %v2370_v29, %v2302_v16 }
 0xaeb   :  { %v2314_v25 = vpop.permute.xlu1 %2313 }
 0xaec   :  { %v2378_v47 = vsel %vm961_vm4, %v2374_v55, %v2314_v25  ;;  %v2388_v20 = vpop.xlane.xlu2 %2387 }
 0xaed   :  { %v2382_v32 = vadd.f32 %v2378_v47, %v2073_v45  ;;  %v2396_v57 = vsub.f32 %v6114_v61, %v2388_v20 }
 0xaef   :  { %v2392_v53 = vsel %vm98_vm1, %v2382_v32, -inf  ;;  %v2401_v40 = vmul.f32 1.442695, %v2396_v57 }
 0xaf0   :  { %2393 = vmax.xlane.f32.xlu1 %v2392_v53 }
 0xb09   :  { %3927 = vrot.lane.b32.xlu1 %v7098_v43, %s4229_s6 }
 0xb16   :  { %v2385_v18 = vpop.xlane.xlu1 %2384 }
 0xb17   :  { %v2395_v0 = vsub.f32 %v2379_v11, %v2385_v18  ;;  %v1926_v11 = vsub.f32 %v5899_v35, %v5952_v62  ;;  %v1925_v62 = vsub.f32 %v5871_v24, %v5961_v56 }
 0xb19   :  { %v2399_v17 = vmul.f32 1.442695, %v2395_v0  ;;  %v1932_v8 = vmul.f32 1.442695, %v1926_v11  ;;  %v1930_v59 = vmul.f32 1.442695, %v1925_v62 }
 0xb1b   :  { %4060 = vpow2.f32 %v2399_v17  ;;  %v2391_v23 = vpop.xlane.xlu2 %2390 }
 0xb1c   :  { %v2397_v28 = vsub.f32 %v2381_v60, %v2391_v23 }
 0xb1e   :  { %v2403_v41 = vmul.f32 1.442695, %v2397_v28 }
 0xb20   :  { %4062 = vpow2.f32 %v2403_v41 }
 0xb21   :  { %v4061_v7 = vpop.eup %4060  ;;  %4064 = vpow2.f32 %v2401_v40 }
 0xb22   :  { %v2407_v5 = vsel %vm98_vm1, %v4061_v7, 0.0  ;;  %4066 = vpow2.f32 %v1932_v8  ;;  %v2542_v8 = vld [vmem:[%s6935_s3 + $0x51] sm:$0xff] }
 0xb23   :  { %2408 = vadd.xlane.f32.xlu0 %v2407_v5  ;;  %v1938_v37 = vpop.xlane.xlu2 %1937  ;;  %4068 = vpow2.f32 %v1930_v59 }
 0xb26   :  { %v6172_v21 = vpop.eup %4062 }
 0xb27   :  { %v2413_v46 = vsel %vm98_vm1, %v6172_v21, 0.0  ;;  %v4065_v61 = vpop.eup %4064 }
 0xb28   :  { %2414 = vadd.xlane.f32.xlu2 %v2413_v46  ;;  %v2410_v44 = vsel %vm98_vm1, %v4065_v61, 0.0  ;;  %v6179_v50 = vpop.eup %4066 }
 0xb29   :  { %v1942_v35 = vsel %vm98_vm1, %v6179_v50, 0.0  ;;  %v4069_v10 = vpop.eup %4068 }
 0xb2b   :  { %v3938_v60 = vpop.permute.xlu2 %3937 }
 0xb2c   :  { %v3939_v43 = vunpack.i.l.bf16 %v3938_v60  ;;  %v3940_v51 = vunpack.i.h.bf16 %v3938_v60 }
 0xb2e   :  { %1992 = vmatpush.msrb.mxu1 %v3939_v43  ;;  %v2543_v43 = vld [vmem:[%s6935_s3 + $0x59] sm:$0xff] }
 0xb30   :  { %1993 = vmatpush.msrb.mxu1 %v3940_v51  ;;  %v2541_v51 = vld [vmem:[%s6935_s3 + $0x49] sm:$0xff] }
 0xb33   :  { %2411 = vadd.xlane.f32.xlu1 %v2410_v44 }
 0xb37   :  { %3942 = vrot.lane.b32.xlu0 %v7097_v2, %s4230_s19  ;;  %v1927_v2 = vsub.f32 %v5929_v27, %v5976_v38 }
 0xb39   :  { %v1934_v58 = vmul.f32 1.442695, %v1927_v2 }
 0xb3b   :  { %1943 = vadd.xlane.f32.xlu1 %v1942_v35  ;;  %4070 = vpow2.f32 %v1934_v58 }
 0xb40   :  { %2484 = vrot.lane.b32.xlu2 %v6067_v30, %s4219_s4  ;;  %v1939_v30 = vsel %vm98_vm1, %v4069_v10, 0.0 }
 0xb41   :  { %v4071_v24 = vpop.eup %4070 }
 0xb48   :  { %2486 = vrot.lane.b32.xlu2 %v6078_v49, %s4219_s4 }
 0xb50   :  { %2488 = vrot.lane.b32.xlu2 %v6083_v19, %s4219_s4  ;;  %v1945_v19 = vsel %vm98_vm1, %v4071_v24, 0.0 }
 0xb58   :  { %2490 = vrot.lane.b32.xlu2 %v6089_v9, %s4219_s4  ;;  %s4239_s4 = smov [#allocation2]  }
 0xb59   :  { %s3727_s25 = sshll.u32 %s4239_s4, 4  ;;  %s3728_s25 = int_to_ptr.vmem [resolvable:$true] %s3727_s25 }
 0xb61   :  { %1940 = vadd.xlane.f32.xlu0 %v1939_v30 }
 0xb63   :  { %v2394_v49 = vpop.xlane.xlu1 %2393 }
 0xb64   :  { %v2398_v3 = vsub.f32 %v2382_v32, %v2394_v49 }
 0xb66   :  { %v2405_v56 = vmul.f32 1.442695, %v2398_v3 }
 0xb68   :  { %4072 = vpow2.f32 %v2405_v56 }
 0xb69   :  { %1946 = vadd.xlane.f32.xlu0 %v1945_v19 }
 0xb6e   :  { %v4073_v36 = vpop.eup %4072 }
 0xb6f   :  { %v2416_v27 = vsel %vm98_vm1, %v4073_v36, 0.0 }
 0xb70   :  { %2417 = vadd.xlane.f32.xlu1 %v2416_v27 }
 0xb7b   :  { %v3928_v38 = vpop.permute.xlu1 %3927 }
 0xb7c   :  { %v3929_v9 = vunpack.i.l.bf16 %v3928_v38  ;;  %v3930_v14 = vunpack.i.h.bf16 %v3928_v38 }
 0xb7e   :  { %2463 = vmatpush.msra.mxu2 %v3929_v9 }
 0xb80   :  { %2464 = vmatpush.msra.mxu2 %v3930_v14 }
 0xb82   :  { %2465 = vmatpush.msra.mxu2 %v3934_v4 }
 0xb84   :  { %2466 = vmatpush.msra.mxu2 %v3935_v1 }
 0xb96   :  { %v2409_v52 = vpop.xlane.xlu0 %2408 }
 0xb97   :  { %4074 = vrcp.f32 %v2409_v52 }
 0xb98   :  { %4076 = vrcp.f32 %v1938_v37 }
 0xb9b   :  { %v2415_v13 = vpop.xlane.xlu2 %2414 }
 0xb9d   :  { %v4075_v15 = vpop.eup %4074 }
 0xb9e   :  { %v2423_v39 = vmul.f32 %v4075_v15, %v4061_v7  ;;  %v4077_v33 = vpop.eup %4076  ;;  %v7099_v15 = vld [vmem:[#allocation6_spill] sm:$0xff] }
 0xb9f   :  { %v1952_v16 = vmul.f32 %v4077_v33, %v6144_v34  ;;  %v7100_v33 = vld [vmem:[#allocation7_spill] sm:$0xff] }
 0xba0   :  { %3818 = vmatmul.msk.f32.vlgmr.msra.gmra.mxu2 %vm98_vm1, %v2423_v39 }
 0xba3   :  { %v2485_v44 = vpop.permute.xlu2 %2484 }
 0xba6   :  { %v2412_v31 = vpop.xlane.xlu1 %2411 }
 0xba7   :  { %4078 = vrcp.f32 %v2412_v31 }
 0xba8   :  { %4080 = vrcp.f32 %v2415_v13 }
 0xba9   :  { %v3943_v26 = vpop.permute.xlu0 %3942 }
 0xbaa   :  { %v3944_v63 = vunpack.i.l.bf16 %v3943_v26  ;;  %v3945_v22 = vunpack.i.h.bf16 %v3943_v26 }
 0xbab   :  { %v2487_v58 = vpop.permute.xlu2 %2486 }
 0xbac   :  { %1994 = vmatpush.msrb.mxu1 %v3944_v63  ;;  %v2529_v30 = vsel %vm557_vm15, %v5759_v12, %v2487_v58 }
 0xbad   :  { %v4079_v29 = vpop.eup %4078 }
 0xbae   :  { %1995 = vmatpush.msrb.mxu1 %v3945_v22  ;;  %v2424_v45 = vmul.f32 %v4079_v29, %v4065_v61  ;;  %v4081_v25 = vpop.eup %4080  ;;  %v1944_v32 = vpop.xlane.xlu1 %1943  ;;  %v2540_v61 = vld [vmem:[%s6935_s3 + $0x41] sm:$0xff] }
 0xbaf   :  { %3802 = vmatmul.msk.f32.vlgmr.msrb.gmra.mxu1 %vm98_vm1, %v1952_v16  ;;  %v2425_v55 = vmul.f32 %v4081_v25, %v6172_v21  ;;  %v7101_v16 = vld [vmem:[#allocation8_spill] sm:$0xff] }
 0xbb0   :  { %3819 = vmatmul.msk.f32.gmra.mxu2 %vm98_vm1, %v2424_v45  ;;  %2568 = vmatpush.msra.mxu1 %v2543_v43 }
 0xbb2   :  { %2569 = vmatpush.msra.mxu1 %v2542_v8 }
 0xbb4   :  { %2570 = vmatpush.msra.mxu1 %v2541_v51 }
 0xbb6   :  { %2571 = vmatpush.msra.mxu1 %v2540_v61 }
 0xbb8   :  { %3820 = vmatmul.msk.f32.gmra.mxu2 %vm98_vm1, %v2425_v55 }
 0xbd4   :  { %v1941_v47 = vpop.xlane.xlu0 %1940 }
 0xbd5   :  { %4082 = vrcp.f32 %v1941_v47 }
 0xbd6   :  { %4084 = vrcp.f32 %v1944_v32  ;;  %v7102_v32 = vld [vmem:[#allocation9_spill] sm:$0xff] }
 0xbdb   :  { %v4083_v53 = vpop.eup %4082 }
 0xbdc   :  { %v1953_v20 = vmul.f32 %v4083_v53, %v4069_v10  ;;  %v1947_v34 = vpop.xlane.xlu0 %1946  ;;  %v4085_v18 = vpop.eup %4084 }
 0xbdd   :  { %4086 = vrcp.f32 %v1947_v34  ;;  %v1954_v17 = vmul.f32 %v4085_v18, %v6179_v50  ;;  %v2528_v50 = vsel %vm557_vm15, %v5757_v42, %v2485_v44  ;;  %v2489_v42 = vpop.permute.xlu2 %2488 }
 0xbde   :  { %3803 = vmatmul.msk.f32.gmra.mxu1 %vm98_vm1, %v1953_v20  ;;  %v2530_v56 = vsel %vm557_vm15, %v5781_v6, %v2489_v42  ;;  %v3980_v6 = vld [vmem:[%s6935_s3 + $0x61] ss:$0 sm:$0xff] }
 0xbe3   :  { %v2418_v0 = vpop.xlane.xlu1 %2417  ;;  %v4087_v23 = vpop.eup %4086 }
 0xbe4   :  { %4088 = vrcp.f32 %v2418_v0  ;;  %v1955_v7 = vmul.f32 %v4087_v23, %v4071_v24  ;;  %v7103_v0 = vld [vmem:[#allocation5_spill] sm:$0xff] }
 0xbe5   :  { %v2491_v12 = vpop.permute.xlu2 %2490 }
 0xbe6   :  { %3804 = vmatmul.msk.f32.gmra.mxu1 %vm98_vm1, %v1954_v17  ;;  %v2531_v48 = vsel %vm557_vm15, %v5800_v54, %v2491_v12  ;;  %v6319_v12 = vld [vmem:[%s6933_s1 + $0x2e] ss:$0 sm:$0xff] }
 0xbea   :  { %v4089_v28 = vpop.eup %4088 }
 0xbeb   :  { %v2426_v41 = vmul.f32 %v4089_v28, %v4073_v36 }
 0xbed   :  { %3821 = vmatmul.msk.f32.gmra.mxu2 %vm98_vm1, %v2426_v41 }
 0xbee   :  { %3805 = vmatmul.msk.f32.gmra.mxu1 %vm98_vm1, %v1955_v7 }
 0xc23   :  { %v2468_v57 = vpop.f32.mrf.mxu2 }
 0xc24   :  { %2516 = vrot.lane.b32.xlu0 %v2468_v57, %s4227_s13 }
 0xc2c   :  { %v1997_v5 = vpop.f32.mrf.mxu1 }
 0xc2d   :  { %2500 = vrot.lane.b32.xlu1 %v1997_v5, %s4221_s26 }
 0xc33   :  { %v2471_v37 = vpop.f32.mrf.mxu2 }
 0xc35   :  { %2518 = vrot.lane.b32.xlu1 %v2471_v37, %s4227_s13 }
 0xc3b   :  { %v2474_v40 = vpop.f32.mrf.mxu2 }
 0xc3d   :  { %2520 = vrot.lane.b32.xlu1 %v2474_v40, %s4227_s13 }
 0xc5b   :  { %v2000_v21 = vpop.f32.mrf.mxu1 }
 0xc5c   :  { %2502 = vrot.lane.b32.xlu0 %v2000_v21, %s4221_s26 }
 0xc63   :  { %v2003_v46 = vpop.f32.mrf.mxu1 }
 0xc64   :  { %2504 = vrot.lane.b32.xlu0 %v2003_v46, %s4221_s26 }
 0xc6b   :  { %v2006_v11 = vpop.f32.mrf.mxu1 }
 0xc6c   :  { %2506 = vrot.lane.b32.xlu0 %v2006_v11, %s4221_s26 }
 0xc70   :  { %v2477_v60 = vpop.f32.mrf.mxu2 }
 0xc71   :  { %2522 = vrot.lane.b32.xlu1 %v2477_v60, %s4227_s13 }
 0xc96   :  { %v2517_v62 = vpop.permute.xlu0 %2516 }
 0xc9f   :  { %v2501_v35 = vpop.permute.xlu1 %2500 }
 0xca0   :  { %v2532_v59 = vsel %vm926_vm8, %v2528_v50, %v2501_v35  ;;  %v2698_v35 = vld [vmem:[%s6940_s8 + $0x18] sm:$0xff] }
 0xca1   :  { %v2536_v2 = vsel %vm946_vm12, %v2532_v59, %v2517_v62  ;;  %2725 = vmatpush.msra.mxu3 %v2698_v35  ;;  %v2697_v62 = vld [vmem:[%s6940_s8 + $0x10] sm:$0xff]  ;;  %v2696_v59 = vld [vmem:[%s6940_s8 + $0x8] sm:$0xff] }
 0xca2   :  { %3822 = vmatmul.msk.f32.vlgmr.msra.gmra.mxu1 %vm98_vm1, %v2536_v2  ;;  %v2695_v2 = vld [vmem:[%s6940_s8] sm:$0xff] }
 0xca3   :  { %2726 = vmatpush.msra.mxu3 %v2697_v62 }
 0xca5   :  { %2727 = vmatpush.msra.mxu3 %v2696_v59 }
 0xca7   :  { %v2519_v10 = vpop.permute.xlu1 %2518  ;;  %2728 = vmatpush.msra.mxu3 %v2695_v2 }
 0xcaf   :  { %v2521_v36 = vpop.permute.xlu1 %2520 }
 0xcce   :  { %v2503_v49 = vpop.permute.xlu0 %2502 }
 0xccf   :  { %v2533_v3 = vsel %vm926_vm8, %v2529_v30, %v2503_v49 }
 0xcd0   :  { %v2537_v24 = vsel %vm946_vm12, %v2533_v3, %v2519_v10 }
 0xcd1   :  { %3823 = vmatmul.msk.f32.gmra.mxu1 %vm98_vm1, %v2537_v24 }
 0xcd6   :  { %v2505_v19 = vpop.permute.xlu0 %2504 }
 0xcd7   :  { %v2534_v27 = vsel %vm926_vm8, %v2530_v56, %v2505_v19 }
 0xcd8   :  { %v2538_v38 = vsel %vm946_vm12, %v2534_v27, %v2521_v36  ;;  %v6314_v36 = vld [vmem:[%s6933_s1 + $0x2d] ss:$0 sm:$0xff] }
 0xcd9   :  { %3824 = vmatmul.msk.f32.gmra.mxu1 %vm98_vm1, %v2538_v38 }
 0xcde   :  { %v2507_v9 = vpop.permute.xlu0 %2506 }
 0xcdf   :  { %v2535_v14 = vsel %vm926_vm8, %v2531_v48, %v2507_v9 }
 0xce3   :  { %v2523_v4 = vpop.permute.xlu1 %2522 }
 0xce4   :  { %v2539_v1 = vsel %vm946_vm12, %v2535_v14, %v2523_v4 }
 0xce5   :  { %3825 = vmatmul.msk.f32.gmra.mxu1 %vm98_vm1, %v2539_v1 }
 0xd1f   :  { %v2573_v52 = vpop.f32.mrf.mxu1 }
 0xd20   :  { %v2585_v39 = vadd.f32 %v2573_v52, %v7099_v15 }
 0xd22   :  { %v6255_v31 = vadd.f32 %v3980_v6, %v2585_v39 }
 0xd24   :  { %v2597_v26 = vsel %vm98_vm1, %v6255_v31, 0.0 }
 0xd25   :  { %2598 = vadd.xlane.f32.xlu2 %v2597_v26 }
 0xd4e   :  { %v2576_v54 = vpop.f32.mrf.mxu1 }
 0xd4f   :  { %v2586_v13 = vadd.f32 %v2576_v54, %v7100_v33 }
 0xd51   :  { %v6260_v63 = vadd.f32 %v3980_v6, %v2586_v13 }
 0xd53   :  { %v2600_v22 = vsel %vm98_vm1, %v6260_v63, 0.0 }
 0xd54   :  { %2601 = vadd.xlane.f32.xlu0 %v2600_v22  ;;  %v4231_v22 = vmov 1  }
 0xd55   :  { %3946 = vset.pattern.permute.xlu1 %v4231_v22 }
 0xd56   :  { %v2579_v29 = vpop.f32.mrf.mxu1 }
 0xd57   :  { %v2587_v45 = vadd.f32 %v2579_v29, %v7101_v16  ;;  %v6330_v16 = vld [vmem:[%s6939_s7] sm:$0xff] }
 0xd59   :  { %v6265_v25 = vadd.f32 %v3980_v6, %v2587_v45 }
 0xd5b   :  { %v2603_v55 = vsel %vm98_vm1, %v6265_v25, 0.0 }
 0xd5c   :  { %2604 = vadd.xlane.f32.xlu1 %v2603_v55 }
 0xd62   :  { %v2582_v47 = vpop.f32.mrf.mxu1 }
 0xd63   :  { %v2588_v53 = vadd.f32 %v2582_v47, %v7102_v32 }
 0xd65   :  { %v6270_v20 = vadd.f32 %v3980_v6, %v2588_v53 }
 0xd67   :  { %v2606_v34 = vsel %vm98_vm1, %v6270_v20, 0.0 }
 0xd68   :  { %2607 = vadd.xlane.f32.xlu2 %v2606_v34 }
 0xd98   :  { %v2599_v18 = vpop.xlane.xlu2 %2598 }
 0xd99   :  { %v2609_v17 = vmul.f32 %v2599_v18, %v7103_v0 }
 0xd9b   :  { %v2613_v23 = vsub.f32 %v6255_v31, %v2609_v17 }
 0xd9d   :  { %v2617_v28 = vmul.f32 %v2613_v23, %v2613_v23 }
 0xd9f   :  { %v2621_v41 = vsel %vm98_vm1, %v2617_v28, 0.0 }
 0xda0   :  { %2622 = vadd.xlane.f32.xlu0 %v2621_v41 }
 0xdc7   :  { %v2602_v7 = vpop.xlane.xlu0 %2601 }
 0xdc8   :  { %v2610_v57 = vmul.f32 %v2602_v7, %v7103_v0 }
 0xdca   :  { %v6279_v5 = vsub.f32 %v6260_v63, %v2610_v57  ;;  %v4232_v57 = vmov 3  }
 0xdcc   :  { %v2618_v37 = vmul.f32 %v6279_v5, %v6279_v5 }
 0xdce   :  { %v2624_v40 = vsel %vm98_vm1, %v2618_v37, 0.0 }
 0xdcf   :  { %2625 = vadd.xlane.f32.xlu1 %v2624_v40  ;;  %v2605_v21 = vpop.xlane.xlu1 %2604 }
 0xdd0   :  { %v2611_v46 = vmul.f32 %v2605_v21, %v7103_v0 }
 0xdd2   :  { %v6286_v11 = vsub.f32 %v6265_v25, %v2611_v46 }
 0xdd4   :  { %v2619_v60 = vmul.f32 %v6286_v11, %v6286_v11 }
 0xdd6   :  { %v2627_v43 = vsel %vm98_vm1, %v2619_v60, 0.0 }
 0xdd7   :  { %2628 = vadd.xlane.f32.xlu2 %v2627_v43 }
 0xddb   :  { %v2608_v8 = vpop.xlane.xlu2 %2607 }
 0xddc   :  { %v2612_v51 = vmul.f32 %v2608_v8, %v7103_v0 }
 0xdde   :  { %v6293_v61 = vsub.f32 %v6270_v20, %v2612_v51 }
 0xde0   :  { %v2620_v44 = vmul.f32 %v6293_v61, %v6293_v61 }
 0xde2   :  { %v2630_v50 = vsel %vm98_vm1, %v2620_v44, 0.0  ;;  %v4233_v44 = vmov 0  }
 0xde3   :  { %2631 = vadd.xlane.f32.xlu0 %v2630_v50  ;;  %v6348_v50 = vld [vmem:[%s6939_s7 + $0x8] sm:$0xff] }
 0xde8   :  { %2894 = vperm.xlu1 %3946, %v6330_v16  }
 0xdf0   :  { %3948 = vset.pattern.permute.xlu1 %v4232_v57 }
 0xdf1   :  { %2961 = vperm.xlu1 %3948, %v6330_v16  }
 0xdf9   :  { %3950 = vset.pattern.permute.xlu1 %v4233_v44 }
 0xdfa   :  { %2860 = vperm.xlu1 %3950, %v6348_v50  }
 0xe13   :  { %v2623_v58 = vpop.xlane.xlu0 %2622 }
 0xe14   :  { %v2633_v10 = vmul.f32 %v2623_v58, %v7103_v0 }
 0xe16   :  { %v2637_v30 = vadd.f32 1e-05, %v2633_v10  ;;  %v4234_v10 = vmov 2  }
 0xe17   :  { %3954 = vset.pattern.permute.xlu1 %v4234_v10  ;;  %3947 = vset.pattern.permute.xlu2 %v4234_v10 }
 0xe18   :  { %4090 = vrsqrt.f32 %v2637_v30  ;;  %vm2647_vm15 = vweird.f32 %v2637_v30  ;;  %2936 = vperm.xlu1 %3954, %v6348_v50   ;;  %2932 = vperm.xlu2 %3947, %v6330_v16  }
 0xe1e   :  { %v4091_v49 = vpop.eup %4090 }
 0xe1f   :  { %v2642_v3 = vmul.f32 %v4091_v49, %v2637_v30  ;;  %vm2648_vm4 = vweird.f32 %v4091_v49  ;;  %v6371_v30 = vld [vmem:[%s6940_s8 + $0x20] ss:$0 sm:$0xff] }
 0xe20   :  { %vm2649_vm0 = vmor %vm2647_vm15, %vm2648_vm4  ;;  %3956 = vset.pattern.permute.xlu1 %v4232_v57 }
 0xe21   :  { %v2643_v24 = vmul.f32 %v4091_v49, %v2642_v3  ;;  %2965 = vperm.xlu1 %3956, %v6348_v50  }
 0xe23   :  { %v2644_v42 = vmul.f32 0.5, %v2643_v24 }
 0xe25   :  { %v2645_v56 = vsub.f32 1.5, %v2644_v42 }
 0xe27   :  { %v2646_v19 = vmul.f32 %v4091_v49, %v2645_v56 }
 0xe29   :  { %v2650_v27 = vsel %vm2649_vm0, %v4091_v49, %v2646_v19  ;;  %3958 = vset.pattern.permute.xlu1 %v4231_v22  ;;  %v4235_v19 = vmov 5  }
 0xe2a   :  { %v2681_v38 = vmul.f32 %v2650_v27, %v2613_v23  ;;  %3952 = vset.pattern.permute.xlu0 %v4235_v19 }
 0xe2b   :  { %3037 = vperm.xlu0 %3952, %v6330_v16  }
 0xe2c   :  { %v2686_v9 = vmul.f32 %v6314_v36, %v2681_v38  ;;  %v4236_v38 = vmov 4  }
 0xe2d   :  { %3949 = vset.pattern.permute.xlu2 %v4236_v38 }
 0xe2e   :  { %v2691_v48 = vadd.f32 %v6319_v12, %v2686_v9  ;;  %2999 = vperm.xlu2 %3949, %v6330_v16  }
 0xe30   :  { %3826 = vmatmul.msk.f32.vlgmr.msra.gmra.mxu3 %vm98_vm1, %v2691_v48 }
 0xe33   :  { %3953 = vset.pattern.permute.xlu0 %v4233_v44 }
 0xe34   :  { %2856 = vperm.xlu0 %3953, %v6330_v16  }
 0xe36   :  { %3951 = vset.pattern.permute.xlu2 %v4231_v22 }
 0xe37   :  { %2898 = vperm.xlu2 %3951, %v6348_v50  }
 0xe42   :  { %v2626_v14 = vpop.xlane.xlu1 %2625 }
 0xe43   :  { %v2634_v4 = vmul.f32 %v2626_v14, %v7103_v0 }
 0xe45   :  { %v2638_v1 = vadd.f32 1e-05, %v2634_v4 }
 0xe47   :  { %4092 = vrsqrt.f32 %v2638_v1  ;;  %vm2657_vm3 = vweird.f32 %v2638_v1 }
 0xe4a   :  { %v2629_v6 = vpop.xlane.xlu2 %2628 }
 0xe4b   :  { %v2635_v52 = vmul.f32 %v2629_v6, %v7103_v0 }
 0xe4d   :  { %v4093_v15 = vpop.eup %4092  ;;  %v2639_v39 = vadd.f32 1e-05, %v2635_v52 }
 0xe4e   :  { %v2652_v26 = vmul.f32 %v4093_v15, %v2638_v1  ;;  %vm2658_vm2 = vweird.f32 %v4093_v15 }
 0xe4f   :  { %4094 = vrsqrt.f32 %v2639_v39  ;;  %vm2659_vm5 = vmor %vm2657_vm3, %vm2658_vm2  ;;  %vm2667_vm7 = vweird.f32 %v2639_v39 }
 0xe50   :  { %v2653_v54 = vmul.f32 %v4093_v15, %v2652_v26 }
 0xe52   :  { %v2654_v33 = vmul.f32 0.5, %v2653_v54 }
 0xe54   :  { %v2655_v13 = vsub.f32 1.5, %v2654_v33 }
 0xe55   :  { %v4095_v29 = vpop.eup %4094 }
 0xe56   :  { %v2656_v45 = vmul.f32 %v4093_v15, %v2655_v13  ;;  %v2662_v55 = vmul.f32 %v4095_v29, %v2639_v39  ;;  %v2632_v47 = vpop.xlane.xlu0 %2631  ;;  %vm2668_vm6 = vweird.f32 %v4095_v29 }
 0xe57   :  { %v2636_v32 = vmul.f32 %v2632_v47, %v7103_v0  ;;  %vm2669_vm8 = vmor %vm2667_vm7, %vm2668_vm6 }
 0xe58   :  { %v2660_v53 = vsel %vm2659_vm5, %v4093_v15, %v2656_v45  ;;  %v2663_v34 = vmul.f32 %v4095_v29, %v2662_v55  ;;  %v4237_v15 = vmov 6  }
 0xe59   :  { %v2640_v18 = vadd.f32 1e-05, %v2636_v32  ;;  %v2682_v17 = vmul.f32 %v2660_v53, %v6279_v5  ;;  %3955 = vset.pattern.permute.xlu2 %v4237_v15 }
 0xe5a   :  { %v2664_v23 = vmul.f32 0.5, %v2663_v34  ;;  %3075 = vperm.xlu2 %3955, %v6330_v16  }
 0xe5b   :  { %4096 = vrsqrt.f32 %v2640_v18  ;;  %v2687_v28 = vmul.f32 %v6314_v36, %v2682_v17  ;;  %vm2677_vm10 = vweird.f32 %v2640_v18 }
 0xe5c   :  { %v2665_v41 = vsub.f32 1.5, %v2664_v23 }
 0xe5d   :  { %v2692_v7 = vadd.f32 %v6319_v12, %v2687_v28 }
 0xe5e   :  { %v2666_v37 = vmul.f32 %v4095_v29, %v2665_v41 }
 0xe5f   :  { %3827 = vmatmul.msk.f32.gmra.mxu3 %vm98_vm1, %v2692_v7 }
 0xe60   :  { %v2670_v40 = vsel %vm2669_vm8, %v4095_v29, %v2666_v37  ;;  %v6407_v29 = vld [vmem:[%s6939_s7 + $0x18] sm:$0xff] }
 0xe61   :  { %v4097_v5 = vpop.eup %4096  ;;  %v2683_v21 = vmul.f32 %v2670_v40, %v6286_v11 }
 0xe62   :  { %v2672_v46 = vmul.f32 %v4097_v5, %v2640_v18  ;;  %vm2678_vm9 = vweird.f32 %v4097_v5  ;;  %3957 = vset.pattern.permute.xlu2 %v4236_v38 }
 0xe63   :  { %v2688_v60 = vmul.f32 %v6314_v36, %v2683_v21  ;;  %vm2679_vm11 = vmor %vm2677_vm10, %vm2678_vm9  ;;  %3003 = vperm.xlu2 %3957, %v6348_v50  }
 0xe64   :  { %v2673_v43 = vmul.f32 %v4097_v5, %v2672_v46 }
 0xe65   :  { %v2693_v8 = vadd.f32 %v6319_v12, %v2688_v60 }
 0xe66   :  { %v2674_v51 = vmul.f32 0.5, %v2673_v43 }
 0xe67   :  { %3828 = vmatmul.msk.f32.gmra.mxu3 %vm98_vm1, %v2693_v8 }
 0xe68   :  { %v2675_v11 = vsub.f32 1.5, %v2674_v51 }
 0xe6a   :  { %v2676_v35 = vmul.f32 %v4097_v5, %v2675_v11 }
 0xe6b   :  { %3959 = vset.pattern.permute.xlu2 %v4235_v19 }
 0xe6c   :  { %v2680_v62 = vsel %vm2679_vm11, %v4097_v5, %v2676_v35  ;;  %3041 = vperm.xlu2 %3959, %v6348_v50  }
 0xe6d   :  { %v2684_v59 = vmul.f32 %v2680_v62, %v6293_v61  ;;  %v6365_v61 = vld [vmem:[%s6939_s7 + $0x10] sm:$0xff] }
 0xe6e   :  { %2902 = vperm.xlu1 %3958, %v6365_v61   ;;  %2864 = vperm.xlu0 %3953, %v6365_v61  }
 0xe6f   :  { %v2689_v2 = vmul.f32 %v6314_v36, %v2684_v59 }
 0xe71   :  { %v2694_v58 = vadd.f32 %v6319_v12, %v2689_v2 }
 0xe73   :  { %3829 = vmatmul.msk.f32.gmra.mxu3 %vm98_vm1, %v2694_v58 }
 0xe74   :  { %3961 = vset.pattern.permute.xlu2 %v4237_v15 }
 0xe76   :  { %3960 = vset.pattern.permute.xlu1 %v4234_v10  ;;  %3962 = vset.pattern.permute.xlu0 %v4232_v57 }
 0xeb3   :  { %v2730_v49 = vpop.f32.mrf.mxu3 }
 0xeb4   :  { %v6375_v3 = vadd.f32 %v6371_v30, %v2730_v49 }
 0xeb6   :  { %v3830_v24 = vmul.f32 -1.442695, %v6375_v3 }
 0xeb8   :  { %4098 = vpow2.f32 %v3830_v24 }
 0xebe   :  { %v4099_v42 = vpop.eup %4098 }
 0xebf   :  { %v2754_v56 = vadd.f32 1.0, %v4099_v42 }
 0xec1   :  { %4100 = vrcp.f32 %v2754_v56  ;;  %v2769_v9 = vand.u32 2147483648, %v2754_v56  ;;  %v2767_v14 = vand.u32 2147483647, %v2754_v56  ;;  %vm2763_vm13 = vweird.f32 %v2754_v56 }
 0xec3   :  { %v2770_v1 = vor.u32 1.1754944e-38, %v2769_v9  ;;  %vm2768_vm4 = vcmp.eq.f32.partialorder %v2767_v14, 8.507059e+37  ;;  %v6433_v14 = vpop.permute.xlu1 %2894 }
 0xec7   :  { %v4101_v36 = vpop.eup %4100 }
 0xec8   :  { %v2759_v27 = vmul.f32 %v4101_v36, %v2754_v56  ;;  %vm2764_vm12 = vweird.f32 %v4101_v36 }
 0xec9   :  { %vm2765_vm14 = vmor %vm2763_vm13, %vm2764_vm12 }
 0xeca   :  { %v2760_v12 = vsub.f32 1.0, %v2759_v27 }
 0xecc   :  { %v2761_v48 = vmul.f32 %v4101_v36, %v2760_v12 }
 0xece   :  { %v2762_v4 = vadd.f32 %v4101_v36, %v2761_v48 }
 0xed0   :  { %v2766_v6 = vsel %vm2765_vm14, %v4101_v36, %v2762_v4  ;;  %v6437_v4 = vpop.permute.xlu2 %2932 }
 0xed1   :  { %v2771_v52 = vsel %vm2768_vm4, %v2770_v1, %v2766_v6 }
 0xed2   :  { %2822 = vrot.lane.b32.xlu1 %v2771_v52, %s4211_s0 }
 0xeda   :  { %2940 = vperm.xlu1 %3960, %v6365_v61  }
 0xee2   :  { %v2733_v39 = vpop.f32.mrf.mxu3  ;;  %3963 = vset.pattern.permute.xlu1 %v4236_v38 }
 0xee3   :  { %v6394_v26 = vadd.f32 %v6371_v30, %v2733_v39  ;;  %3007 = vperm.xlu1 %3963, %v6365_v61  }
 0xee5   :  { %v3831_v54 = vmul.f32 -1.442695, %v6394_v26 }
 0xee7   :  { %4102 = vpow2.f32 %v3831_v54 }
 0xeea   :  { %v2736_v33 = vpop.f32.mrf.mxu3 }
 0xeeb   :  { %v6401_v13 = vadd.f32 %v6371_v30, %v2736_v33  ;;  %3965 = vset.pattern.permute.xlu1 %v4231_v22 }
 0xeec   :  { %2906 = vperm.xlu1 %3965, %v6407_v29  }
 0xeed   :  { %v4103_v16 = vpop.eup %4102  ;;  %v3832_v45 = vmul.f32 -1.442695, %v6401_v13 }
 0xeee   :  { %v2755_v55 = vadd.f32 1.0, %v4103_v16 }
 0xeef   :  { %4104 = vpow2.f32 %v3832_v45  ;;  %v2838_v45 = vld [vmem:[%s6941_s9] sm:$0xff] }
 0xef0   :  { %4106 = vrcp.f32 %v2755_v55  ;;  %v2784_v28 = vand.u32 2147483648, %v2755_v55  ;;  %v2782_v7 = vand.u32 2147483647, %v2755_v55  ;;  %vm2778_vm0 = vweird.f32 %v2755_v55 }
 0xef2   :  { %v2785_v5 = vor.u32 1.1754944e-38, %v2784_v28  ;;  %vm2783_vm3 = vcmp.eq.f32.partialorder %v2782_v7, 8.507059e+37  ;;  %v6492_v28 = vperm.slane %v2838_v45, 1 }
 0xef4   :  { %3968 = vset.pattern.permute.xlu1 %v4237_v15 }
 0xef5   :  { %v4105_v22 = vpop.eup %4104  ;;  %3083 = vperm.xlu1 %3968, %v6365_v61  }
 0xef6   :  { %v4107_v47 = vpop.eup %4106  ;;  %v2756_v32 = vadd.f32 1.0, %v4105_v22  ;;  %v2739_v53 = vpop.f32.mrf.mxu3 }
 0xef7   :  { %v6417_v34 = vadd.f32 %v6371_v30, %v2739_v53  ;;  %v2774_v18 = vmul.f32 %v4107_v47, %v2755_v55  ;;  %vm2779_vm15 = vweird.f32 %v4107_v47  ;;  %v6477_v53 = vperm.slane %v2838_v45, 3 }
 0xef8   :  { %4108 = vrcp.f32 %v2756_v32  ;;  %vm2780_vm2 = vmor %vm2778_vm0, %vm2779_vm15  ;;  %v2799_v11 = vand.u32 2147483648, %v2756_v32  ;;  %v2797_v62 = vand.u32 2147483647, %v2756_v32  ;;  %vm2793_vm6 = vweird.f32 %v2756_v32 }
 0xef9   :  { %v3833_v17 = vmul.f32 -1.442695, %v6417_v34  ;;  %v2775_v23 = vsub.f32 1.0, %v2774_v18 }
 0xefa   :  { %v2800_v2 = vor.u32 1.1754944e-38, %v2799_v11  ;;  %vm2798_vm8 = vcmp.eq.f32.partialorder %v2797_v62, 8.507059e+37  ;;  %v6519_v62 = vperm.slane %v2838_v45, 2 }
 0xefb   :  { %4110 = vpow2.f32 %v3833_v17  ;;  %v2776_v41 = vmul.f32 %v4107_v47, %v2775_v23  ;;  %v3190_v17 = vld [vmem:[%s6935_s3 + $0x9a] sm:$0xff]  ;;  %v3189_v23 = vld [vmem:[%s6935_s3 + $0x92] sm:$0xff] }
 0xefc   :  { %3213 = vmatpush.msra.mxu0 %v3190_v17 }
 0xefd   :  { %v2777_v37 = vadd.f32 %v4107_v47, %v2776_v41  ;;  %3970 = vset.pattern.permute.xlu1 %v4236_v38 }
 0xefe   :  { %v4109_v40 = vpop.eup %4108  ;;  %3011 = vperm.xlu1 %3970, %v6407_v29   ;;  %3214 = vmatpush.msra.mxu0 %v3189_v23 }
 0xeff   :  { %v2781_v21 = vsel %vm2780_vm2, %v4107_v47, %v2777_v37  ;;  %v2789_v46 = vmul.f32 %v4109_v40, %v2756_v32  ;;  %vm2794_vm5 = vweird.f32 %v4109_v40 }
 0xf00   :  { %v2786_v60 = vsel %vm2783_vm3, %v2785_v5, %v2781_v21  ;;  %vm2795_vm7 = vmor %vm2793_vm6, %vm2794_vm5 }
 0xf01   :  { %v4111_v43 = vpop.eup %4110  ;;  %2824 = vrot.lane.b32.xlu0 %v2786_v60, %s4211_s0  ;;  %v2790_v8 = vsub.f32 1.0, %v2789_v46 }
 0xf02   :  { %v2757_v51 = vadd.f32 1.0, %v4111_v43 }
 0xf03   :  { %v2791_v35 = vmul.f32 %v4109_v40, %v2790_v8 }
 0xf04   :  { %4112 = vrcp.f32 %v2757_v51  ;;  %v2814_v56 = vand.u32 2147483648, %v2757_v51  ;;  %v2812_v27 = vand.u32 2147483647, %v2757_v51  ;;  %vm2808_vm10 = vweird.f32 %v2757_v51 }
 0xf05   :  { %v2792_v59 = vadd.f32 %v4109_v40, %v2791_v35 }
 0xf06   :  { %v2815_v12 = vor.u32 1.1754944e-38, %v2814_v56  ;;  %vm2813_vm12 = vcmp.eq.f32.partialorder %v2812_v27, 8.507059e+37  ;;  %v6541_v27 = vperm.slane %v2838_v45, 4 }
 0xf07   :  { %v2796_v58 = vsel %vm2795_vm7, %v4109_v40, %v2792_v59  ;;  %v3188_v40 = vld [vmem:[%s6935_s3 + $0x8a] sm:$0xff] }
 0xf08   :  { %v2801_v30 = vsel %vm2798_vm8, %v2800_v2, %v2796_v58  ;;  %3215 = vmatpush.msra.mxu0 %v3188_v40  ;;  %v3187_v58 = vld [vmem:[%s6935_s3 + $0x82] sm:$0xff]  ;;  %vm7113_vm8 = vcmask 523264  }
 0xf09   :  { %2826 = vrot.lane.b32.xlu0 %v2801_v30, %s4211_s0  ;;  %v3186_v30 = vld [vmem:[%s6935_s3 + $0x7a] sm:$0xff] }
 0xf0a   :  { %v4113_v49 = vpop.eup %4112  ;;  %3216 = vmatpush.msra.mxu0 %v3187_v58 }
 0xf0b   :  { %v2804_v24 = vmul.f32 %v4113_v49, %v2757_v51  ;;  %vm2809_vm9 = vweird.f32 %v4113_v49 }
 0xf0c   :  { %vm2810_vm11 = vmor %vm2808_vm10, %vm2809_vm9  ;;  %3217 = vmatpush.msra.mxu0 %v3186_v30 }
 0xf0d   :  { %v2805_v42 = vsub.f32 1.0, %v2804_v24 }
 0xf0f   :  { %v2806_v36 = vmul.f32 %v4113_v49, %v2805_v42 }
 0xf11   :  { %2969 = vperm.xlu0 %3962, %v6365_v61   ;;  %v2807_v38 = vadd.f32 %v4113_v49, %v2806_v36 }
 0xf13   :  { %v2811_v9 = vsel %vm2810_vm11, %v4113_v49, %v2807_v38 }
 0xf14   :  { %v2816_v48 = vsel %vm2813_vm12, %v2815_v12, %v2811_v9 }
 0xf15   :  { %2828 = vrot.lane.b32.xlu2 %v2816_v48, %s4211_s0 }
 0xf19   :  { %3967 = vset.pattern.permute.xlu0 %v4234_v10  ;;  %v6439_v10 = vpop.permute.xlu1 %2961 }
 0xf1a   :  { %2944 = vperm.xlu0 %3967, %v6407_v29  }
 0xf1d   :  { %3079 = vperm.xlu2 %3961, %v6348_v50   ;;  %v6443_v50 = vpop.permute.xlu2 %2999 }
 0xf21   :  { %v6445_v1 = vpop.permute.xlu1 %2860 }
 0xf22   :  { %3972 = vset.pattern.permute.xlu0 %v4237_v15  ;;  %v6457_v15 = vpop.permute.xlu0 %3037 }
 0xf23   :  { %3087 = vperm.xlu0 %3972, %v6407_v29  }
 0xf25   :  { %3964 = vset.pattern.permute.xlu2 %v4233_v44  ;;  %v6449_v44 = vpop.permute.xlu2 %2898 }
 0xf26   :  { %2868 = vperm.xlu2 %3964, %v6407_v29  }
 0xf29   :  { %v6451_v6 = vpop.permute.xlu1 %2936 }
 0xf2a   :  { %v2857_v54 = vpop.permute.xlu0 %2856 }
 0xf2e   :  { %3966 = vset.pattern.permute.xlu2 %v4235_v19 }
 0xf2f   :  { %3045 = vperm.xlu2 %3966, %v6365_v61   ;;  %v6453_v61 = vpop.permute.xlu2 %3075 }
 0xf31   :  { %v6455_v52 = vpop.permute.xlu1 %2965 }
 0xf32   :  { %v6465_v16 = vpop.permute.xlu0 %2864 }
 0xf37   :  { %3969 = vset.pattern.permute.xlu2 %v4232_v57  ;;  %v6459_v57 = vpop.permute.xlu2 %3003 }
 0xf38   :  { %2973 = vperm.xlu2 %3969, %v6407_v29  }
 0xf39   :  { %v6461_v39 = vpop.permute.xlu1 %2902 }
 0xf3f   :  { %v6463_v33 = vpop.permute.xlu2 %3041 }
 0xf40   :  { %3971 = vset.pattern.permute.xlu2 %v4235_v19 }
 0xf41   :  { %3049 = vperm.xlu2 %3971, %v6407_v29   ;;  %v2843_v29 = vlaneseq }
 0xf43   :  { %v6470_v55 = vshrl.u32 %v2843_v29, 7 }
 0xf44   :  { %v2823_v19 = vpop.permute.xlu1 %2822 }
 0xf45   :  { %v6473_v22 = vmul.f32 %v2823_v19, %v6375_v3  ;;  %vm2845_vm13 = vcmp.lt.s32.totalorder %v6470_v55, 3  ;;  %v6489_v3 = vperm.slane %v2838_v45, 0  ;;  %vm2883_vm14 = vcmp.lt.s32.totalorder %v6470_v55, 2 }
 0xf46   :  { %vm2921_vm4 = vcmp.lt.s32.totalorder %v6470_v55, 1  ;;  %vm2988_vm15 = vcmp.lt.s32.totalorder %v6470_v55, 7  ;;  %vm3026_vm0 = vcmp.lt.s32.totalorder %v6470_v55, 6  ;;  %vm3064_vm2 = vcmp.lt.s32.totalorder %v6470_v55, 5 }
 0xf47   :  { %v2839_v7 = vrot.slane %v6473_v22, 5  ;;  %v2879_v37 = vrot.slane %v6473_v22, 6  ;;  %v2956_v21 = vmul.f32 %v6477_v53, %v6473_v22  ;;  %v6981_v51 = vrot.slane %v6473_v22, 7 }
 0xf48   :  { %v6975_v49 = vrot.slane %v6473_v22, 1  ;;  %v6973_v36 = vrot.slane %v6473_v22, 3  ;;  %v6974_v12 = vrot.slane %v6473_v22, 2 }
 0xf49   :  { %v2976_v38 = vmul.f32 %v6439_v10, %v2956_v21  ;;  %v6557_v10 = vperm.slane %v2838_v45, 6 }
 0xf4c   :  { %v6475_v47 = vpop.permute.xlu1 %2940 }
 0xf55   :  { %v6545_v9 = vpop.permute.xlu1 %3007 }
 0xf6f   :  { %v2829_v32 = vpop.permute.xlu2 %2828 }
 0xf70   :  { %v6480_v18 = vmul.f32 %v2829_v32, %v6417_v34 }
 0xf72   :  { %v2842_v34 = vrot.slane %v6480_v18, 5  ;;  %v2882_v41 = vrot.slane %v6480_v18, 6  ;;  %v6977_v46 = vrot.slane %v6480_v18, 7  ;;  %v6980_v21 = vrot.slane %v6480_v18, 1 }
 0xf73   :  { %v2825_v5 = vpop.permute.xlu0 %2824 }
 0xf74   :  { %v6506_v60 = vmul.f32 %v2825_v5, %v6394_v26  ;;  %v2849_v43 = vsel %vm2845_vm13, %v2842_v34, %v2839_v7  ;;  %v2887_v8 = vsel %vm2883_vm14, %v2882_v41, %v2879_v37  ;;  %v2925_v2 = vsel %vm2921_vm4, %v6977_v46, %v6981_v51 }
 0xf75   :  { %v2851_v11 = vmul.f32 %v6489_v3, %v2849_v43  ;;  %v2889_v35 = vmul.f32 %v6492_v28, %v2887_v8  ;;  %v6561_v5 = vperm.slane %v2838_v45, 7 }
 0xf76   :  { %v2840_v26 = vrot.slane %v6506_v60, 5  ;;  %v2880_v59 = vrot.slane %v6506_v60, 6  ;;  %v6978_v48 = vrot.slane %v6506_v60, 1  ;;  %v3023_v23 = vrot.slane %v6506_v60, 2 }
 0xf77   :  { %v6536_v24 = vpop.permute.xlu2 %3079  ;;  %v2871_v42 = vmul.f32 %v2857_v54, %v2851_v11  ;;  %v2909_v56 = vmul.f32 %v6433_v14, %v2889_v35  ;;  %v6549_v54 = vperm.slane %v2838_v45, 5  ;;  %v2927_v14 = vmul.f32 %v6519_v62, %v2925_v2 }
 0xf78   :  { %v2848_v19 = vsel %vm2845_vm13, %v2839_v7, %v2840_v26  ;;  %v2886_v29 = vsel %vm2883_vm14, %v2879_v37, %v2880_v59  ;;  %v6976_v40 = vrot.slane %v6506_v60, 3  ;;  %v3025_v7 = vrot.slane %v6480_v18, 2 }
 0xf79   :  { %v2913_v17 = vadd.f32 %v2909_v56, %v2871_v42  ;;  %v3063_v37 = vrot.slane %v6480_v18, 3  ;;  %v2991_v8 = vsel %vm2988_vm15, %v6975_v49, %v6978_v48  ;;  %v2852_v11 = vmul.f32 %v6489_v3, %v2848_v19 }
 0xf7a   :  { %v2890_v45 = vmul.f32 %v6492_v28, %v2886_v29  ;;  %v2947_v35 = vmul.f32 %v6437_v4, %v2927_v14  ;;  %v2918_v58 = vrot.slane %v6506_v60, 7  ;;  %v3067_v19 = vsel %vm3064_vm2, %v6973_v36, %v6976_v40  ;;  %v3185_v36 = vld [vmem:[%s6935_s3 + $0x72] sm:$0xff] }
 0xf7b   :  { %v2827_v32 = vpop.permute.xlu0 %2826  ;;  %v3029_v4 = vsel %vm3026_vm0, %v6974_v12, %v3023_v23  ;;  %v2994_v14 = vmul.f32 %v6541_v27, %v2991_v8  ;;  %v3184_v12 = vld [vmem:[%s6935_s3 + $0x6a] sm:$0xff]  ;;  %v2872_v8 = vmul.f32 %v6445_v1, %v2852_v11  ;;  %3218 = vmatpush.msra.mxu0 %v3185_v36  ;;  %v3070_v48 = vmul.f32 %v6557_v10, %v3067_v19  ;;  %v2907_v11 = vpop.permute.xlu1 %2906 }
 0xf7c   :  { %v6565_v43 = vmul.f32 %v2827_v32, %v6401_v13  ;;  %v2951_v56 = vadd.f32 %v2947_v35, %v2913_v17  ;;  %v2910_v49 = vmul.f32 %v6449_v44, %v2890_v45  ;;  %v3032_v1 = vmul.f32 %v6549_v54, %v3029_v4  ;;  %v3183_v44 = vld [vmem:[%s6935_s3 + $0x62] sm:$0xff] }
 0xf7d   :  { %3219 = vmatpush.msra.mxu0 %v3184_v12 }
 0xf7e   :  { %v2841_v13 = vrot.slane %v6565_v43, 5  ;;  %v2881_v2 = vrot.slane %v6565_v43, 6  ;;  %v6979_v30 = vrot.slane %v6565_v43, 7  ;;  %v2986_v42 = vrot.slane %v6565_v43, 1 }
 0xf7f   :  { %v3024_v35 = vrot.slane %v6565_v43, 2  ;;  %3220 = vmatpush.msra.mxu0 %v3183_v44 }
 0xf80   :  { %v6594_v29 = vpop.permute.xlu2 %2868  ;;  %v2847_v32 = vsel %vm2845_vm13, %v2840_v26, %v2841_v13  ;;  %v2885_v17 = vsel %vm2883_vm14, %v2880_v59, %v2881_v2  ;;  %v2923_v59 = vsel %vm2921_vm4, %v2918_v58, %v6979_v30  ;;  %v2989_v46 = vsel %vm2988_vm15, %v2986_v42, %v6980_v21 }
 0xf81   :  { %v2853_v40 = vmul.f32 %v6489_v3, %v2847_v32  ;;  %v2891_v26 = vmul.f32 %v6492_v28, %v2885_v17  ;;  %v2929_v45 = vmul.f32 %v6519_v62, %v2923_v59  ;;  %v3062_v17 = vrot.slane %v6565_v43, 3 }
 0xf82   :  { %v2980_v30 = vadd.f32 %v2976_v38, %v2951_v56  ;;  %v2958_v21 = vmul.f32 %v6477_v53, %v6565_v43  ;;  %v2996_v4 = vmul.f32 %v6541_v27, %v2989_v46  ;;  %v3027_v51 = vsel %vm3026_vm0, %v3024_v35, %v3025_v7 }
 0xf83   :  { %v2873_v36 = vmul.f32 %v6465_v16, %v2853_v40  ;;  %v2970_v32 = vpop.permute.xlu0 %2969  ;;  %v2911_v19 = vmul.f32 %v6461_v39, %v2891_v26  ;;  %v3014_v16 = vmul.f32 %v6443_v50, %v2994_v14  ;;  %v2846_v38 = vsel %vm2845_vm13, %v2841_v13, %v2842_v34 }
 0xf84   :  { %v2884_v12 = vsel %vm2883_vm14, %v2881_v2, %v2882_v41  ;;  %v2914_v39 = vadd.f32 %v2910_v49, %v2872_v8  ;;  %v2949_v40 = vmul.f32 %v6475_v47, %v2929_v45  ;;  %v2978_v56 = vmul.f32 %v2970_v32, %v2958_v21 }
 0xf85   :  { %v2915_v46 = vadd.f32 %v2911_v19, %v2873_v36  ;;  %v3028_v26 = vsel %vm3026_vm0, %v3023_v23, %v3024_v35  ;;  %v3034_v50 = vmul.f32 %v6549_v54, %v3027_v51  ;;  %v3065_v34 = vsel %vm3064_vm2, %v3062_v17, %v3063_v37 }
 0xf86   :  { %v3018_v13 = vadd.f32 %v3014_v16, %v2980_v30  ;;  %v3052_v14 = vmul.f32 %v6457_v15, %v3032_v1  ;;  %v3016_v49 = vmul.f32 %v6545_v9, %v2996_v4  ;;  %v3090_v2 = vmul.f32 %v6453_v61, %v3070_v48 }
 0xf87   :  { %v2953_v41 = vadd.f32 %v2949_v40, %v2915_v46  ;;  %v7104_v47 = vrot.slane %v6473_v22, 7  ;;  %v2957_v8 = vmul.f32 %v6477_v53, %v6506_v60  ;;  %v7105_v30 = vrot.slane %v6506_v60, 1 }
 0xf88   :  { %v3056_v51 = vadd.f32 %v3052_v14, %v3018_v13  ;;  %v3072_v61 = vmul.f32 %v6557_v10, %v3065_v34  ;;  %v2892_v1 = vmul.f32 %v6492_v28, %v2884_v12  ;;  %v3033_v32 = vmul.f32 %v6549_v54, %v3028_v26 }
 0xf89   :  { %v2924_v23 = vsel %vm2921_vm4, %v7104_v47, %v2918_v58  ;;  %v3046_v21 = vpop.permute.xlu2 %3045  ;;  %v2990_v15 = vsel %vm2988_vm15, %v7105_v30, %v2986_v42  ;;  %v2982_v9 = vadd.f32 %v2978_v56, %v2953_v41  ;;  %v2854_v58 = vmul.f32 %v6489_v3, %v2846_v38  ;;  %v3084_v38 = vpop.permute.xlu1 %3083 }
 0xf8a   :  { %v2928_v35 = vmul.f32 %v6519_v62, %v2924_v23  ;;  %v3054_v59 = vmul.f32 %v3046_v21, %v3034_v50  ;;  %v2995_v48 = vmul.f32 %v6541_v27, %v2990_v15  ;;  %v3094_v44 = vadd.f32 %v3090_v2, %v3056_v51 }
 0xf8b   :  { %v3020_v45 = vadd.f32 %v3016_v49, %v2982_v9  ;;  %v7106_v19 = vrot.slane %v6480_v18, 7  ;;  %v7107_v42 = vrot.slane %v6565_v43, 7  ;;  %v7108_v16 = vrot.slane %v6506_v60, 3 }
 0xf8c   :  { %v2948_v36 = vmul.f32 %v6451_v6, %v2928_v35  ;;  %v6683_v28 = vadd.f32 %v6561_v5, %v3094_v44  ;;  %v2977_v12 = vmul.f32 %v6455_v52, %v2957_v8  ;;  %v3015_v46 = vmul.f32 %v6459_v57, %v2995_v48  ;;  %v2945_v43 = vpop.permute.xlu0 %2944 }
 0xf8d   :  { %v2922_v4 = vsel %vm2921_vm4, %v7107_v42, %v7106_v19  ;;  %v3066_v3 = vsel %vm3064_vm2, %v7108_v16, %v3062_v17  ;;  %v3058_v40 = vadd.f32 %v3054_v59, %v3020_v45  ;;  %v3092_v56 = vmul.f32 %v3084_v38, %v3072_v61 }
 0xf8e   :  { %v2952_v6 = vadd.f32 %v2948_v36, %v2914_v39  ;;  %v3834_v26 = vmul.f32 -1.442695, %v6683_v28  ;;  %v3071_v60 = vmul.f32 %v6557_v10, %v3066_v3  ;;  %v2874_v34 = vmul.f32 %v6594_v29, %v2854_v58 }
 0xf8f   :  { %v2912_v17 = vmul.f32 %v2907_v11, %v2892_v1  ;;  %v3096_v13 = vadd.f32 %v3092_v56, %v3058_v40  ;;  %v2930_v14 = vmul.f32 %v6519_v62, %v2922_v4  ;;  %v3053_v52 = vmul.f32 %v6463_v33, %v3033_v32 }
 0xf90   :  { %v2981_v50 = vadd.f32 %v2977_v12, %v2952_v6  ;;  %4114 = vpow2.f32 %v3834_v26  ;;  %v2959_v57 = vmul.f32 %v6477_v53, %v6480_v18  ;;  %v7109_v47 = vrot.slane %v6473_v22, 1 }
 0xf91   :  { %v2950_v41 = vmul.f32 %v2945_v43, %v2930_v14  ;;  %v6695_v2 = vadd.f32 %v6561_v5, %v3096_v13  ;;  %v7110_v29 = vrot.slane %v6480_v18, 1  ;;  %v3091_v23 = vmul.f32 %v6536_v24, %v3071_v60  ;;  %v3012_v15 = vpop.permute.xlu1 %3011 }
 0xf92   :  { %v3019_v39 = vadd.f32 %v3015_v46, %v2981_v50  ;;  %v2974_v49 = vpop.permute.xlu2 %2973  ;;  %v2916_v21 = vadd.f32 %v2912_v17, %v2874_v34  ;;  %v7111_v9 = vrot.slane %v6473_v22, 2  ;;  %v7112_v58 = vrot.slane %v6473_v22, 3 }
 0xf93   :  { %v2992_v11 = vsel %vm2988_vm15, %v7110_v29, %v7109_v47  ;;  %v2979_v33 = vmul.f32 %v2974_v49, %v2959_v57  ;;  %v3836_v51 = vmul.f32 -1.442695, %v6695_v2  ;;  %vm7114_vm15 = vmmov %vm7113_vm8 }
 0xf94   :  { %v3057_v62 = vadd.f32 %v3053_v52, %v3019_v39  ;;  %v2997_v53 = vmul.f32 %v6541_v27, %v2992_v11  ;;  %v2954_v8 = vadd.f32 %v2950_v41, %v2916_v21  ;;  %v3030_v59 = vsel %vm3026_vm0, %v3025_v7, %v7111_v9 }
 0xf95   :  { %4116 = vpow2.f32 %v3836_v51  ;;  %v3068_v27 = vsel %vm3064_vm2, %v3063_v37, %v7112_v58  ;;  %v3035_v36 = vmul.f32 %v6549_v54, %v3030_v59  ;;  %v3088_v45 = vpop.permute.xlu0 %3087 }
 0xf96   :  { %v3095_v35 = vadd.f32 %v3091_v23, %v3057_v62  ;;  %v4115_v30 = vpop.eup %4114  ;;  %v2983_v61 = vadd.f32 %v2979_v33, %v2954_v8  ;;  %v3017_v44 = vmul.f32 %v3012_v15, %v2997_v53  ;;  %v3073_v19 = vmul.f32 %v6557_v10, %v3068_v27 }
 0xf97   :  { %v3115_v48 = vadd.f32 1.0, %v4115_v30 }
 0xf98   :  { %v6713_v24 = vadd.f32 %v6561_v5, %v3095_v35  ;;  %v3021_v42 = vadd.f32 %v3017_v44, %v2983_v61  ;;  %v3093_v16 = vmul.f32 %v3088_v45, %v3073_v19 }
 0xf99   :  { %4118 = vrcp.f32 %v3115_v48  ;;  %v3130_v46 = vand.u32 2147483648, %v3115_v48  ;;  %v3128_v10 = vand.u32 2147483647, %v3115_v48  ;;  %vm3124_vm5 = vweird.f32 %v3115_v48 }
 0xf9a   :  { %v3835_v1 = vmul.f32 -1.442695, %v6713_v24 }
 0xf9b   :  { %v3050_v7 = vpop.permute.xlu2 %3049  ;;  %v4117_v32 = vpop.eup %4116  ;;  %v3131_v60 = vor.u32 1.1754944e-38, %v3130_v46  ;;  %vm3129_vm7 = vcmp.eq.f32.partialorder %v3128_v10, 8.507059e+37 }
 0xf9c   :  { %4120 = vpow2.f32 %v3835_v1  ;;  %v3055_v4 = vmul.f32 %v3050_v7, %v3035_v36  ;;  %v3117_v22 = vadd.f32 1.0, %v4117_v32  ;;  %v3984_v32 = vld [vmem:[%s6935_s3 + $0xa2] ss:$0 sm:$0xff] }
 0xf9e   :  { %v3059_v18 = vadd.f32 %v3055_v4, %v3021_v42  ;;  %4122 = vrcp.f32 %v3117_v22  ;;  %v3160_v51 = vand.u32 2147483648, %v3117_v22  ;;  %vm3154_vm14 = vweird.f32 %v3117_v22 }
 0xf9f   :  { %v4119_v55 = vpop.eup %4118  ;;  %v3158_v53 = vand.u32 2147483647, %v3117_v22 }
 0xfa0   :  { %v3097_v37 = vadd.f32 %v3093_v16, %v3059_v18  ;;  %v3120_v38 = vmul.f32 %v4119_v55, %v3115_v48  ;;  %vm3125_vm3 = vweird.f32 %v4119_v55  ;;  %v3161_v9 = vor.u32 1.1754944e-38, %v3160_v51 }
 0xfa1   :  { %vm3126_vm6 = vmor %vm3124_vm5, %vm3125_vm3  ;;  %vm3159_vm0 = vcmp.eq.f32.partialorder %v3158_v53, 8.507059e+37 }
 0xfa2   :  { %v4121_v3 = vpop.eup %4120  ;;  %v6725_v54 = vadd.f32 %v6561_v5, %v3097_v37  ;;  %v3121_v12 = vsub.f32 1.0, %v3120_v38 }
 0xfa3   :  { %v3116_v6 = vadd.f32 1.0, %v4121_v3 }
 0xfa4   :  { %v4123_v40 = vpop.eup %4122  ;;  %v3122_v56 = vmul.f32 %v4119_v55, %v3121_v12  ;;  %v3837_v43 = vmul.f32 -1.442695, %v6725_v54 }
 0xfa5   :  { %4124 = vrcp.f32 %v3116_v6  ;;  %v3150_v50 = vmul.f32 %v4123_v40, %v3117_v22  ;;  %v3145_v57 = vand.u32 2147483648, %v3116_v6  ;;  %v3143_v29 = vand.u32 2147483647, %v3116_v6 }
 0xfa6   :  { %v3123_v26 = vadd.f32 %v4119_v55, %v3122_v56  ;;  %4126 = vpow2.f32 %v3837_v43  ;;  %vm3139_vm10 = vweird.f32 %v3116_v6  ;;  %vm3155_vm13 = vweird.f32 %v4123_v40 }
 0xfa7   :  { %v3151_v39 = vsub.f32 1.0, %v3150_v50  ;;  %v3146_v23 = vor.u32 1.1754944e-38, %v3145_v57  ;;  %vm3144_vm12 = vcmp.eq.f32.partialorder %v3143_v29, 8.507059e+37  ;;  %vm3156_vm4 = vmor %vm3154_vm14, %vm3155_vm13 }
 0xfa8   :  { %v3127_v34 = vsel %vm3126_vm6, %v4119_v55, %v3123_v26  ;;  %vm7115_vm6 = vmmov %vm7113_vm8 }
 0xfa9   :  { %v3132_v5 = vsel %vm3129_vm7, %v3131_v60, %v3127_v34  ;;  %v3152_v11 = vmul.f32 %v4123_v40, %v3151_v39 }
 0xfaa   :  { %v3179_v13 = vmul.f32 %v3132_v5, %v6683_v28 }
 0xfab   :  { %v4125_v17 = vpop.eup %4124  ;;  %v3153_v28 = vadd.f32 %v4123_v40, %v3152_v11  ;;  %v3340_v11 = vld [vmem:[%s6934_s2 + $0x31] sm:$0xff] }
 0xfac   :  { %v3135_v14 = vmul.f32 %v4125_v17, %v3116_v6  ;;  %v4127_v52 = vpop.eup %4126  ;;  %3838 = vmatmul.msk.f32.vlgmr.msra.gmra.mxu0 %vm7113_vm8, %v3179_v13  ;;  %vm3140_vm9 = vweird.f32 %v4125_v17  ;;  %vm7116_vm8 = vmmov %vm7115_vm6 }
 0xfad   :  { %v3118_v49 = vadd.f32 1.0, %v4127_v52  ;;  %vm3141_vm11 = vmor %vm3139_vm10, %vm3140_vm9  ;;  %v3157_v30 = vsel %vm3156_vm4, %v4123_v40, %v3153_v28  ;;  %v3338_v28 = vld [vmem:[%s6934_s2 + $0x21] sm:$0xff] }
 0xfae   :  { %v3136_v41 = vsub.f32 1.0, %v3135_v14  ;;  %v3162_v61 = vsel %vm3159_vm0, %v3161_v9, %v3157_v30 }
 0xfaf   :  { %4128 = vrcp.f32 %v3118_v49  ;;  %v3175_v48 = vand.u32 2147483648, %v3118_v49  ;;  %v3173_v27 = vand.u32 2147483647, %v3118_v49  ;;  %v3181_v1 = vmul.f32 %v3162_v61, %v6695_v2 }
 0xfb0   :  { %v3137_v47 = vmul.f32 %v4125_v17, %v3136_v41  ;;  %vm3169_vm3 = vweird.f32 %v3118_v49 }
 0xfb1   :  { %vm3174_vm7 = vcmp.eq.f32.partialorder %v3173_v27, 8.507059e+37  ;;  %v3985_v27 = vld [vmem:[%s6933_s1 + $0x2f] ss:$0 sm:$0xff] }
 0xfb2   :  { %v3138_v62 = vadd.f32 %v4125_v17, %v3137_v47  ;;  %v3341_v47 = vld [vmem:[%s6934_s2 + $0x39] sm:$0xff] }
 0xfb3   :  { %3368 = vmatpush.msrb.mxu2 %v3341_v47 }
 0xfb4   :  { %v3142_v21 = vsel %vm3141_vm11, %v4125_v17, %v3138_v62 }
 0xfb5   :  { %v3147_v33 = vsel %vm3144_vm12, %v3146_v23, %v3142_v21  ;;  %v4129_v8 = vpop.eup %4128  ;;  %3369 = vmatpush.msrb.mxu2 %v3340_v11  ;;  %v3339_v21 = vld [vmem:[%s6934_s2 + $0x29] sm:$0xff]  ;;  %v3471_v11 = vld [vmem:[%s6935_s3 + $0xd3] sm:$0xff] }
 0xfb6   :  { %v3180_v35 = vmul.f32 %v3147_v33, %v6713_v24  ;;  %v3165_v15 = vmul.f32 %v4129_v8, %v3118_v49  ;;  %vm3170_vm2 = vweird.f32 %v4129_v8  ;;  %v3176_v24 = vor.u32 1.1754944e-38, %v3175_v48 }
 0xfb7   :  { %vm3171_vm5 = vmor %vm3169_vm3, %vm3170_vm2  ;;  %3370 = vmatpush.msrb.mxu2 %v3339_v21  ;;  %v3469_v21 = vld [vmem:[%s6935_s3 + $0xc3] sm:$0xff] }
 0xfb8   :  { %3839 = vmatmul.msk.f32.gmra.mxu0 %vm7114_vm15, %v3180_v35  ;;  %v3166_v59 = vsub.f32 1.0, %v3165_v15 }
 0xfb9   :  { %3371 = vmatpush.msrb.mxu2 %v3338_v28 }
 0xfba   :  { %v3167_v58 = vmul.f32 %v4129_v8, %v3166_v59 }
 0xfbc   :  { %v3168_v44 = vadd.f32 %v4129_v8, %v3167_v58 }
 0xfbe   :  { %v3172_v36 = vsel %vm3171_vm5, %v4129_v8, %v3168_v44 }
 0xfbf   :  { %v3177_v45 = vsel %vm3174_vm7, %v3176_v24, %v3172_v36 }
 0xfc0   :  { %3840 = vmatmul.msk.f32.gmra.mxu0 %vm7115_vm6, %v3181_v1  ;;  %v3182_v7 = vmul.f32 %v3177_v45, %v6725_v54  ;;  %v3986_v45 = vld [vmem:[%s6933_s1 + $0x30] ss:$0 sm:$0xff] }
 0xfc8   :  { %3841 = vmatmul.msk.f32.gmra.mxu0 %vm7116_vm8, %v3182_v7 }
0x1029   :  { %v3222_v19 = vpop.f32.mrf.mxu0 }
0x102a   :  { %v3223_v42 = vadd.f32 %v3984_v32, %v3222_v19 }
0x102c   :  { %v6740_v2 = vadd.f32 %v3223_v42, %v6255_v31 }
0x102e   :  { %v3240_v4 = vsel %vm98_vm1, %v6740_v2, 0.0 }
0x102f   :  { %3241 = vadd.xlane.f32.xlu1 %v3240_v4 }
0x1035   :  { %v3225_v22 = vpop.f32.mrf.mxu0 }
0x1036   :  { %v3226_v16 = vadd.f32 %v3984_v32, %v3225_v22 }
0x1038   :  { %v6745_v18 = vadd.f32 %v3226_v16, %v6260_v63 }
0x103a   :  { %v3243_v55 = vsel %vm98_vm1, %v6745_v18, 0.0 }
0x103b   :  { %3244 = vadd.xlane.f32.xlu2 %v3243_v55 }
0x103d   :  { %v3228_v37 = vpop.f32.mrf.mxu0 }
0x103e   :  { %v3229_v3 = vadd.f32 %v3984_v32, %v3228_v37 }
0x1040   :  { %v6750_v38 = vadd.f32 %v3229_v3, %v6265_v25 }
0x1042   :  { %v3246_v31 = vsel %vm98_vm1, %v6750_v38, 0.0 }
0x1043   :  { %3247 = vadd.xlane.f32.xlu0 %v3246_v31 }
0x1045   :  { %v3231_v6 = vpop.f32.mrf.mxu0 }
0x1046   :  { %v3232_v54 = vadd.f32 %v3984_v32, %v3231_v6 }
0x1048   :  { %v6755_v12 = vadd.f32 %v3232_v54, %v6270_v20 }
0x104a   :  { %v3249_v63 = vsel %vm98_vm1, %v6755_v12, 0.0 }
0x104b   :  { %3250 = vadd.xlane.f32.xlu1 %v3249_v63 }
0x10a2   :  { %v3242_v46 = vpop.xlane.xlu1 %3241 }
0x10a3   :  { %v3252_v40 = vmul.f32 %v3242_v46, %v7103_v0 }
0x10a5   :  { %v3256_v56 = vsub.f32 %v6740_v2, %v3252_v40 }
0x10a7   :  { %v3260_v25 = vmul.f32 %v3256_v56, %v3256_v56 }
0x10a9   :  { %v3264_v10 = vsel %vm98_vm1, %v3260_v25, 0.0 }
0x10aa   :  { %3265 = vadd.xlane.f32.xlu2 %v3264_v10 }
0x10ae   :  { %v3245_v43 = vpop.xlane.xlu2 %3244 }
0x10af   :  { %v3253_v26 = vmul.f32 %v3245_v43, %v7103_v0 }
0x10b1   :  { %v6764_v50 = vsub.f32 %v6745_v18, %v3253_v26 }
0x10b3   :  { %v3261_v20 = vmul.f32 %v6764_v50, %v6764_v50 }
0x10b5   :  { %v3267_v60 = vsel %vm98_vm1, %v3261_v20, 0.0 }
0x10b6   :  { %v3248_v34 = vpop.xlane.xlu0 %3247  ;;  %3268 = vadd.xlane.f32.xlu1 %v3267_v60 }
0x10b7   :  { %v3254_v17 = vmul.f32 %v3248_v34, %v7103_v0 }
0x10b9   :  { %v6771_v5 = vsub.f32 %v6750_v38, %v3254_v17 }
0x10bb   :  { %v3262_v13 = vmul.f32 %v6771_v5, %v6771_v5 }
0x10bd   :  { %v3270_v14 = vsel %vm98_vm1, %v3262_v13, 0.0 }
0x10be   :  { %3271 = vadd.xlane.f32.xlu2 %v3270_v14  ;;  %v3251_v39 = vpop.xlane.xlu1 %3250 }
0x10bf   :  { %v3255_v52 = vmul.f32 %v3251_v39, %v7103_v0 }
0x10c1   :  { %v6778_v41 = vsub.f32 %v6755_v12, %v3255_v52 }
0x10c3   :  { %v3263_v57 = vmul.f32 %v6778_v41, %v6778_v41 }
0x10c5   :  { %v3273_v49 = vsel %vm98_vm1, %v3263_v57, 0.0 }
0x10c6   :  { %3274 = vadd.xlane.f32.xlu0 %v3273_v49 }
0x111d   :  { %v3266_v29 = vpop.xlane.xlu2 %3265 }
0x111e   :  { %v3276_v62 = vmul.f32 %v3266_v29, %v7103_v0  ;;  %v3987_v29 = vld [vmem:[%s6934_s2 + $0x41] ss:$0 sm:$0xff] }
0x1120   :  { %v3280_v23 = vadd.f32 1e-05, %v3276_v62 }
0x1122   :  { %4130 = vrsqrt.f32 %v3280_v23  ;;  %vm3290_vm10 = vweird.f32 %v3280_v23 }
0x1128   :  { %v4131_v51 = vpop.eup %4130 }
0x1129   :  { %v3269_v33 = vpop.xlane.xlu1 %3268  ;;  %v3285_v53 = vmul.f32 %v4131_v51, %v3280_v23  ;;  %vm3291_vm9 = vweird.f32 %v4131_v51 }
0x112a   :  { %v3277_v35 = vmul.f32 %v3269_v33, %v7103_v0  ;;  %vm3292_vm11 = vmor %vm3290_vm10, %vm3291_vm9  ;;  %v3468_v33 = vld [vmem:[%s6935_s3 + $0xbb] sm:$0xff]  ;;  %vm7117_vm10 = vcmask 523264  }
0x112b   :  { %v3286_v30 = vmul.f32 %v4131_v51, %v3285_v53  ;;  %v3465_v53 = vld [vmem:[%s6935_s3 + $0xa3] sm:$0xff] }
0x112c   :  { %v3281_v8 = vadd.f32 1e-05, %v3277_v35  ;;  %v3466_v35 = vld [vmem:[%s6935_s3 + $0xab] sm:$0xff] }
0x112d   :  { %v3287_v15 = vmul.f32 0.5, %v3286_v30 }
0x112e   :  { %4132 = vrsqrt.f32 %v3281_v8  ;;  %vm3300_vm13 = vweird.f32 %v3281_v8 }
0x112f   :  { %v3288_v9 = vsub.f32 1.5, %v3287_v15 }
0x1131   :  { %v3272_v59 = vpop.xlane.xlu2 %3271  ;;  %v3289_v48 = vmul.f32 %v4131_v51, %v3288_v9 }
0x1132   :  { %v3278_v61 = vmul.f32 %v3272_v59, %v7103_v0 }
0x1133   :  { %v3293_v44 = vsel %vm3292_vm11, %v4131_v51, %v3289_v48  ;;  %v3467_v51 = vld [vmem:[%s6935_s3 + $0xb3] sm:$0xff] }
0x1134   :  { %v4133_v58 = vpop.eup %4132  ;;  %v3282_v1 = vadd.f32 1e-05, %v3278_v61  ;;  %v3324_v36 = vmul.f32 %v3293_v44, %v3256_v56 }
0x1135   :  { %v3295_v24 = vmul.f32 %v4133_v58, %v3281_v8  ;;  %vm3301_vm12 = vweird.f32 %v4133_v58 }
0x1136   :  { %4134 = vrsqrt.f32 %v3282_v1  ;;  %v3329_v32 = vmul.f32 %v3985_v27, %v3324_v36  ;;  %vm3302_vm14 = vmor %vm3300_vm13, %vm3301_vm12  ;;  %vm3310_vm15 = vweird.f32 %v3282_v1 }
0x1137   :  { %v3296_v7 = vmul.f32 %v4133_v58, %v3295_v24 }
0x1138   :  { %v3334_v4 = vadd.f32 %v3986_v45, %v3329_v32 }
0x1139   :  { %v3297_v19 = vmul.f32 0.5, %v3296_v7  ;;  %v3275_v42 = vpop.xlane.xlu0 %3274 }
0x113a   :  { %v3279_v22 = vmul.f32 %v3275_v42, %v7103_v0  ;;  %3842 = vmatmul.msk.f32.vlgmr.msrb.gmra.mxu2 %vm98_vm1, %v3334_v4 }
0x113b   :  { %v3298_v16 = vsub.f32 1.5, %v3297_v19 }
0x113c   :  { %v4135_v55 = vpop.eup %4134  ;;  %v3283_v37 = vadd.f32 1e-05, %v3279_v22 }
0x113d   :  { %v3299_v3 = vmul.f32 %v4133_v58, %v3298_v16  ;;  %v3305_v31 = vmul.f32 %v4135_v55, %v3282_v1  ;;  %vm3311_vm4 = vweird.f32 %v4135_v55 }
0x113e   :  { %4136 = vrsqrt.f32 %v3283_v37  ;;  %vm3312_vm0 = vmor %vm3310_vm15, %vm3311_vm4  ;;  %vm3320_vm3 = vweird.f32 %v3283_v37 }
0x113f   :  { %v3303_v6 = vsel %vm3302_vm14, %v4133_v58, %v3299_v3  ;;  %v3306_v54 = vmul.f32 %v4135_v55, %v3305_v31  ;;  %vm7118_vm15 = vmmov %vm7117_vm10 }
0x1140   :  { %v3325_v63 = vmul.f32 %v3303_v6, %v6764_v50 }
0x1141   :  { %v3307_v46 = vmul.f32 0.5, %v3306_v54 }
0x1142   :  { %v3330_v40 = vmul.f32 %v3985_v27, %v3325_v63 }
0x1143   :  { %v3308_v56 = vsub.f32 1.5, %v3307_v46 }
0x1144   :  { %v4137_v25 = vpop.eup %4136  ;;  %v3335_v10 = vadd.f32 %v3986_v45, %v3330_v40 }
0x1145   :  { %v3309_v43 = vmul.f32 %v4135_v55, %v3308_v56  ;;  %v3315_v26 = vmul.f32 %v4137_v25, %v3283_v37  ;;  %vm3321_vm2 = vweird.f32 %v4137_v25 }
0x1146   :  { %3843 = vmatmul.msk.f32.gmra.mxu2 %vm98_vm1, %v3335_v10  ;;  %vm3322_vm5 = vmor %vm3320_vm3, %vm3321_vm2 }
0x1147   :  { %v3313_v20 = vsel %vm3312_vm0, %v4135_v55, %v3309_v43  ;;  %v3316_v60 = vmul.f32 %v4137_v25, %v3315_v26 }
0x1148   :  { %v3326_v34 = vmul.f32 %v3313_v20, %v6771_v5  ;;  %v3472_v5 = vld [vmem:[%s6935_s3 + $0xdb] sm:$0xff] }
0x1149   :  { %v3317_v17 = vmul.f32 0.5, %v3316_v60  ;;  %3495 = vmatpush.msrb.mxu1 %v3472_v5 }
0x114a   :  { %v3331_v13 = vmul.f32 %v3985_v27, %v3326_v34 }
0x114b   :  { %v3318_v14 = vsub.f32 1.5, %v3317_v17  ;;  %3496 = vmatpush.msrb.mxu1 %v3471_v11 }
0x114c   :  { %v3336_v50 = vadd.f32 %v3986_v45, %v3331_v13 }
0x114d   :  { %v3319_v39 = vmul.f32 %v4137_v25, %v3318_v14 }
0x114e   :  { %3844 = vmatmul.msk.f32.gmra.mxu2 %vm98_vm1, %v3336_v50 }
0x114f   :  { %v3323_v52 = vsel %vm3322_vm5, %v4137_v25, %v3319_v39 }
0x1150   :  { %v3327_v57 = vmul.f32 %v3323_v52, %v6778_v41  ;;  %v3470_v41 = vld [vmem:[%s6935_s3 + $0xcb] sm:$0xff] }
0x1151   :  { %3497 = vmatpush.msrb.mxu1 %v3470_v41 }
0x1152   :  { %v3332_v49 = vmul.f32 %v3985_v27, %v3327_v57 }
0x1153   :  { %3498 = vmatpush.msrb.mxu1 %v3469_v21 }
0x1154   :  { %v3337_v47 = vadd.f32 %v3986_v45, %v3332_v49 }
0x1155   :  { %3499 = vmatpush.msrb.mxu1 %v3468_v33 }
0x1156   :  { %3845 = vmatmul.msk.f32.gmra.mxu2 %vm98_vm1, %v3337_v47 }
0x1157   :  { %3500 = vmatpush.msrb.mxu1 %v3467_v51 }
0x1159   :  { %3501 = vmatpush.msrb.mxu1 %v3466_v35 }
0x115b   :  { %3502 = vmatpush.msrb.mxu1 %v3465_v53 }
0x11bd   :  { %v3373_v62 = vpop.f32.mrf.mxu2 }
0x11be   :  { %v3374_v23 = vadd.f32 %v3987_v29, %v3373_v62 }
0x11c0   :  { %v3846_v28 = vmul.f32 -1.442695, %v3374_v23 }
0x11c2   :  { %4138 = vpow2.f32 %v3846_v28 }
0x11c8   :  { %v4139_v30 = vpop.eup %4138 }
0x11c9   :  { %v3376_v8 = vpop.f32.mrf.mxu2  ;;  %v3397_v9 = vadd.f32 1.0, %v4139_v30 }
0x11ca   :  { %v3377_v15 = vadd.f32 %v3987_v29, %v3376_v8 }
0x11cb   :  { %4140 = vrcp.f32 %v3397_v9  ;;  %v3412_v45 = vand.u32 2147483648, %v3397_v9  ;;  %v3410_v32 = vand.u32 2147483647, %v3397_v9  ;;  %vm3406_vm7 = vweird.f32 %v3397_v9 }
0x11cc   :  { %v3847_v59 = vmul.f32 -1.442695, %v3377_v15 }
0x11cd   :  { %v3413_v22 = vor.u32 1.1754944e-38, %v3412_v45  ;;  %vm3411_vm9 = vcmp.eq.f32.partialorder %v3410_v32, 8.507059e+37 }
0x11ce   :  { %4142 = vpow2.f32 %v3847_v59 }
0x11d1   :  { %v3379_v61 = vpop.f32.mrf.mxu2  ;;  %v4141_v58 = vpop.eup %4140 }
0x11d2   :  { %v6839_v48 = vadd.f32 %v3987_v29, %v3379_v61  ;;  %v3402_v1 = vmul.f32 %v4141_v58, %v3397_v9  ;;  %vm3407_vm6 = vweird.f32 %v4141_v58  ;;  %v3988_v9 = vld [vmem:[%s6935_s3 + $0xe3] ss:$0 sm:$0xff] }
0x11d3   :  { %vm3408_vm8 = vmor %vm3406_vm7, %vm3407_vm6 }
0x11d4   :  { %v4143_v27 = vpop.eup %4142  ;;  %v3848_v44 = vmul.f32 -1.442695, %v6839_v48  ;;  %v3403_v36 = vsub.f32 1.0, %v3402_v1  ;;  %vm7119_vm6 = vmmov %vm7117_vm10 }
0x11d5   :  { %v3398_v24 = vadd.f32 1.0, %v4143_v27 }
0x11d6   :  { %4144 = vpow2.f32 %v3848_v44  ;;  %v3404_v7 = vmul.f32 %v4141_v58, %v3403_v36 }
0x11d7   :  { %4146 = vrcp.f32 %v3398_v24  ;;  %v3427_v40 = vand.u32 2147483648, %v3398_v24  ;;  %v3425_v25 = vand.u32 2147483647, %v3398_v24  ;;  %vm3421_vm12 = vweird.f32 %v3398_v24 }
0x11d8   :  { %v3405_v42 = vadd.f32 %v4141_v58, %v3404_v7 }
0x11d9   :  { %v3382_v19 = vpop.f32.mrf.mxu2  ;;  %v3428_v20 = vor.u32 1.1754944e-38, %v3427_v40  ;;  %vm3426_vm14 = vcmp.eq.f32.partialorder %v3425_v25, 8.507059e+37 }
0x11da   :  { %v6842_v4 = vadd.f32 %v3987_v29, %v3382_v19  ;;  %v3409_v55 = vsel %vm3408_vm8, %v4141_v58, %v3405_v42 }
0x11db   :  { %v3414_v31 = vsel %vm3411_vm9, %v3413_v22, %v3409_v55  ;;  %v4171_v55 = vld [vmem:[%s6939_s7] sm:$0xff] }
0x11dc   :  { %v4145_v16 = vpop.eup %4144  ;;  %v3849_v37 = vmul.f32 -1.442695, %v6842_v4  ;;  %v3461_v54 = vmul.f32 %v3414_v31, %v3374_v23 }
0x11dd   :  { %v4147_v3 = vpop.eup %4146  ;;  %v3399_v6 = vadd.f32 1.0, %v4145_v16 }
0x11de   :  { %v3417_v63 = vmul.f32 %v4147_v3, %v3398_v24  ;;  %4148 = vpow2.f32 %v3849_v37  ;;  %3850 = vmatmul.msk.f32.vlgmr.msrb.gmra.mxu1 %vm7117_vm10, %v3461_v54  ;;  %vm3422_vm11 = vweird.f32 %v4147_v3  ;;  %vm7120_vm10 = vmmov %vm7119_vm6 }
0x11df   :  { %4150 = vrcp.f32 %v3399_v6  ;;  %vm3423_vm13 = vmor %vm3421_vm12, %vm3422_vm11  ;;  %v3442_v39 = vand.u32 2147483648, %v3399_v6  ;;  %v3440_v57 = vand.u32 2147483647, %v3399_v6  ;;  %vm3436_vm0 = vweird.f32 %v3399_v6 }
0x11e0   :  { %v3418_v46 = vsub.f32 1.0, %v3417_v63 }
0x11e1   :  { %v3443_v5 = vor.u32 1.1754944e-38, %v3442_v39  ;;  %vm3441_vm3 = vcmp.eq.f32.partialorder %v3440_v57, 8.507059e+37 }
0x11e2   :  { %v3419_v56 = vmul.f32 %v4147_v3, %v3418_v46 }
0x11e4   :  { %v4149_v10 = vpop.eup %4148  ;;  %v3420_v43 = vadd.f32 %v4147_v3, %v3419_v56 }
0x11e5   :  { %v4151_v26 = vpop.eup %4150  ;;  %v3400_v60 = vadd.f32 1.0, %v4149_v10 }
0x11e6   :  { %v3424_v34 = vsel %vm3423_vm13, %v4147_v3, %v3420_v43  ;;  %v3432_v17 = vmul.f32 %v4151_v26, %v3399_v6  ;;  %vm3437_vm4 = vweird.f32 %v4151_v26 }
0x11e7   :  { %v3429_v13 = vsel %vm3426_vm14, %v3428_v20, %v3424_v34  ;;  %4152 = vrcp.f32 %v3400_v60  ;;  %vm3438_vm2 = vmor %vm3436_vm0, %vm3437_vm4  ;;  %v3457_v21 = vand.u32 2147483648, %v3400_v60  ;;  %v3455_v33 = vand.u32 2147483647, %v3400_v60  ;;  %v4173_v34 = vld [vmem:[%s6939_s7 + $0x18] sm:$0xff] }
0x11e8   :  { %v3462_v14 = vmul.f32 %v3429_v13, %v3377_v15  ;;  %v3433_v50 = vsub.f32 1.0, %v3432_v17  ;;  %vm3451_vm7 = vweird.f32 %v3400_v60  ;;  %v4174_v17 = vld [vmem:[%s6939_s7 + $0x10] sm:$0xff] }
0x11e9   :  { %v3458_v35 = vor.u32 1.1754944e-38, %v3457_v21  ;;  %vm3456_vm9 = vcmp.eq.f32.partialorder %v3455_v33, 8.507059e+37 }
0x11ea   :  { %v3434_v52 = vmul.f32 %v4151_v26, %v3433_v50  ;;  %3851 = vmatmul.msk.f32.gmra.mxu1 %vm7118_vm15, %v3462_v14 }
0x11ec   :  { %v3435_v49 = vadd.f32 %v4151_v26, %v3434_v52 }
0x11ed   :  { %v4153_v47 = vpop.eup %4152 }
0x11ee   :  { %v3439_v29 = vsel %vm3438_vm2, %v4151_v26, %v3435_v49  ;;  %v3447_v11 = vmul.f32 %v4153_v47, %v3400_v60  ;;  %vm3452_vm5 = vweird.f32 %v4153_v47  ;;  %v4172_v60 = vld [vmem:[%s6939_s7 + $0x8] sm:$0xff] }
0x11ef   :  { %v3444_v41 = vsel %vm3441_vm3, %v3443_v5, %v3439_v29  ;;  %vm3453_vm8 = vmor %vm3451_vm7, %vm3452_vm5 }
0x11f0   :  { %v3463_v62 = vmul.f32 %v3444_v41, %v6839_v48  ;;  %v3448_v23 = vsub.f32 1.0, %v3447_v11 }
0x11f2   :  { %v3449_v28 = vmul.f32 %v4153_v47, %v3448_v23  ;;  %3852 = vmatmul.msk.f32.gmra.mxu1 %vm7119_vm6, %v3463_v62 }
0x11f4   :  { %v3450_v51 = vadd.f32 %v4153_v47, %v3449_v28 }
0x11f6   :  { %v3454_v53 = vsel %vm3453_vm8, %v4153_v47, %v3450_v51 }
0x11f7   :  { %v3459_v8 = vsel %vm3456_vm9, %v3458_v35, %v3454_v53 }
0x11f8   :  { %v3464_v30 = vmul.f32 %v3459_v8, %v6842_v4 }
0x11fa   :  { %3853 = vmatmul.msk.f32.gmra.mxu1 %vm7120_vm10, %v3464_v30 }
0x125b   :  { %v3504_v15 = vpop.f32.mrf.mxu1 }
0x125c   :  { %v3505_v19 = vadd.f32 %v3988_v9, %v3504_v15 }
0x125e   :  { %v3516_v22 = vmul.f32 0.5, %v3505_v19 }
0x1260   :  { %v3520_v16 = vadd.f32 %v3516_v22, %v6740_v2 }
0x1267   :  { %v3507_v59 = vpop.f32.mrf.mxu1 }
0x1268   :  { %v3508_v61 = vadd.f32 %v3988_v9, %v3507_v59 }
0x126a   :  { %v3517_v48 = vmul.f32 0.5, %v3508_v61 }
0x126c   :  { %v3521_v58 = vadd.f32 %v3517_v48, %v6745_v18 }
0x126e   :  { %v3529_v27 = vsel %vm98_vm1, %v3521_v58, 0.0 }
0x126f   :  { %v3510_v1 = vpop.f32.mrf.mxu1  ;;  %3530 = vadd.xlane.f32.xlu0 %v3529_v27 }
0x1270   :  { %v3511_v44 = vadd.f32 %v3988_v9, %v3510_v1 }
0x1272   :  { %v3518_v24 = vmul.f32 0.5, %v3511_v44 }
0x1274   :  { %v3522_v36 = vadd.f32 %v3518_v24, %v6750_v38  ;;  %v3526_v38 = vsel %vm98_vm1, %v3520_v16, 0.0 }
0x1276   :  { %v3532_v45 = vsel %vm98_vm1, %v3522_v36, 0.0 }
0x1277   :  { %3533 = vadd.xlane.f32.xlu2 %v3532_v45  ;;  %v3513_v7 = vpop.f32.mrf.mxu1 }
0x1278   :  { %v3514_v32 = vadd.f32 %v3988_v9, %v3513_v7 }
0x127a   :  { %v3519_v42 = vmul.f32 0.5, %v3514_v32 }
0x127c   :  { %v3523_v4 = vadd.f32 %v3519_v42, %v6755_v12 }
0x127e   :  { %v3535_v18 = vsel %vm98_vm1, %v3523_v4, 0.0 }
0x127f   :  { %3536 = vadd.xlane.f32.xlu1 %v3535_v18 }
0x1283   :  { %3624 = vrot.lane.b32.xlu0 %v4171_v55, %s4238_s29 }
0x1287   :  { %3527 = vadd.xlane.f32.xlu1 %v3526_v38 }
0x12e2   :  { %v3531_v37 = vpop.xlane.xlu0 %3530 }
0x12e3   :  { %v3539_v3 = vmul.f32 %v3531_v37, %v7103_v0 }
0x12e5   :  { %v6866_v31 = vsub.f32 %v3521_v58, %v3539_v3 }
0x12e7   :  { %v3547_v12 = vmul.f32 %v6866_v31, %v6866_v31 }
0x12e9   :  { %v3553_v6 = vsel %vm98_vm1, %v3547_v12, 0.0 }
0x12ea   :  { %v3534_v2 = vpop.xlane.xlu2 %3533  ;;  %3554 = vadd.xlane.f32.xlu1 %v3553_v6 }
0x12eb   :  { %v3540_v54 = vmul.f32 %v3534_v2, %v7103_v0 }
0x12ed   :  { %v6872_v63 = vsub.f32 %v3522_v36, %v3540_v54  ;;  %v3989_v54 = vld [vmem:[%s6933_s1 + $0x31] ss:$0 sm:$0xff] }
0x12ef   :  { %v3548_v46 = vmul.f32 %v6872_v63, %v6872_v63 }
0x12f1   :  { %v3556_v40 = vsel %vm98_vm1, %v3548_v46, 0.0 }
0x12f2   :  { %3557 = vadd.xlane.f32.xlu0 %v3556_v40  ;;  %v3537_v56 = vpop.xlane.xlu1 %3536 }
0x12f3   :  { %v3541_v13 = vmul.f32 %v3537_v56, %v7103_v0  ;;  %v3990_v56 = vld [vmem:[%s6933_s1 + $0x32] ss:$0 sm:$0xff] }
0x12f5   :  { %v6893_v14 = vsub.f32 %v3523_v4, %v3541_v13  ;;  %v3625_v52 = vpop.permute.xlu0 %3624  ;;  %v3694_v13 = vld [vmem:[%s6942_s10 + $0x10] sm:$0xff] }
0x12f7   :  { %v3549_v50 = vmul.f32 %v6893_v14, %v6893_v14 }
0x12f9   :  { %v3559_v39 = vsel %vm98_vm1, %v3549_v50, 0.0 }
0x12fa   :  { %v3528_v25 = vpop.xlane.xlu1 %3527 }
0x12fb   :  { %v3538_v10 = vmul.f32 %v3528_v25, %v7103_v0 }
0x12fd   :  { %v6878_v43 = vsub.f32 %v3520_v16, %v3538_v10 }
0x12ff   :  { %v3546_v26 = vmul.f32 %v6878_v43, %v6878_v43 }
0x1301   :  { %v3550_v20 = vsel %vm98_vm1, %v3546_v26, 0.0 }
0x1302   :  { %3551 = vadd.xlane.f32.xlu2 %v3550_v20 }
0x1303   :  { %3626 = vrot.lane.b32.xlu1 %v4172_v60, %s4238_s29 }
0x1306   :  { %3630 = vrot.lane.b32.xlu0 %v4173_v34, %s4238_s29 }
0x131a   :  { %3628 = vrot.lane.b32.xlu2 %v4174_v17, %s4238_s29 }
0x1343   :  { %3560 = vadd.xlane.f32.xlu2 %v3559_v39 }
0x135d   :  { %v3555_v57 = vpop.xlane.xlu1 %3554 }
0x135e   :  { %v3563_v62 = vmul.f32 %v3555_v57, %v7103_v0  ;;  %v3991_v57 = vld [vmem:[%s6942_s10 + $0x20] ss:$0 sm:$0xff] }
0x1360   :  { %v3567_v28 = vadd.f32 1e-05, %v3563_v62 }
0x1362   :  { %vm3586_vm14 = vweird.f32 %v3567_v28 }
0x1365   :  { %v3558_v5 = vpop.xlane.xlu0 %3557 }
0x1366   :  { %v3564_v41 = vmul.f32 %v3558_v5, %v7103_v0 }
0x1368   :  { %v3568_v23 = vadd.f32 1e-05, %v3564_v41 }
0x136a   :  { %4154 = vrsqrt.f32 %v3568_v23  ;;  %vm3596_vm13 = vweird.f32 %v3568_v23 }
0x136b   :  { %4156 = vrsqrt.f32 %v3567_v28 }
0x136c   :  { %3636 = vxpose.xlu2.b32.start [1/4] (short) (narrow) %v3625_v52, 8 }
0x1370   :  { %v4155_v51 = vpop.eup %4154 }
0x1371   :  { %v4157_v35 = vpop.eup %4156  ;;  %v3591_v53 = vmul.f32 %v4155_v51, %v3568_v23  ;;  %vm3597_vm11 = vweird.f32 %v4155_v51 }
0x1372   :  { %v3581_v30 = vmul.f32 %v4157_v35, %v3567_v28  ;;  %vm3587_vm12 = vweird.f32 %v4157_v35  ;;  %vm3598_vm4 = vmor %vm3596_vm13, %vm3597_vm11 }
0x1373   :  { %v3592_v59 = vmul.f32 %v4155_v51, %v3591_v53  ;;  %vm3588_vm2 = vmor %vm3586_vm14, %vm3587_vm12 }
0x1374   :  { %v3582_v58 = vmul.f32 %v4157_v35, %v3581_v30 }
0x1375   :  { %v3552_v49 = vpop.xlane.xlu2 %3551  ;;  %v3627_v47 = vpop.permute.xlu1 %3626  ;;  %v3593_v27 = vmul.f32 0.5, %v3592_v59 }
0x1376   :  { %3637 = vxpose.xlu2.b32.cont [2/4] (short) (narrow) %v3627_v47, 8  ;;  %v3562_v21 = vmul.f32 %v3552_v49, %v7103_v0  ;;  %v3583_v44 = vmul.f32 0.5, %v3582_v58 }
0x1377   :  { %v3594_v24 = vsub.f32 1.5, %v3593_v27 }
0x1378   :  { %v3631_v11 = vpop.permute.xlu0 %3630  ;;  %v3566_v33 = vadd.f32 1e-05, %v3562_v21  ;;  %v3584_v7 = vsub.f32 1.5, %v3583_v44 }
0x1379   :  { %v3595_v19 = vmul.f32 %v4155_v51, %v3594_v24 }
0x137a   :  { %4158 = vrsqrt.f32 %v3566_v33  ;;  %v3585_v22 = vmul.f32 %v4157_v35, %v3584_v7  ;;  %vm3576_vm3 = vweird.f32 %v3566_v33 }
0x137b   :  { %v3599_v18 = vsel %vm3598_vm4, %v4155_v51, %v3595_v19 }
0x137c   :  { %v3589_v38 = vsel %vm3588_vm2, %v4157_v35, %v3585_v22  ;;  %v3612_v3 = vmul.f32 %v3599_v18, %v6872_v63 }
0x137d   :  { %v3629_v29 = vpop.permute.xlu2 %3628  ;;  %v3611_v46 = vmul.f32 %v3589_v38, %v6866_v31  ;;  %v3695_v31 = vld [vmem:[%s6942_s10 + $0x18] sm:$0xff] }
0x137e   :  { %3638 = vxpose.xlu2.b32.cont [3/4] (short) (narrow) %v3629_v29, 8  ;;  %v3617_v25 = vmul.f32 %v3989_v54, %v3612_v3  ;;  %3713 = vmatpush.msrb.mxu0 %v3695_v31 }
0x137f   :  { %v3616_v63 = vmul.f32 %v3989_v54, %v3611_v46 }
0x1380   :  { %v4159_v8 = vpop.eup %4158  ;;  %v3622_v20 = vadd.f32 %v3990_v56, %v3617_v25  ;;  %3714 = vmatpush.msrb.mxu0 %v3694_v13 }
0x1381   :  { %v3571_v61 = vmul.f32 %v4159_v8, %v3566_v33  ;;  %vm3577_vm15 = vweird.f32 %v4159_v8  ;;  %v3621_v34 = vadd.f32 %v3990_v56, %v3616_v63 }
0x1382   :  { %vm3578_vm5 = vmor %vm3576_vm3, %vm3577_vm15 }
0x1383   :  { %v3572_v1 = vmul.f32 %v4159_v8, %v3571_v61 }
0x1385   :  { %v3573_v36 = vmul.f32 0.5, %v3572_v1 }
0x1386   :  { %3639 = vxpose.xlu2.b32.end [4/4] (short) (narrow) %v3631_v11, 8 }
0x1387   :  { %v3574_v42 = vsub.f32 1.5, %v3573_v36 }
0x1389   :  { %v3575_v16 = vmul.f32 %v4159_v8, %v3574_v42 }
0x138b   :  { %v3579_v12 = vsel %vm3578_vm5, %v4159_v8, %v3575_v16 }
0x138c   :  { %v3610_v10 = vmul.f32 %v3579_v12, %v6878_v43  ;;  %v3693_v43 = vld [vmem:[%s6942_s10 + $0x8] sm:$0xff] }
0x138d   :  { %3715 = vmatpush.msrb.mxu0 %v3693_v43 }
0x138e   :  { %v3615_v60 = vmul.f32 %v3989_v54, %v3610_v10 }
0x1390   :  { %v3620_v17 = vadd.f32 %v3990_v56, %v3615_v60 }
0x13b6   :  { %v3561_v15 = vpop.xlane.xlu2 %3560 }
0x13b7   :  { %v3565_v9 = vmul.f32 %v3561_v15, %v7103_v0 }
0x13b9   :  { %v3569_v48 = vadd.f32 1e-05, %v3565_v9 }
0x13bb   :  { %4160 = vrsqrt.f32 %v3569_v48  ;;  %vm3606_vm6 = vweird.f32 %v3569_v48 }
0x13c1   :  { %v4161_v45 = vpop.eup %4160 }
0x13c2   :  { %v3601_v32 = vmul.f32 %v4161_v45, %v3569_v48  ;;  %vm3607_vm0 = vweird.f32 %v4161_v45 }
0x13c3   :  { %vm3608_vm7 = vmor %vm3606_vm6, %vm3607_vm0 }
0x13c4   :  { %v3602_v4 = vmul.f32 %v4161_v45, %v3601_v32 }
0x13c6   :  { %v3603_v0 = vmul.f32 0.5, %v3602_v4 }
0x13c8   :  { %v3604_v55 = vsub.f32 1.5, %v3603_v0 }
0x13ca   :  { %v3605_v37 = vmul.f32 %v4161_v45, %v3604_v55 }
0x13cc   :  { %v3609_v6 = vsel %vm3608_vm7, %v4161_v45, %v3605_v37 }
0x13cd   :  { %v3613_v2 = vmul.f32 %v3609_v6, %v6893_v14  ;;  %v3692_v14 = vld [vmem:[%s6942_s10] sm:$0xff] }
0x13ce   :  { %3716 = vmatpush.msrb.mxu0 %v3692_v14 }
0x13cf   :  { %v3618_v40 = vmul.f32 %v3989_v54, %v3613_v2 }
0x13d1   :  { %v3623_v26 = vadd.f32 %v3990_v56, %v3618_v40 }
0x13d3   :  { %3683 = vmatpush.msrb.mxu3 %v3623_v26 }
0x13d5   :  { %3684 = vmatpush.msrb.mxu3 %v3622_v20 }
0x13d7   :  { %3685 = vmatpush.msrb.mxu3 %v3621_v34 }
0x13d9   :  { %3686 = vmatpush.msrb.mxu3 %v3620_v17 }
0x1407   :  { %v3652_v50 = vpop.trf.xlu2 }
0x1408   :  { %3854 = vmatmul.msk.f32.vlgmr.msrb.gmra.mxu3 %vm98_vm1, %v3652_v50 }
0x148b   :  { %v3688_v39 = vpop.f32.mrf.mxu3 }
0x148c   :  { %v3691_v52 = vmul.f32 0.0625, %v3688_v39 }
0x148e   :  { %3855 = vmatmul.msk.f32.vlgmr.msrb.gmra.mxu0 %vm98_vm1, %v3691_v52 }
0x150b   :  { %v3718_v49 = vpop.f32.mrf.mxu0 }
0x150c   :  { %v3719_v47 = vadd.f32 %v3991_v57, %v3718_v49 }
0x150e   :  { %3721 = vst [vmem:[#allocation2] sm:$0x3] %v3719_v47 }
0x150f   :  { %3732 = dma.vmem_to_hbm [thread:$0]  %s3728_s25, 32, %s3730_s27, [#allocation3]  }
0x1510   :  { %4199 = dma.done.wait [#allocation3], 32  }
0x1511   :  { %4200 = vsyncadd [#allocation3], 4294967264 }
0x1512   :  { %3737 = vsyncpa [#allocation3], 1 }

</bundles_post_ra>
